<compile_context>
chip_gen: v6e
topology: v6e:2x2x1
jax: 0.10.0
libtpu: 0.0.40
codegen_flags: <defaults>
</compile_context>

<pallas_src>
from functools import partial

import jax
import jax.numpy as jnp
from jax.experimental import pallas as pl
from jax.experimental.pallas import tpu as pltpu


def _round_up(v, m):
    return (v + m - 1) // m * m


# ---------------------------------------------------------------------------
# Fused kernel (one batch element per grid step)
# ---------------------------------------------------------------------------
def _basic_block_kernel(x_ref, w1_ref, w2_ref, mask_ref, out_ref,
                        vol_ref, patch_ref, *, dims, pad, bias_row):
    # x_ref    : (C, DHW)          f32   input, channels-first, flat (d,h,w)
    # w1_ref   : (C, Kp)           bf16  im2col weights (BN1 scale folded),
    #                                    column `bias_row` holds the BN1 bias
    # w2_ref   : (C, Kp)           bf16  same for conv2 / BN2
    # mask_ref : (27, DHW)         bf16  per-tap boundary masks (1.0 / 0.0)
    # out_ref  : (C, DHW)          f32
    # vol_ref  : (C, 2*pad + DHW)  bf16  scratch: flat volume with zero halos
    #                                    (reused for the conv1 activation)
    # patch_ref: (Kp, DHW)         bf16  scratch: transposed im2col patches
    D, H, W = dims
    C, DHW = out_ref.shape
    Kp = patch_ref.shape[0]

    # Constant K-padding rows: row `bias_row` = 1.0 (pairs with the bias
    # column of the weights), remaining tail rows = 0.0.  Rewritten every
    # step: scratch VMEM may hold stale/NaN bits and a program_id-gated init
    # is unsafe under the 'parallel' batch axis.
    pad_rows = Kp - bias_row
    row_id = jax.lax.broadcasted_iota(jnp.int32, (pad_rows, DHW), 0)
    patch_ref[bias_row:Kp, :] = jnp.where(row_id == 0, 1.0, 0.0).astype(patch_ref.dtype)

    # Zero only the halo strips; the interior is fully overwritten below.
    zeros_halo = jnp.zeros((C, pad), vol_ref.dtype)
    vol_ref[:, 0:pad] = zeros_halo
    vol_ref[:, pad + DHW:] = zeros_halo

    def build_patch():
        # Transposed im2col: tap t = (kd*3+kh)*3+kw fills rows [t*C,(t+1)*C).
        # Each tap is a static lane shift of the flat volume; wrap-around at
        # the d/h/w edges is zeroed by the precomputed lane mask.  Every
        # store is C sublane rows x DHW dense lanes.
        t = 0
        for kd in range(3):
            for kh in range(3):
                for kw in range(3):
                    delta = (kd - 1) * H * W + (kh - 1) * W + (kw - 1)
                    s = pad + delta
                    tap = vol_ref[:, s:s + DHW]
                    patch_ref[t * C:(t + 1) * C, :] = tap * mask_ref[t:t + 1, :]
                    t += 1

    # ---- conv1 as one fat-K matmul (lane-dense (C, DHW) result) + bn1 + relu
    vol_ref[:, pad:pad + DHW] = x_ref[...].astype(vol_ref.dtype)
    build_patch()
    y = jnp.dot(w1_ref[...], patch_ref[...], preferred_element_type=jnp.float32)
    y = jnp.maximum(y, 0.0)

    # ---- conv2 + bn2 + residual + relu (intermediate never leaves VMEM) ----
    vol_ref[:, pad:pad + DHW] = y.astype(vol_ref.dtype)   # halos still zero
    build_patch()
    y = jnp.dot(w2_ref[...], patch_ref[...], preferred_element_type=jnp.float32)
    y = jnp.maximum(y + x_ref[...], 0.0)                  # residual read once, f32
    out_ref[...] = y.astype(out_ref.dtype)


# ---------------------------------------------------------------------------
# pallas_call wrapper (grid over batch; lane-dense in/out slabs)
# ---------------------------------------------------------------------------
def _basic_block_pallas(x_flat, w1, w2, masks, dims):
    N, C, DHW = x_flat.shape
    D, H, W = dims
    Kp = w1.shape[1]
    pad = max(128, _round_up(H * W + W + 1, 128))   # halo >= max |tap shift|

    kernel = partial(_basic_block_kernel, dims=dims, pad=pad, bias_row=27 * C)
    return pl.pallas_call(
        kernel,
        out_shape=jax.ShapeDtypeStruct((N, C, DHW), x_flat.dtype),
        grid=(N,),
        in_specs=[
            pl.BlockSpec((None, C, DHW), lambda n: (n, 0, 0)),   # x
            pl.BlockSpec((C, Kp), lambda n: (0, 0)),             # w1 (grid-invariant)
            pl.BlockSpec((C, Kp), lambda n: (0, 0)),             # w2
            pl.BlockSpec((27, DHW), lambda n: (0, 0)),           # tap masks
        ],
        out_specs=pl.BlockSpec((None, C, DHW), lambda n: (n, 0, 0)),
        scratch_shapes=[
            pltpu.VMEM((C, DHW + 2 * pad), jnp.bfloat16),   # flat padded volume
            pltpu.VMEM((Kp, DHW), jnp.bfloat16),            # transposed im2col
        ],
        compiler_params=pltpu.CompilerParams(
            dimension_semantics=("parallel",)),
    )(x_flat, w1, w2, masks)


# ---------------------------------------------------------------------------
# Host-side parameter preparation: fold BN into weights / bias column,
# precompute the per-tap boundary masks.
# ---------------------------------------------------------------------------
def make_basic_block_params(w1_oidhw, bn1, w2_oidhw, bn2, spatial, eps=1e-5):
    D, H, W = spatial
    dhw = D * H * W

    def fold(w_oidhw, gamma, beta, mean, var):
        cout, cin = w_oidhw.shape[0], w_oidhw.shape[1]
        scale = gamma / jnp.sqrt(var + eps)                        # (cout,)
        bias = beta - mean * scale                                 # (cout,)
        # (cout,cin,kd,kh,kw) -> (cout,kd,kh,kw,cin) -> (cout, 27*cin); fold scale in f32.
        w = jnp.transpose(w_oidhw, (0, 2, 3, 4, 1)).reshape(cout, 27 * cin)
        w = w * scale[:, None]
        kk = 27 * cin
        kp = max(128, _round_up(kk + 1, 128))
        wmat = jnp.zeros((cout, kp), jnp.float32)
        wmat = wmat.at[:, :kk].set(w)
        wmat = wmat.at[:, kk].set(bias)     # bias column, pairs with all-ones patch row
        return wmat.astype(jnp.bfloat16)

    # Per-tap boundary masks for the flat lane-shift im2col.
    d_i, h_i, w_i = jnp.meshgrid(jnp.arange(D), jnp.arange(H), jnp.arange(W),
                                 indexing="ij")
    masks = []
    for kd in range(3):
        for kh in range(3):
            for kw in range(3):
                ok = ((d_i + kd - 1 >= 0) & (d_i + kd - 1 < D) &
                      (h_i + kh - 1 >= 0) & (h_i + kh - 1 < H) &
                      (w_i + kw - 1 >= 0) & (w_i + kw - 1 < W))
                masks.append(ok.reshape(dhw))
    masks = jnp.stack(masks).astype(jnp.bfloat16)                  # (27, DHW)

    return {"w1": fold(w1_oidhw, *bn1), "w2": fold(w2_oidhw, *bn2), "masks": masks}


@jax.jit
def basic_block_forward(x_ncdhw, params):
    N, C, D, H, W = x_ncdhw.shape
    # NCDHW is already channels-first: a free reshape gives the lane-dense slab.
    x_flat = x_ncdhw.reshape(N, C, D * H * W)
    out = _basic_block_pallas(x_flat, params["w1"], params["w2"],
                              params["masks"], (D, H, W))
    return out.reshape(N, C, D, H, W)


# ---------------------------------------------------------------------------
# Pure-JAX reference (for correctness check)
# ---------------------------------------------------------------------------
def _ref_forward(x, w1, w2, bn1, bn2, eps=1e-5):
    def conv(x, w):
        return jax.lax.conv_general_dilated(
            x, w, window_strides=(1, 1, 1),
            padding=((1, 1), (1, 1), (1, 1)),
            dimension_numbers=("NCDHW", "OIDHW", "NCDHW"),
            precision=jax.lax.Precision.HIGHEST)

    def bn(x, gamma, beta, mean, var):
        s = gamma / jnp.sqrt(var + eps)
        b = beta - mean * s
        return x * s[None, :, None, None, None] + b[None, :, None, None, None]

    out = jax.nn.relu(bn(conv(x, w1), *bn1))
    out = bn(conv(out, w2), *bn2)
    return jax.nn.relu(out + x)


# ---------------------------------------------------------------------------
if __name__ == "__main__":
    key = jax.random.PRNGKey(0)
    ks = jax.random.split(key, 11)

    N, C, D, H, W = 2, 4, 8, 8, 8
    planes = C          # stride=1, downsample=None => in_planes == planes
    eps = 1e-5

    x = jax.random.normal(ks[0], (N, C, D, H, W), jnp.float32)

    # Conv weights in PyTorch layout (out, in, kd, kh, kw), no bias.
    w1_t = 0.1 * jax.random.normal(ks[1], (planes, C, 3, 3, 3), jnp.float32)
    w2_t = 0.1 * jax.random.normal(ks[2], (planes, planes, 3, 3, 3), jnp.float32)

    # BatchNorm3d parameters / running stats (deterministic, non-trivial).
    gamma1 = 1.0 + 0.1 * jax.random.normal(ks[3], (planes,), jnp.float32)
    beta1 = 0.1 * jax.random.normal(ks[4], (planes,), jnp.float32)
    mean1 = 0.05 * jax.random.normal(ks[5], (planes,), jnp.float32)
    var1 = 0.5 + jax.random.uniform(ks[6], (planes,), jnp.float32)

    gamma2 = 1.0 + 0.1 * jax.random.normal(ks[7], (planes,), jnp.float32)
    beta2 = 0.1 * jax.random.normal(ks[8], (planes,), jnp.float32)
    mean2 = 0.05 * jax.random.normal(ks[9], (planes,), jnp.float32)
    var2 = 0.5 + jax.random.uniform(ks[10], (planes,), jnp.float32)

    params = make_basic_block_params(
        w1_t, (gamma1, beta1, mean1, var1),
        w2_t, (gamma2, beta2, mean2, var2),
        spatial=(D, H, W), eps=eps)

    out = basic_block_forward(x, params)
    out = jax.block_until_ready(out)

    ref = _ref_forward(x, w1_t, w2_t,
                       (gamma1, beta1, mean1, var1),
                       (gamma2, beta2, mean2, var2), eps)
    ref = jax.block_until_ready(ref)

    assert out.shape == (N, C, D, H, W), out.shape
    # bf16 matmul inputs with f32 accumulation -> looser tolerance than the
    # f32-HIGHEST reference.
    assert jnp.allclose(out, ref, rtol=5e-2, atol=5e-2), (
        float(jnp.max(jnp.abs(out - ref))))

    print("KERNEL_OK")
</pallas_src>

<mosaic_0001>
module attributes {stable_mosaic.version = 11 : i64} {
  func.func @_basic_block_kernel(%arg0: i32, %arg1: memref<1x4x512xf32, #tpu.memory_space<vmem>>, %arg2: memref<4x128xbf16, #tpu.memory_space<vmem>>, %arg3: memref<4x128xbf16, #tpu.memory_space<vmem>>, %arg4: memref<27x512xbf16, #tpu.memory_space<vmem>>, %arg5: memref<1x4x512xf32, #tpu.memory_space<vmem>>, %arg6: memref<4x768xbf16, #tpu.memory_space<vmem>>, %arg7: memref<128x512xbf16, #tpu.memory_space<vmem>>) attributes {dimension_semantics = [#tpu.dimension_semantics<parallel>], iteration_bounds = array<i64: 2>, scalar_prefetch = 0 : i64, scratch_operands = 2 : i64, tpu.core_type = #tpu.core_type<tc>, window_params = [{transform_indices = @transform_0, window_bounds = array<i64: 1, 4, 512>}, {pipeline_mode = #tpu.pipeline_mode<synchronous>, transform_indices = @transform_1, window_bounds = array<i64: 4, 128>}, {pipeline_mode = #tpu.pipeline_mode<synchronous>, transform_indices = @transform_2, window_bounds = array<i64: 4, 128>}, {pipeline_mode = #tpu.pipeline_mode<synchronous>, transform_indices = @transform_3, window_bounds = array<i64: 27, 512>}, {transform_indices = @transform_4, window_bounds = array<i64: 1, 4, 512>}]} {
    %0 = tpu.iota {dimensions = array<i32: 0>} : vector<20x512xi32>
    %c0_i32 = arith.constant 0 : i32
    %1 = vector.broadcast %c0_i32 : i32 to vector<20x512xi32>
    %2 = arith.cmpi eq, %0, %1 : vector<20x512xi32>
    %cst = arith.constant 1.000000e+00 : f32
    %cst_0 = arith.constant 0.000000e+00 : f32
    %3 = vector.broadcast %cst : f32 to vector<20x512xf32>
    %4 = vector.broadcast %cst_0 : f32 to vector<20x512xf32>
    %5 = arith.select %2, %3, %4 : vector<20x512xi1>, vector<20x512xf32>
    %6 = arith.truncf %5 : vector<20x512xf32> to vector<20x512xbf16>
    %c108 = arith.constant 108 : index
    %c0 = arith.constant 0 : index
    %7 = vector.load %arg7[%c108, %c0] : memref<128x512xbf16, #tpu.memory_space<vmem>>, vector<20x512xbf16>
    tpu.vector_store %arg7[%c108, %c0], %6 {strides = array<i32>} : memref<128x512xbf16, #tpu.memory_space<vmem>>, vector<20x512xbf16>,
    %cst_1 = arith.constant 0.000000e+00 : bf16
    %8 = vector.broadcast %cst_1 : bf16 to vector<4x128xbf16>
    %c0_2 = arith.constant 0 : index
    %c0_3 = arith.constant 0 : index
    %9 = vector.load %arg6[%c0_2, %c0_3] : memref<4x768xbf16, #tpu.memory_space<vmem>>, vector<4x128xbf16>
    tpu.vector_store %arg6[%c0_2, %c0_3], %8 {strides = array<i32>} : memref<4x768xbf16, #tpu.memory_space<vmem>>, vector<4x128xbf16>,
    %c0_4 = arith.constant 0 : index
    %c640 = arith.constant 640 : index
    %10 = vector.load %arg6[%c0_4, %c640] : memref<4x768xbf16, #tpu.memory_space<vmem>>, vector<4x128xbf16>
    tpu.vector_store %arg6[%c0_4, %c640], %8 {strides = array<i32>} : memref<4x768xbf16, #tpu.memory_space<vmem>>, vector<4x128xbf16>,
    %c0_5 = arith.constant 0 : index
    %c0_6 = arith.constant 0 : index
    %c0_7 = arith.constant 0 : index
    %11 = vector.load %arg1[%c0_5, %c0_6, %c0_7] : memref<1x4x512xf32, #tpu.memory_space<vmem>>, vector<1x4x512xf32>
    %12 = vector.shape_cast %11 : vector<1x4x512xf32> to vector<4x512xf32>
    %13 = arith.truncf %12 : vector<4x512xf32> to vector<4x512xbf16>
    %c0_8 = arith.constant 0 : index
    %c128 = arith.constant 128 : index
    %14 = vector.load %arg6[%c0_8, %c128] : memref<4x768xbf16, #tpu.memory_space<vmem>>, vector<4x512xbf16>
    tpu.vector_store %arg6[%c0_8, %c128], %13 {strides = array<i32>} : memref<4x768xbf16, #tpu.memory_space<vmem>>, vector<4x512xbf16>,
    %c0_9 = arith.constant 0 : index
    %c55 = arith.constant 55 : index
    %15 = vector.load %arg6[%c0_9, %c55] : memref<4x768xbf16, #tpu.memory_space<vmem>>, vector<4x512xbf16>
    %c0_10 = arith.constant 0 : index
    %c0_11 = arith.constant 0 : index
    %16 = vector.load %arg4[%c0_10, %c0_11] : memref<27x512xbf16, #tpu.memory_space<vmem>>, vector<1x512xbf16>
    %17 = vector.broadcast %16 : vector<1x512xbf16> to vector<4x512xbf16>
    %18 = arith.mulf %15, %17 : vector<4x512xbf16>
    %c0_12 = arith.constant 0 : index
    %c0_13 = arith.constant 0 : index
    %19 = vector.load %arg7[%c0_12, %c0_13] : memref<128x512xbf16, #tpu.memory_space<vmem>>, vector<4x512xbf16>
    tpu.vector_store %arg7[%c0_12, %c0_13], %18 {strides = array<i32>} : memref<128x512xbf16, #tpu.memory_space<vmem>>, vector<4x512xbf16>,
    %c0_14 = arith.constant 0 : index
    %c56 = arith.constant 56 : index
    %20 = vector.load %arg6[%c0_14, %c56] : memref<4x768xbf16, #tpu.memory_space<vmem>>, vector<4x512xbf16>
    %c1 = arith.constant 1 : index
    %c0_15 = arith.constant 0 : index
    %21 = vector.load %arg4[%c1, %c0_15] : memref<27x512xbf16, #tpu.memory_space<vmem>>, vector<1x512xbf16>
    %22 = vector.broadcast %21 : vector<1x512xbf16> to vector<4x512xbf16>
    %23 = arith.mulf %20, %22 : vector<4x512xbf16>
    %c4 = arith.constant 4 : index
    %c0_16 = arith.constant 0 : index
    %24 = vector.load %arg7[%c4, %c0_16] : memref<128x512xbf16, #tpu.memory_space<vmem>>, vector<4x512xbf16>
    tpu.vector_store %arg7[%c4, %c0_16], %23 {strides = array<i32>} : memref<128x512xbf16, #tpu.memory_space<vmem>>, vector<4x512xbf16>,
    %c0_17 = arith.constant 0 : index
    %c57 = arith.constant 57 : index
    %25 = vector.load %arg6[%c0_17, %c57] : memref<4x768xbf16, #tpu.memory_space<vmem>>, vector<4x512xbf16>
    %c2 = arith.constant 2 : index
    %c0_18 = arith.constant 0 : index
    %26 = vector.load %arg4[%c2, %c0_18] : memref<27x512xbf16, #tpu.memory_space<vmem>>, vector<1x512xbf16>
    %27 = vector.broadcast %26 : vector<1x512xbf16> to vector<4x512xbf16>
    %28 = arith.mulf %25, %27 : vector<4x512xbf16>
    %c8 = arith.constant 8 : index
    %c0_19 = arith.constant 0 : index
    %29 = vector.load %arg7[%c8, %c0_19] : memref<128x512xbf16, #tpu.memory_space<vmem>>, vector<4x512xbf16>
    tpu.vector_store %arg7[%c8, %c0_19], %28 {strides = array<i32>} : memref<128x512xbf16, #tpu.memory_space<vmem>>, vector<4x512xbf16>,
    %c0_20 = arith.constant 0 : index
    %c63 = arith.constant 63 : index
    %30 = vector.load %arg6[%c0_20, %c63] : memref<4x768xbf16, #tpu.memory_space<vmem>>, vector<4x512xbf16>
    %c3 = arith.constant 3 : index
    %c0_21 = arith.constant 0 : index
    %31 = vector.load %arg4[%c3, %c0_21] : memref<27x512xbf16, #tpu.memory_space<vmem>>, vector<1x512xbf16>
    %32 = vector.broadcast %31 : vector<1x512xbf16> to vector<4x512xbf16>
    %33 = arith.mulf %30, %32 : vector<4x512xbf16>
    %c12 = arith.constant 12 : index
    %c0_22 = arith.constant 0 : index
    %34 = vector.load %arg7[%c12, %c0_22] : memref<128x512xbf16, #tpu.memory_space<vmem>>, vector<4x512xbf16>
    tpu.vector_store %arg7[%c12, %c0_22], %33 {strides = array<i32>} : memref<128x512xbf16, #tpu.memory_space<vmem>>, vector<4x512xbf16>,
    %c0_23 = arith.constant 0 : index
    %c64 = arith.constant 64 : index
    %35 = vector.load %arg6[%c0_23, %c64] : memref<4x768xbf16, #tpu.memory_space<vmem>>, vector<4x512xbf16>
    %c4_24 = arith.constant 4 : index
    %c0_25 = arith.constant 0 : index
    %36 = vector.load %arg4[%c4_24, %c0_25] : memref<27x512xbf16, #tpu.memory_space<vmem>>, vector<1x512xbf16>
    %37 = vector.broadcast %36 : vector<1x512xbf16> to vector<4x512xbf16>
    %38 = arith.mulf %35, %37 : vector<4x512xbf16>
    %c16 = arith.constant 16 : index
    %c0_26 = arith.constant 0 : index
    %39 = vector.load %arg7[%c16, %c0_26] : memref<128x512xbf16, #tpu.memory_space<vmem>>, vector<4x512xbf16>
    tpu.vector_store %arg7[%c16, %c0_26], %38 {strides = array<i32>} : memref<128x512xbf16, #tpu.memory_space<vmem>>, vector<4x512xbf16>,
    %c0_27 = arith.constant 0 : index
    %c65 = arith.constant 65 : index
    %40 = vector.load %arg6[%c0_27, %c65] : memref<4x768xbf16, #tpu.memory_space<vmem>>, vector<4x512xbf16>
    %c5 = arith.constant 5 : index
    %c0_28 = arith.constant 0 : index
    %41 = vector.load %arg4[%c5, %c0_28] : memref<27x512xbf16, #tpu.memory_space<vmem>>, vector<1x512xbf16>
    %42 = vector.broadcast %41 : vector<1x512xbf16> to vector<4x512xbf16>
    %43 = arith.mulf %40, %42 : vector<4x512xbf16>
    %c20 = arith.constant 20 : index
    %c0_29 = arith.constant 0 : index
    %44 = vector.load %arg7[%c20, %c0_29] : memref<128x512xbf16, #tpu.memory_space<vmem>>, vector<4x512xbf16>
    tpu.vector_store %arg7[%c20, %c0_29], %43 {strides = array<i32>} : memref<128x512xbf16, #tpu.memory_space<vmem>>, vector<4x512xbf16>,
    %c0_30 = arith.constant 0 : index
    %c71 = arith.constant 71 : index
    %45 = vector.load %arg6[%c0_30, %c71] : memref<4x768xbf16, #tpu.memory_space<vmem>>, vector<4x512xbf16>
    %c6 = arith.constant 6 : index
    %c0_31 = arith.constant 0 : index
    %46 = vector.load %arg4[%c6, %c0_31] : memref<27x512xbf16, #tpu.memory_space<vmem>>, vector<1x512xbf16>
    %47 = vector.broadcast %46 : vector<1x512xbf16> to vector<4x512xbf16>
    %48 = arith.mulf %45, %47 : vector<4x512xbf16>
    %c24 = arith.constant 24 : index
    %c0_32 = arith.constant 0 : index
    %49 = vector.load %arg7[%c24, %c0_32] : memref<128x512xbf16, #tpu.memory_space<vmem>>, vector<4x512xbf16>
    tpu.vector_store %arg7[%c24, %c0_32], %48 {strides = array<i32>} : memref<128x512xbf16, #tpu.memory_space<vmem>>, vector<4x512xbf16>,
    %c0_33 = arith.constant 0 : index
    %c72 = arith.constant 72 : index
    %50 = vector.load %arg6[%c0_33, %c72] : memref<4x768xbf16, #tpu.memory_space<vmem>>, vector<4x512xbf16>
    %c7 = arith.constant 7 : index
    %c0_34 = arith.constant 0 : index
    %51 = vector.load %arg4[%c7, %c0_34] : memref<27x512xbf16, #tpu.memory_space<vmem>>, vector<1x512xbf16>
    %52 = vector.broadcast %51 : vector<1x512xbf16> to vector<4x512xbf16>
    %53 = arith.mulf %50, %52 : vector<4x512xbf16>
    %c28 = arith.constant 28 : index
    %c0_35 = arith.constant 0 : index
    %54 = vector.load %arg7[%c28, %c0_35] : memref<128x512xbf16, #tpu.memory_space<vmem>>, vector<4x512xbf16>
    tpu.vector_store %arg7[%c28, %c0_35], %53 {strides = array<i32>} : memref<128x512xbf16, #tpu.memory_space<vmem>>, vector<4x512xbf16>,
    %c0_36 = arith.constant 0 : index
    %c73 = arith.constant 73 : index
    %55 = vector.load %arg6[%c0_36, %c73] : memref<4x768xbf16, #tpu.memory_space<vmem>>, vector<4x512xbf16>
    %c8_37 = arith.constant 8 : index
    %c0_38 = arith.constant 0 : index
    %56 = vector.load %arg4[%c8_37, %c0_38] : memref<27x512xbf16, #tpu.memory_space<vmem>>, vector<1x512xbf16>
    %57 = vector.broadcast %56 : vector<1x512xbf16> to vector<4x512xbf16>
    %58 = arith.mulf %55, %57 : vector<4x512xbf16>
    %c32 = arith.constant 32 : index
    %c0_39 = arith.constant 0 : index
    %59 = vector.load %arg7[%c32, %c0_39] : memref<128x512xbf16, #tpu.memory_space<vmem>>, vector<4x512xbf16>
    tpu.vector_store %arg7[%c32, %c0_39], %58 {strides = array<i32>} : memref<128x512xbf16, #tpu.memory_space<vmem>>, vector<4x512xbf16>,
    %c0_40 = arith.constant 0 : index
    %c119 = arith.constant 119 : index
    %60 = vector.load %arg6[%c0_40, %c119] : memref<4x768xbf16, #tpu.memory_space<vmem>>, vector<4x512xbf16>
    %c9 = arith.constant 9 : index
    %c0_41 = arith.constant 0 : index
    %61 = vector.load %arg4[%c9, %c0_41] : memref<27x512xbf16, #tpu.memory_space<vmem>>, vector<1x512xbf16>
    %62 = vector.broadcast %61 : vector<1x512xbf16> to vector<4x512xbf16>
    %63 = arith.mulf %60, %62 : vector<4x512xbf16>
    %c36 = arith.constant 36 : index
    %c0_42 = arith.constant 0 : index
    %64 = vector.load %arg7[%c36, %c0_42] : memref<128x512xbf16, #tpu.memory_space<vmem>>, vector<4x512xbf16>
    tpu.vector_store %arg7[%c36, %c0_42], %63 {strides = array<i32>} : memref<128x512xbf16, #tpu.memory_space<vmem>>, vector<4x512xbf16>,
    %c0_43 = arith.constant 0 : index
    %c120 = arith.constant 120 : index
    %65 = vector.load %arg6[%c0_43, %c120] : memref<4x768xbf16, #tpu.memory_space<vmem>>, vector<4x512xbf16>
    %c10 = arith.constant 10 : index
    %c0_44 = arith.constant 0 : index
    %66 = vector.load %arg4[%c10, %c0_44] : memref<27x512xbf16, #tpu.memory_space<vmem>>, vector<1x512xbf16>
    %67 = vector.broadcast %66 : vector<1x512xbf16> to vector<4x512xbf16>
    %68 = arith.mulf %65, %67 : vector<4x512xbf16>
    %c40 = arith.constant 40 : index
    %c0_45 = arith.constant 0 : index
    %69 = vector.load %arg7[%c40, %c0_45] : memref<128x512xbf16, #tpu.memory_space<vmem>>, vector<4x512xbf16>
    tpu.vector_store %arg7[%c40, %c0_45], %68 {strides = array<i32>} : memref<128x512xbf16, #tpu.memory_space<vmem>>, vector<4x512xbf16>,
    %c0_46 = arith.constant 0 : index
    %c121 = arith.constant 121 : index
    %70 = vector.load %arg6[%c0_46, %c121] : memref<4x768xbf16, #tpu.memory_space<vmem>>, vector<4x512xbf16>
    %c11 = arith.constant 11 : index
    %c0_47 = arith.constant 0 : index
    %71 = vector.load %arg4[%c11, %c0_47] : memref<27x512xbf16, #tpu.memory_space<vmem>>, vector<1x512xbf16>
    %72 = vector.broadcast %71 : vector<1x512xbf16> to vector<4x512xbf16>
    %73 = arith.mulf %70, %72 : vector<4x512xbf16>
    %c44 = arith.constant 44 : index
    %c0_48 = arith.constant 0 : index
    %74 = vector.load %arg7[%c44, %c0_48] : memref<128x512xbf16, #tpu.memory_space<vmem>>, vector<4x512xbf16>
    tpu.vector_store %arg7[%c44, %c0_48], %73 {strides = array<i32>} : memref<128x512xbf16, #tpu.memory_space<vmem>>, vector<4x512xbf16>,
    %c0_49 = arith.constant 0 : index
    %c127 = arith.constant 127 : index
    %75 = vector.load %arg6[%c0_49, %c127] : memref<4x768xbf16, #tpu.memory_space<vmem>>, vector<4x512xbf16>
    %c12_50 = arith.constant 12 : index
    %c0_51 = arith.constant 0 : index
    %76 = vector.load %arg4[%c12_50, %c0_51] : memref<27x512xbf16, #tpu.memory_space<vmem>>, vector<1x512xbf16>
    %77 = vector.broadcast %76 : vector<1x512xbf16> to vector<4x512xbf16>
    %78 = arith.mulf %75, %77 : vector<4x512xbf16>
    %c48 = arith.constant 48 : index
    %c0_52 = arith.constant 0 : index
    %79 = vector.load %arg7[%c48, %c0_52] : memref<128x512xbf16, #tpu.memory_space<vmem>>, vector<4x512xbf16>
    tpu.vector_store %arg7[%c48, %c0_52], %78 {strides = array<i32>} : memref<128x512xbf16, #tpu.memory_space<vmem>>, vector<4x512xbf16>,
    %c0_53 = arith.constant 0 : index
    %c128_54 = arith.constant 128 : index
    %80 = vector.load %arg6[%c0_53, %c128_54] : memref<4x768xbf16, #tpu.memory_space<vmem>>, vector<4x512xbf16>
    %c13 = arith.constant 13 : index
    %c0_55 = arith.constant 0 : index
    %81 = vector.load %arg4[%c13, %c0_55] : memref<27x512xbf16, #tpu.memory_space<vmem>>, vector<1x512xbf16>
    %82 = vector.broadcast %81 : vector<1x512xbf16> to vector<4x512xbf16>
    %83 = arith.mulf %80, %82 : vector<4x512xbf16>
    %c52 = arith.constant 52 : index
    %c0_56 = arith.constant 0 : index
    %84 = vector.load %arg7[%c52, %c0_56] : memref<128x512xbf16, #tpu.memory_space<vmem>>, vector<4x512xbf16>
    tpu.vector_store %arg7[%c52, %c0_56], %83 {strides = array<i32>} : memref<128x512xbf16, #tpu.memory_space<vmem>>, vector<4x512xbf16>,
    %c0_57 = arith.constant 0 : index
    %c129 = arith.constant 129 : index
    %85 = vector.load %arg6[%c0_57, %c129] : memref<4x768xbf16, #tpu.memory_space<vmem>>, vector<4x512xbf16>
    %c14 = arith.constant 14 : index
    %c0_58 = arith.constant 0 : index
    %86 = vector.load %arg4[%c14, %c0_58] : memref<27x512xbf16, #tpu.memory_space<vmem>>, vector<1x512xbf16>
    %87 = vector.broadcast %86 : vector<1x512xbf16> to vector<4x512xbf16>
    %88 = arith.mulf %85, %87 : vector<4x512xbf16>
    %c56_59 = arith.constant 56 : index
    %c0_60 = arith.constant 0 : index
    %89 = vector.load %arg7[%c56_59, %c0_60] : memref<128x512xbf16, #tpu.memory_space<vmem>>, vector<4x512xbf16>
    tpu.vector_store %arg7[%c56_59, %c0_60], %88 {strides = array<i32>} : memref<128x512xbf16, #tpu.memory_space<vmem>>, vector<4x512xbf16>,
    %c0_61 = arith.constant 0 : index
    %c135 = arith.constant 135 : index
    %90 = vector.load %arg6[%c0_61, %c135] : memref<4x768xbf16, #tpu.memory_space<vmem>>, vector<4x512xbf16>
    %c15 = arith.constant 15 : index
    %c0_62 = arith.constant 0 : index
    %91 = vector.load %arg4[%c15, %c0_62] : memref<27x512xbf16, #tpu.memory_space<vmem>>, vector<1x512xbf16>
    %92 = vector.broadcast %91 : vector<1x512xbf16> to vector<4x512xbf16>
    %93 = arith.mulf %90, %92 : vector<4x512xbf16>
    %c60 = arith.constant 60 : index
    %c0_63 = arith.constant 0 : index
    %94 = vector.load %arg7[%c60, %c0_63] : memref<128x512xbf16, #tpu.memory_space<vmem>>, vector<4x512xbf16>
    tpu.vector_store %arg7[%c60, %c0_63], %93 {strides = array<i32>} : memref<128x512xbf16, #tpu.memory_space<vmem>>, vector<4x512xbf16>,
    %c0_64 = arith.constant 0 : index
    %c136 = arith.constant 136 : index
    %95 = vector.load %arg6[%c0_64, %c136] : memref<4x768xbf16, #tpu.memory_space<vmem>>, vector<4x512xbf16>
    %c16_65 = arith.constant 16 : index
    %c0_66 = arith.constant 0 : index
    %96 = vector.load %arg4[%c16_65, %c0_66] : memref<27x512xbf16, #tpu.memory_space<vmem>>, vector<1x512xbf16>
    %97 = vector.broadcast %96 : vector<1x512xbf16> to vector<4x512xbf16>
    %98 = arith.mulf %95, %97 : vector<4x512xbf16>
    %c64_67 = arith.constant 64 : index
    %c0_68 = arith.constant 0 : index
    %99 = vector.load %arg7[%c64_67, %c0_68] : memref<128x512xbf16, #tpu.memory_space<vmem>>, vector<4x512xbf16>
    tpu.vector_store %arg7[%c64_67, %c0_68], %98 {strides = array<i32>} : memref<128x512xbf16, #tpu.memory_space<vmem>>, vector<4x512xbf16>,
    %c0_69 = arith.constant 0 : index
    %c137 = arith.constant 137 : index
    %100 = vector.load %arg6[%c0_69, %c137] : memref<4x768xbf16, #tpu.memory_space<vmem>>, vector<4x512xbf16>
    %c17 = arith.constant 17 : index
    %c0_70 = arith.constant 0 : index
    %101 = vector.load %arg4[%c17, %c0_70] : memref<27x512xbf16, #tpu.memory_space<vmem>>, vector<1x512xbf16>
    %102 = vector.broadcast %101 : vector<1x512xbf16> to vector<4x512xbf16>
    %103 = arith.mulf %100, %102 : vector<4x512xbf16>
    %c68 = arith.constant 68 : index
    %c0_71 = arith.constant 0 : index
    %104 = vector.load %arg7[%c68, %c0_71] : memref<128x512xbf16, #tpu.memory_space<vmem>>, vector<4x512xbf16>
    tpu.vector_store %arg7[%c68, %c0_71], %103 {strides = array<i32>} : memref<128x512xbf16, #tpu.memory_space<vmem>>, vector<4x512xbf16>,
    %c0_72 = arith.constant 0 : index
    %c183 = arith.constant 183 : index
    %105 = vector.load %arg6[%c0_72, %c183] : memref<4x768xbf16, #tpu.memory_space<vmem>>, vector<4x512xbf16>
    %c18 = arith.constant 18 : index
    %c0_73 = arith.constant 0 : index
    %106 = vector.load %arg4[%c18, %c0_73] : memref<27x512xbf16, #tpu.memory_space<vmem>>, vector<1x512xbf16>
    %107 = vector.broadcast %106 : vector<1x512xbf16> to vector<4x512xbf16>
    %108 = arith.mulf %105, %107 : vector<4x512xbf16>
    %c72_74 = arith.constant 72 : index
    %c0_75 = arith.constant 0 : index
    %109 = vector.load %arg7[%c72_74, %c0_75] : memref<128x512xbf16, #tpu.memory_space<vmem>>, vector<4x512xbf16>
    tpu.vector_store %arg7[%c72_74, %c0_75], %108 {strides = array<i32>} : memref<128x512xbf16, #tpu.memory_space<vmem>>, vector<4x512xbf16>,
    %c0_76 = arith.constant 0 : index
    %c184 = arith.constant 184 : index
    %110 = vector.load %arg6[%c0_76, %c184] : memref<4x768xbf16, #tpu.memory_space<vmem>>, vector<4x512xbf16>
    %c19 = arith.constant 19 : index
    %c0_77 = arith.constant 0 : index
    %111 = vector.load %arg4[%c19, %c0_77] : memref<27x512xbf16, #tpu.memory_space<vmem>>, vector<1x512xbf16>
    %112 = vector.broadcast %111 : vector<1x512xbf16> to vector<4x512xbf16>
    %113 = arith.mulf %110, %112 : vector<4x512xbf16>
    %c76 = arith.constant 76 : index
    %c0_78 = arith.constant 0 : index
    %114 = vector.load %arg7[%c76, %c0_78] : memref<128x512xbf16, #tpu.memory_space<vmem>>, vector<4x512xbf16>
    tpu.vector_store %arg7[%c76, %c0_78], %113 {strides = array<i32>} : memref<128x512xbf16, #tpu.memory_space<vmem>>, vector<4x512xbf16>,
    %c0_79 = arith.constant 0 : index
    %c185 = arith.constant 185 : index
    %115 = vector.load %arg6[%c0_79, %c185] : memref<4x768xbf16, #tpu.memory_space<vmem>>, vector<4x512xbf16>
    %c20_80 = arith.constant 20 : index
    %c0_81 = arith.constant 0 : index
    %116 = vector.load %arg4[%c20_80, %c0_81] : memref<27x512xbf16, #tpu.memory_space<vmem>>, vector<1x512xbf16>
    %117 = vector.broadcast %116 : vector<1x512xbf16> to vector<4x512xbf16>
    %118 = arith.mulf %115, %117 : vector<4x512xbf16>
    %c80 = arith.constant 80 : index
    %c0_82 = arith.constant 0 : index
    %119 = vector.load %arg7[%c80, %c0_82] : memref<128x512xbf16, #tpu.memory_space<vmem>>, vector<4x512xbf16>
    tpu.vector_store %arg7[%c80, %c0_82], %118 {strides = array<i32>} : memref<128x512xbf16, #tpu.memory_space<vmem>>, vector<4x512xbf16>,
    %c0_83 = arith.constant 0 : index
    %c191 = arith.constant 191 : index
    %120 = vector.load %arg6[%c0_83, %c191] : memref<4x768xbf16, #tpu.memory_space<vmem>>, vector<4x512xbf16>
    %c21 = arith.constant 21 : index
    %c0_84 = arith.constant 0 : index
    %121 = vector.load %arg4[%c21, %c0_84] : memref<27x512xbf16, #tpu.memory_space<vmem>>, vector<1x512xbf16>
    %122 = vector.broadcast %121 : vector<1x512xbf16> to vector<4x512xbf16>
    %123 = arith.mulf %120, %122 : vector<4x512xbf16>
    %c84 = arith.constant 84 : index
    %c0_85 = arith.constant 0 : index
    %124 = vector.load %arg7[%c84, %c0_85] : memref<128x512xbf16, #tpu.memory_space<vmem>>, vector<4x512xbf16>
    tpu.vector_store %arg7[%c84, %c0_85], %123 {strides = array<i32>} : memref<128x512xbf16, #tpu.memory_space<vmem>>, vector<4x512xbf16>,
    %c0_86 = arith.constant 0 : index
    %c192 = arith.constant 192 : index
    %125 = vector.load %arg6[%c0_86, %c192] : memref<4x768xbf16, #tpu.memory_space<vmem>>, vector<4x512xbf16>
    %c22 = arith.constant 22 : index
    %c0_87 = arith.constant 0 : index
    %126 = vector.load %arg4[%c22, %c0_87] : memref<27x512xbf16, #tpu.memory_space<vmem>>, vector<1x512xbf16>
    %127 = vector.broadcast %126 : vector<1x512xbf16> to vector<4x512xbf16>
    %128 = arith.mulf %125, %127 : vector<4x512xbf16>
    %c88 = arith.constant 88 : index
    %c0_88 = arith.constant 0 : index
    %129 = vector.load %arg7[%c88, %c0_88] : memref<128x512xbf16, #tpu.memory_space<vmem>>, vector<4x512xbf16>
    tpu.vector_store %arg7[%c88, %c0_88], %128 {strides = array<i32>} : memref<128x512xbf16, #tpu.memory_space<vmem>>, vector<4x512xbf16>,
    %c0_89 = arith.constant 0 : index
    %c193 = arith.constant 193 : index
    %130 = vector.load %arg6[%c0_89, %c193] : memref<4x768xbf16, #tpu.memory_space<vmem>>, vector<4x512xbf16>
    %c23 = arith.constant 23 : index
    %c0_90 = arith.constant 0 : index
    %131 = vector.load %arg4[%c23, %c0_90] : memref<27x512xbf16, #tpu.memory_space<vmem>>, vector<1x512xbf16>
    %132 = vector.broadcast %131 : vector<1x512xbf16> to vector<4x512xbf16>
    %133 = arith.mulf %130, %132 : vector<4x512xbf16>
    %c92 = arith.constant 92 : index
    %c0_91 = arith.constant 0 : index
    %134 = vector.load %arg7[%c92, %c0_91] : memref<128x512xbf16, #tpu.memory_space<vmem>>, vector<4x512xbf16>
    tpu.vector_store %arg7[%c92, %c0_91], %133 {strides = array<i32>} : memref<128x512xbf16, #tpu.memory_space<vmem>>, vector<4x512xbf16>,
    %c0_92 = arith.constant 0 : index
    %c199 = arith.constant 199 : index
    %135 = vector.load %arg6[%c0_92, %c199] : memref<4x768xbf16, #tpu.memory_space<vmem>>, vector<4x512xbf16>
    %c24_93 = arith.constant 24 : index
    %c0_94 = arith.constant 0 : index
    %136 = vector.load %arg4[%c24_93, %c0_94] : memref<27x512xbf16, #tpu.memory_space<vmem>>, vector<1x512xbf16>
    %137 = vector.broadcast %136 : vector<1x512xbf16> to vector<4x512xbf16>
    %138 = arith.mulf %135, %137 : vector<4x512xbf16>
    %c96 = arith.constant 96 : index
    %c0_95 = arith.constant 0 : index
    %139 = vector.load %arg7[%c96, %c0_95] : memref<128x512xbf16, #tpu.memory_space<vmem>>, vector<4x512xbf16>
    tpu.vector_store %arg7[%c96, %c0_95], %138 {strides = array<i32>} : memref<128x512xbf16, #tpu.memory_space<vmem>>, vector<4x512xbf16>,
    %c0_96 = arith.constant 0 : index
    %c200 = arith.constant 200 : index
    %140 = vector.load %arg6[%c0_96, %c200] : memref<4x768xbf16, #tpu.memory_space<vmem>>, vector<4x512xbf16>
    %c25 = arith.constant 25 : index
    %c0_97 = arith.constant 0 : index
    %141 = vector.load %arg4[%c25, %c0_97] : memref<27x512xbf16, #tpu.memory_space<vmem>>, vector<1x512xbf16>
    %142 = vector.broadcast %141 : vector<1x512xbf16> to vector<4x512xbf16>
    %143 = arith.mulf %140, %142 : vector<4x512xbf16>
    %c100 = arith.constant 100 : index
    %c0_98 = arith.constant 0 : index
    %144 = vector.load %arg7[%c100, %c0_98] : memref<128x512xbf16, #tpu.memory_space<vmem>>, vector<4x512xbf16>
    tpu.vector_store %arg7[%c100, %c0_98], %143 {strides = array<i32>} : memref<128x512xbf16, #tpu.memory_space<vmem>>, vector<4x512xbf16>,
    %c0_99 = arith.constant 0 : index
    %c201 = arith.constant 201 : index
    %145 = vector.load %arg6[%c0_99, %c201] : memref<4x768xbf16, #tpu.memory_space<vmem>>, vector<4x512xbf16>
    %c26 = arith.constant 26 : index
    %c0_100 = arith.constant 0 : index
    %146 = vector.load %arg4[%c26, %c0_100] : memref<27x512xbf16, #tpu.memory_space<vmem>>, vector<1x512xbf16>
    %147 = vector.broadcast %146 : vector<1x512xbf16> to vector<4x512xbf16>
    %148 = arith.mulf %145, %147 : vector<4x512xbf16>
    %c104 = arith.constant 104 : index
    %c0_101 = arith.constant 0 : index
    %149 = vector.load %arg7[%c104, %c0_101] : memref<128x512xbf16, #tpu.memory_space<vmem>>, vector<4x512xbf16>
    tpu.vector_store %arg7[%c104, %c0_101], %148 {strides = array<i32>} : memref<128x512xbf16, #tpu.memory_space<vmem>>, vector<4x512xbf16>,
    %c0_102 = arith.constant 0 : index
    %c0_103 = arith.constant 0 : index
    %150 = vector.load %arg2[%c0_102, %c0_103] : memref<4x128xbf16, #tpu.memory_space<vmem>>, vector<4x128xbf16>
    %c0_104 = arith.constant 0 : index
    %c0_105 = arith.constant 0 : index
    %151 = vector.load %arg7[%c0_104, %c0_105] : memref<128x512xbf16, #tpu.memory_space<vmem>>, vector<128x512xbf16>
    %cst_106 = arith.constant dense<0.000000e+00> : vector<4x512xf32>
    %152 = tpu.matmul %150, %151, %cst_106 {dimension_numbers = #tpu.dot_dimension_numbers<[1], [0], [0], [1], [0, 0, 1, 1], [], []>} : vector<4x128xbf16>, vector<128x512xbf16>, vector<4x512xf32> -> vector<4x512xf32>
    %cst_107 = arith.constant 0.000000e+00 : f32
    %153 = vector.broadcast %cst_107 : f32 to vector<4x512xf32>
    %154 = arith.maximumf %152, %153 : vector<4x512xf32>
    %155 = arith.truncf %154 : vector<4x512xf32> to vector<4x512xbf16>
    %c0_108 = arith.constant 0 : index
    %c128_109 = arith.constant 128 : index
    %156 = vector.load %arg6[%c0_108, %c128_109] : memref<4x768xbf16, #tpu.memory_space<vmem>>, vector<4x512xbf16>
    tpu.vector_store %arg6[%c0_108, %c128_109], %155 {strides = array<i32>} : memref<4x768xbf16, #tpu.memory_space<vmem>>, vector<4x512xbf16>,
    %c0_110 = arith.constant 0 : index
    %c55_111 = arith.constant 55 : index
    %157 = vector.load %arg6[%c0_110, %c55_111] : memref<4x768xbf16, #tpu.memory_space<vmem>>, vector<4x512xbf16>
    %c0_112 = arith.constant 0 : index
    %c0_113 = arith.constant 0 : index
    %158 = vector.load %arg4[%c0_112, %c0_113] : memref<27x512xbf16, #tpu.memory_space<vmem>>, vector<1x512xbf16>
    %159 = vector.broadcast %158 : vector<1x512xbf16> to vector<4x512xbf16>
    %160 = arith.mulf %157, %159 : vector<4x512xbf16>
    %c0_114 = arith.constant 0 : index
    %c0_115 = arith.constant 0 : index
    %161 = vector.load %arg7[%c0_114, %c0_115] : memref<128x512xbf16, #tpu.memory_space<vmem>>, vector<4x512xbf16>
    tpu.vector_store %arg7[%c0_114, %c0_115], %160 {strides = array<i32>} : memref<128x512xbf16, #tpu.memory_space<vmem>>, vector<4x512xbf16>,
    %c0_116 = arith.constant 0 : index
    %c56_117 = arith.constant 56 : index
    %162 = vector.load %arg6[%c0_116, %c56_117] : memref<4x768xbf16, #tpu.memory_space<vmem>>, vector<4x512xbf16>
    %c1_118 = arith.constant 1 : index
    %c0_119 = arith.constant 0 : index
    %163 = vector.load %arg4[%c1_118, %c0_119] : memref<27x512xbf16, #tpu.memory_space<vmem>>, vector<1x512xbf16>
    %164 = vector.broadcast %163 : vector<1x512xbf16> to vector<4x512xbf16>
    %165 = arith.mulf %162, %164 : vector<4x512xbf16>
    %c4_120 = arith.constant 4 : index
    %c0_121 = arith.constant 0 : index
    %166 = vector.load %arg7[%c4_120, %c0_121] : memref<128x512xbf16, #tpu.memory_space<vmem>>, vector<4x512xbf16>
    tpu.vector_store %arg7[%c4_120, %c0_121], %165 {strides = array<i32>} : memref<128x512xbf16, #tpu.memory_space<vmem>>, vector<4x512xbf16>,
    %c0_122 = arith.constant 0 : index
    %c57_123 = arith.constant 57 : index
    %167 = vector.load %arg6[%c0_122, %c57_123] : memref<4x768xbf16, #tpu.memory_space<vmem>>, vector<4x512xbf16>
    %c2_124 = arith.constant 2 : index
    %c0_125 = arith.constant 0 : index
    %168 = vector.load %arg4[%c2_124, %c0_125] : memref<27x512xbf16, #tpu.memory_space<vmem>>, vector<1x512xbf16>
    %169 = vector.broadcast %168 : vector<1x512xbf16> to vector<4x512xbf16>
    %170 = arith.mulf %167, %169 : vector<4x512xbf16>
    %c8_126 = arith.constant 8 : index
    %c0_127 = arith.constant 0 : index
    %171 = vector.load %arg7[%c8_126, %c0_127] : memref<128x512xbf16, #tpu.memory_space<vmem>>, vector<4x512xbf16>
    tpu.vector_store %arg7[%c8_126, %c0_127], %170 {strides = array<i32>} : memref<128x512xbf16, #tpu.memory_space<vmem>>, vector<4x512xbf16>,
    %c0_128 = arith.constant 0 : index
    %c63_129 = arith.constant 63 : index
    %172 = vector.load %arg6[%c0_128, %c63_129] : memref<4x768xbf16, #tpu.memory_space<vmem>>, vector<4x512xbf16>
    %c3_130 = arith.constant 3 : index
    %c0_131 = arith.constant 0 : index
    %173 = vector.load %arg4[%c3_130, %c0_131] : memref<27x512xbf16, #tpu.memory_space<vmem>>, vector<1x512xbf16>
    %174 = vector.broadcast %173 : vector<1x512xbf16> to vector<4x512xbf16>
    %175 = arith.mulf %172, %174 : vector<4x512xbf16>
    %c12_132 = arith.constant 12 : index
    %c0_133 = arith.constant 0 : index
    %176 = vector.load %arg7[%c12_132, %c0_133] : memref<128x512xbf16, #tpu.memory_space<vmem>>, vector<4x512xbf16>
    tpu.vector_store %arg7[%c12_132, %c0_133], %175 {strides = array<i32>} : memref<128x512xbf16, #tpu.memory_space<vmem>>, vector<4x512xbf16>,
    %c0_134 = arith.constant 0 : index
    %c64_135 = arith.constant 64 : index
    %177 = vector.load %arg6[%c0_134, %c64_135] : memref<4x768xbf16, #tpu.memory_space<vmem>>, vector<4x512xbf16>
    %c4_136 = arith.constant 4 : index
    %c0_137 = arith.constant 0 : index
    %178 = vector.load %arg4[%c4_136, %c0_137] : memref<27x512xbf16, #tpu.memory_space<vmem>>, vector<1x512xbf16>
    %179 = vector.broadcast %178 : vector<1x512xbf16> to vector<4x512xbf16>
    %180 = arith.mulf %177, %179 : vector<4x512xbf16>
    %c16_138 = arith.constant 16 : index
    %c0_139 = arith.constant 0 : index
    %181 = vector.load %arg7[%c16_138, %c0_139] : memref<128x512xbf16, #tpu.memory_space<vmem>>, vector<4x512xbf16>
    tpu.vector_store %arg7[%c16_138, %c0_139], %180 {strides = array<i32>} : memref<128x512xbf16, #tpu.memory_space<vmem>>, vector<4x512xbf16>,
    %c0_140 = arith.constant 0 : index
    %c65_141 = arith.constant 65 : index
    %182 = vector.load %arg6[%c0_140, %c65_141] : memref<4x768xbf16, #tpu.memory_space<vmem>>, vector<4x512xbf16>
    %c5_142 = arith.constant 5 : index
    %c0_143 = arith.constant 0 : index
    %183 = vector.load %arg4[%c5_142, %c0_143] : memref<27x512xbf16, #tpu.memory_space<vmem>>, vector<1x512xbf16>
    %184 = vector.broadcast %183 : vector<1x512xbf16> to vector<4x512xbf16>
    %185 = arith.mulf %182, %184 : vector<4x512xbf16>
    %c20_144 = arith.constant 20 : index
    %c0_145 = arith.constant 0 : index
    %186 = vector.load %arg7[%c20_144, %c0_145] : memref<128x512xbf16, #tpu.memory_space<vmem>>, vector<4x512xbf16>
    tpu.vector_store %arg7[%c20_144, %c0_145], %185 {strides = array<i32>} : memref<128x512xbf16, #tpu.memory_space<vmem>>, vector<4x512xbf16>,
    %c0_146 = arith.constant 0 : index
    %c71_147 = arith.constant 71 : index
    %187 = vector.load %arg6[%c0_146, %c71_147] : memref<4x768xbf16, #tpu.memory_space<vmem>>, vector<4x512xbf16>
    %c6_148 = arith.constant 6 : index
    %c0_149 = arith.constant 0 : index
    %188 = vector.load %arg4[%c6_148, %c0_149] : memref<27x512xbf16, #tpu.memory_space<vmem>>, vector<1x512xbf16>
    %189 = vector.broadcast %188 : vector<1x512xbf16> to vector<4x512xbf16>
    %190 = arith.mulf %187, %189 : vector<4x512xbf16>
    %c24_150 = arith.constant 24 : index
    %c0_151 = arith.constant 0 : index
    %191 = vector.load %arg7[%c24_150, %c0_151] : memref<128x512xbf16, #tpu.memory_space<vmem>>, vector<4x512xbf16>
    tpu.vector_store %arg7[%c24_150, %c0_151], %190 {strides = array<i32>} : memref<128x512xbf16, #tpu.memory_space<vmem>>, vector<4x512xbf16>,
    %c0_152 = arith.constant 0 : index
    %c72_153 = arith.constant 72 : index
    %192 = vector.load %arg6[%c0_152, %c72_153] : memref<4x768xbf16, #tpu.memory_space<vmem>>, vector<4x512xbf16>
    %c7_154 = arith.constant 7 : index
    %c0_155 = arith.constant 0 : index
    %193 = vector.load %arg4[%c7_154, %c0_155] : memref<27x512xbf16, #tpu.memory_space<vmem>>, vector<1x512xbf16>
    %194 = vector.broadcast %193 : vector<1x512xbf16> to vector<4x512xbf16>
    %195 = arith.mulf %192, %194 : vector<4x512xbf16>
    %c28_156 = arith.constant 28 : index
    %c0_157 = arith.constant 0 : index
    %196 = vector.load %arg7[%c28_156, %c0_157] : memref<128x512xbf16, #tpu.memory_space<vmem>>, vector<4x512xbf16>
    tpu.vector_store %arg7[%c28_156, %c0_157], %195 {strides = array<i32>} : memref<128x512xbf16, #tpu.memory_space<vmem>>, vector<4x512xbf16>,
    %c0_158 = arith.constant 0 : index
    %c73_159 = arith.constant 73 : index
    %197 = vector.load %arg6[%c0_158, %c73_159] : memref<4x768xbf16, #tpu.memory_space<vmem>>, vector<4x512xbf16>
    %c8_160 = arith.constant 8 : index
    %c0_161 = arith.constant 0 : index
    %198 = vector.load %arg4[%c8_160, %c0_161] : memref<27x512xbf16, #tpu.memory_space<vmem>>, vector<1x512xbf16>
    %199 = vector.broadcast %198 : vector<1x512xbf16> to vector<4x512xbf16>
    %200 = arith.mulf %197, %199 : vector<4x512xbf16>
    %c32_162 = arith.constant 32 : index
    %c0_163 = arith.constant 0 : index
    %201 = vector.load %arg7[%c32_162, %c0_163] : memref<128x512xbf16, #tpu.memory_space<vmem>>, vector<4x512xbf16>
    tpu.vector_store %arg7[%c32_162, %c0_163], %200 {strides = array<i32>} : memref<128x512xbf16, #tpu.memory_space<vmem>>, vector<4x512xbf16>,
    %c0_164 = arith.constant 0 : index
    %c119_165 = arith.constant 119 : index
    %202 = vector.load %arg6[%c0_164, %c119_165] : memref<4x768xbf16, #tpu.memory_space<vmem>>, vector<4x512xbf16>
    %c9_166 = arith.constant 9 : index
    %c0_167 = arith.constant 0 : index
    %203 = vector.load %arg4[%c9_166, %c0_167] : memref<27x512xbf16, #tpu.memory_space<vmem>>, vector<1x512xbf16>
    %204 = vector.broadcast %203 : vector<1x512xbf16> to vector<4x512xbf16>
    %205 = arith.mulf %202, %204 : vector<4x512xbf16>
    %c36_168 = arith.constant 36 : index
    %c0_169 = arith.constant 0 : index
    %206 = vector.load %arg7[%c36_168, %c0_169] : memref<128x512xbf16, #tpu.memory_space<vmem>>, vector<4x512xbf16>
    tpu.vector_store %arg7[%c36_168, %c0_169], %205 {strides = array<i32>} : memref<128x512xbf16, #tpu.memory_space<vmem>>, vector<4x512xbf16>,
    %c0_170 = arith.constant 0 : index
    %c120_171 = arith.constant 120 : index
    %207 = vector.load %arg6[%c0_170, %c120_171] : memref<4x768xbf16, #tpu.memory_space<vmem>>, vector<4x512xbf16>
    %c10_172 = arith.constant 10 : index
    %c0_173 = arith.constant 0 : index
    %208 = vector.load %arg4[%c10_172, %c0_173] : memref<27x512xbf16, #tpu.memory_space<vmem>>, vector<1x512xbf16>
    %209 = vector.broadcast %208 : vector<1x512xbf16> to vector<4x512xbf16>
    %210 = arith.mulf %207, %209 : vector<4x512xbf16>
    %c40_174 = arith.constant 40 : index
    %c0_175 = arith.constant 0 : index
    %211 = vector.load %arg7[%c40_174, %c0_175] : memref<128x512xbf16, #tpu.memory_space<vmem>>, vector<4x512xbf16>
    tpu.vector_store %arg7[%c40_174, %c0_175], %210 {strides = array<i32>} : memref<128x512xbf16, #tpu.memory_space<vmem>>, vector<4x512xbf16>,
    %c0_176 = arith.constant 0 : index
    %c121_177 = arith.constant 121 : index
    %212 = vector.load %arg6[%c0_176, %c121_177] : memref<4x768xbf16, #tpu.memory_space<vmem>>, vector<4x512xbf16>
    %c11_178 = arith.constant 11 : index
    %c0_179 = arith.constant 0 : index
    %213 = vector.load %arg4[%c11_178, %c0_179] : memref<27x512xbf16, #tpu.memory_space<vmem>>, vector<1x512xbf16>
    %214 = vector.broadcast %213 : vector<1x512xbf16> to vector<4x512xbf16>
    %215 = arith.mulf %212, %214 : vector<4x512xbf16>
    %c44_180 = arith.constant 44 : index
    %c0_181 = arith.constant 0 : index
    %216 = vector.load %arg7[%c44_180, %c0_181] : memref<128x512xbf16, #tpu.memory_space<vmem>>, vector<4x512xbf16>
    tpu.vector_store %arg7[%c44_180, %c0_181], %215 {strides = array<i32>} : memref<128x512xbf16, #tpu.memory_space<vmem>>, vector<4x512xbf16>,
    %c0_182 = arith.constant 0 : index
    %c127_183 = arith.constant 127 : index
    %217 = vector.load %arg6[%c0_182, %c127_183] : memref<4x768xbf16, #tpu.memory_space<vmem>>, vector<4x512xbf16>
    %c12_184 = arith.constant 12 : index
    %c0_185 = arith.constant 0 : index
    %218 = vector.load %arg4[%c12_184, %c0_185] : memref<27x512xbf16, #tpu.memory_space<vmem>>, vector<1x512xbf16>
    %219 = vector.broadcast %218 : vector<1x512xbf16> to vector<4x512xbf16>
    %220 = arith.mulf %217, %219 : vector<4x512xbf16>
    %c48_186 = arith.constant 48 : index
    %c0_187 = arith.constant 0 : index
    %221 = vector.load %arg7[%c48_186, %c0_187] : memref<128x512xbf16, #tpu.memory_space<vmem>>, vector<4x512xbf16>
    tpu.vector_store %arg7[%c48_186, %c0_187], %220 {strides = array<i32>} : memref<128x512xbf16, #tpu.memory_space<vmem>>, vector<4x512xbf16>,
    %c0_188 = arith.constant 0 : index
    %c128_189 = arith.constant 128 : index
    %222 = vector.load %arg6[%c0_188, %c128_189] : memref<4x768xbf16, #tpu.memory_space<vmem>>, vector<4x512xbf16>
    %c13_190 = arith.constant 13 : index
    %c0_191 = arith.constant 0 : index
    %223 = vector.load %arg4[%c13_190, %c0_191] : memref<27x512xbf16, #tpu.memory_space<vmem>>, vector<1x512xbf16>
    %224 = vector.broadcast %223 : vector<1x512xbf16> to vector<4x512xbf16>
    %225 = arith.mulf %222, %224 : vector<4x512xbf16>
    %c52_192 = arith.constant 52 : index
    %c0_193 = arith.constant 0 : index
    %226 = vector.load %arg7[%c52_192, %c0_193] : memref<128x512xbf16, #tpu.memory_space<vmem>>, vector<4x512xbf16>
    tpu.vector_store %arg7[%c52_192, %c0_193], %225 {strides = array<i32>} : memref<128x512xbf16, #tpu.memory_space<vmem>>, vector<4x512xbf16>,
    %c0_194 = arith.constant 0 : index
    %c129_195 = arith.constant 129 : index
    %227 = vector.load %arg6[%c0_194, %c129_195] : memref<4x768xbf16, #tpu.memory_space<vmem>>, vector<4x512xbf16>
    %c14_196 = arith.constant 14 : index
    %c0_197 = arith.constant 0 : index
    %228 = vector.load %arg4[%c14_196, %c0_197] : memref<27x512xbf16, #tpu.memory_space<vmem>>, vector<1x512xbf16>
    %229 = vector.broadcast %228 : vector<1x512xbf16> to vector<4x512xbf16>
    %230 = arith.mulf %227, %229 : vector<4x512xbf16>
    %c56_198 = arith.constant 56 : index
    %c0_199 = arith.constant 0 : index
    %231 = vector.load %arg7[%c56_198, %c0_199] : memref<128x512xbf16, #tpu.memory_space<vmem>>, vector<4x512xbf16>
    tpu.vector_store %arg7[%c56_198, %c0_199], %230 {strides = array<i32>} : memref<128x512xbf16, #tpu.memory_space<vmem>>, vector<4x512xbf16>,
    %c0_200 = arith.constant 0 : index
    %c135_201 = arith.constant 135 : index
    %232 = vector.load %arg6[%c0_200, %c135_201] : memref<4x768xbf16, #tpu.memory_space<vmem>>, vector<4x512xbf16>
    %c15_202 = arith.constant 15 : index
    %c0_203 = arith.constant 0 : index
    %233 = vector.load %arg4[%c15_202, %c0_203] : memref<27x512xbf16, #tpu.memory_space<vmem>>, vector<1x512xbf16>
    %234 = vector.broadcast %233 : vector<1x512xbf16> to vector<4x512xbf16>
    %235 = arith.mulf %232, %234 : vector<4x512xbf16>
    %c60_204 = arith.constant 60 : index
    %c0_205 = arith.constant 0 : index
    %236 = vector.load %arg7[%c60_204, %c0_205] : memref<128x512xbf16, #tpu.memory_space<vmem>>, vector<4x512xbf16>
    tpu.vector_store %arg7[%c60_204, %c0_205], %235 {strides = array<i32>} : memref<128x512xbf16, #tpu.memory_space<vmem>>, vector<4x512xbf16>,
    %c0_206 = arith.constant 0 : index
    %c136_207 = arith.constant 136 : index
    %237 = vector.load %arg6[%c0_206, %c136_207] : memref<4x768xbf16, #tpu.memory_space<vmem>>, vector<4x512xbf16>
    %c16_208 = arith.constant 16 : index
    %c0_209 = arith.constant 0 : index
    %238 = vector.load %arg4[%c16_208, %c0_209] : memref<27x512xbf16, #tpu.memory_space<vmem>>, vector<1x512xbf16>
    %239 = vector.broadcast %238 : vector<1x512xbf16> to vector<4x512xbf16>
    %240 = arith.mulf %237, %239 : vector<4x512xbf16>
    %c64_210 = arith.constant 64 : index
    %c0_211 = arith.constant 0 : index
    %241 = vector.load %arg7[%c64_210, %c0_211] : memref<128x512xbf16, #tpu.memory_space<vmem>>, vector<4x512xbf16>
    tpu.vector_store %arg7[%c64_210, %c0_211], %240 {strides = array<i32>} : memref<128x512xbf16, #tpu.memory_space<vmem>>, vector<4x512xbf16>,
    %c0_212 = arith.constant 0 : index
    %c137_213 = arith.constant 137 : index
    %242 = vector.load %arg6[%c0_212, %c137_213] : memref<4x768xbf16, #tpu.memory_space<vmem>>, vector<4x512xbf16>
    %c17_214 = arith.constant 17 : index
    %c0_215 = arith.constant 0 : index
    %243 = vector.load %arg4[%c17_214, %c0_215] : memref<27x512xbf16, #tpu.memory_space<vmem>>, vector<1x512xbf16>
    %244 = vector.broadcast %243 : vector<1x512xbf16> to vector<4x512xbf16>
    %245 = arith.mulf %242, %244 : vector<4x512xbf16>
    %c68_216 = arith.constant 68 : index
    %c0_217 = arith.constant 0 : index
    %246 = vector.load %arg7[%c68_216, %c0_217] : memref<128x512xbf16, #tpu.memory_space<vmem>>, vector<4x512xbf16>
    tpu.vector_store %arg7[%c68_216, %c0_217], %245 {strides = array<i32>} : memref<128x512xbf16, #tpu.memory_space<vmem>>, vector<4x512xbf16>,
    %c0_218 = arith.constant 0 : index
    %c183_219 = arith.constant 183 : index
    %247 = vector.load %arg6[%c0_218, %c183_219] : memref<4x768xbf16, #tpu.memory_space<vmem>>, vector<4x512xbf16>
    %c18_220 = arith.constant 18 : index
    %c0_221 = arith.constant 0 : index
    %248 = vector.load %arg4[%c18_220, %c0_221] : memref<27x512xbf16, #tpu.memory_space<vmem>>, vector<1x512xbf16>
    %249 = vector.broadcast %248 : vector<1x512xbf16> to vector<4x512xbf16>
    %250 = arith.mulf %247, %249 : vector<4x512xbf16>
    %c72_222 = arith.constant 72 : index
    %c0_223 = arith.constant 0 : index
    %251 = vector.load %arg7[%c72_222, %c0_223] : memref<128x512xbf16, #tpu.memory_space<vmem>>, vector<4x512xbf16>
    tpu.vector_store %arg7[%c72_222, %c0_223], %250 {strides = array<i32>} : memref<128x512xbf16, #tpu.memory_space<vmem>>, vector<4x512xbf16>,
    %c0_224 = arith.constant 0 : index
    %c184_225 = arith.constant 184 : index
    %252 = vector.load %arg6[%c0_224, %c184_225] : memref<4x768xbf16, #tpu.memory_space<vmem>>, vector<4x512xbf16>
    %c19_226 = arith.constant 19 : index
    %c0_227 = arith.constant 0 : index
    %253 = vector.load %arg4[%c19_226, %c0_227] : memref<27x512xbf16, #tpu.memory_space<vmem>>, vector<1x512xbf16>
    %254 = vector.broadcast %253 : vector<1x512xbf16> to vector<4x512xbf16>
    %255 = arith.mulf %252, %254 : vector<4x512xbf16>
    %c76_228 = arith.constant 76 : index
    %c0_229 = arith.constant 0 : index
    %256 = vector.load %arg7[%c76_228, %c0_229] : memref<128x512xbf16, #tpu.memory_space<vmem>>, vector<4x512xbf16>
    tpu.vector_store %arg7[%c76_228, %c0_229], %255 {strides = array<i32>} : memref<128x512xbf16, #tpu.memory_space<vmem>>, vector<4x512xbf16>,
    %c0_230 = arith.constant 0 : index
    %c185_231 = arith.constant 185 : index
    %257 = vector.load %arg6[%c0_230, %c185_231] : memref<4x768xbf16, #tpu.memory_space<vmem>>, vector<4x512xbf16>
    %c20_232 = arith.constant 20 : index
    %c0_233 = arith.constant 0 : index
    %258 = vector.load %arg4[%c20_232, %c0_233] : memref<27x512xbf16, #tpu.memory_space<vmem>>, vector<1x512xbf16>
    %259 = vector.broadcast %258 : vector<1x512xbf16> to vector<4x512xbf16>
    %260 = arith.mulf %257, %259 : vector<4x512xbf16>
    %c80_234 = arith.constant 80 : index
    %c0_235 = arith.constant 0 : index
    %261 = vector.load %arg7[%c80_234, %c0_235] : memref<128x512xbf16, #tpu.memory_space<vmem>>, vector<4x512xbf16>
    tpu.vector_store %arg7[%c80_234, %c0_235], %260 {strides = array<i32>} : memref<128x512xbf16, #tpu.memory_space<vmem>>, vector<4x512xbf16>,
    %c0_236 = arith.constant 0 : index
    %c191_237 = arith.constant 191 : index
    %262 = vector.load %arg6[%c0_236, %c191_237] : memref<4x768xbf16, #tpu.memory_space<vmem>>, vector<4x512xbf16>
    %c21_238 = arith.constant 21 : index
    %c0_239 = arith.constant 0 : index
    %263 = vector.load %arg4[%c21_238, %c0_239] : memref<27x512xbf16, #tpu.memory_space<vmem>>, vector<1x512xbf16>
    %264 = vector.broadcast %263 : vector<1x512xbf16> to vector<4x512xbf16>
    %265 = arith.mulf %262, %264 : vector<4x512xbf16>
    %c84_240 = arith.constant 84 : index
    %c0_241 = arith.constant 0 : index
    %266 = vector.load %arg7[%c84_240, %c0_241] : memref<128x512xbf16, #tpu.memory_space<vmem>>, vector<4x512xbf16>
    tpu.vector_store %arg7[%c84_240, %c0_241], %265 {strides = array<i32>} : memref<128x512xbf16, #tpu.memory_space<vmem>>, vector<4x512xbf16>,
    %c0_242 = arith.constant 0 : index
    %c192_243 = arith.constant 192 : index
    %267 = vector.load %arg6[%c0_242, %c192_243] : memref<4x768xbf16, #tpu.memory_space<vmem>>, vector<4x512xbf16>
    %c22_244 = arith.constant 22 : index
    %c0_245 = arith.constant 0 : index
    %268 = vector.load %arg4[%c22_244, %c0_245] : memref<27x512xbf16, #tpu.memory_space<vmem>>, vector<1x512xbf16>
    %269 = vector.broadcast %268 : vector<1x512xbf16> to vector<4x512xbf16>
    %270 = arith.mulf %267, %269 : vector<4x512xbf16>
    %c88_246 = arith.constant 88 : index
    %c0_247 = arith.constant 0 : index
    %271 = vector.load %arg7[%c88_246, %c0_247] : memref<128x512xbf16, #tpu.memory_space<vmem>>, vector<4x512xbf16>
    tpu.vector_store %arg7[%c88_246, %c0_247], %270 {strides = array<i32>} : memref<128x512xbf16, #tpu.memory_space<vmem>>, vector<4x512xbf16>,
    %c0_248 = arith.constant 0 : index
    %c193_249 = arith.constant 193 : index
    %272 = vector.load %arg6[%c0_248, %c193_249] : memref<4x768xbf16, #tpu.memory_space<vmem>>, vector<4x512xbf16>
    %c23_250 = arith.constant 23 : index
    %c0_251 = arith.constant 0 : index
    %273 = vector.load %arg4[%c23_250, %c0_251] : memref<27x512xbf16, #tpu.memory_space<vmem>>, vector<1x512xbf16>
    %274 = vector.broadcast %273 : vector<1x512xbf16> to vector<4x512xbf16>
    %275 = arith.mulf %272, %274 : vector<4x512xbf16>
    %c92_252 = arith.constant 92 : index
    %c0_253 = arith.constant 0 : index
    %276 = vector.load %arg7[%c92_252, %c0_253] : memref<128x512xbf16, #tpu.memory_space<vmem>>, vector<4x512xbf16>
    tpu.vector_store %arg7[%c92_252, %c0_253], %275 {strides = array<i32>} : memref<128x512xbf16, #tpu.memory_space<vmem>>, vector<4x512xbf16>,
    %c0_254 = arith.constant 0 : index
    %c199_255 = arith.constant 199 : index
    %277 = vector.load %arg6[%c0_254, %c199_255] : memref<4x768xbf16, #tpu.memory_space<vmem>>, vector<4x512xbf16>
    %c24_256 = arith.constant 24 : index
    %c0_257 = arith.constant 0 : index
    %278 = vector.load %arg4[%c24_256, %c0_257] : memref<27x512xbf16, #tpu.memory_space<vmem>>, vector<1x512xbf16>
    %279 = vector.broadcast %278 : vector<1x512xbf16> to vector<4x512xbf16>
    %280 = arith.mulf %277, %279 : vector<4x512xbf16>
    %c96_258 = arith.constant 96 : index
    %c0_259 = arith.constant 0 : index
    %281 = vector.load %arg7[%c96_258, %c0_259] : memref<128x512xbf16, #tpu.memory_space<vmem>>, vector<4x512xbf16>
    tpu.vector_store %arg7[%c96_258, %c0_259], %280 {strides = array<i32>} : memref<128x512xbf16, #tpu.memory_space<vmem>>, vector<4x512xbf16>,
    %c0_260 = arith.constant 0 : index
    %c200_261 = arith.constant 200 : index
    %282 = vector.load %arg6[%c0_260, %c200_261] : memref<4x768xbf16, #tpu.memory_space<vmem>>, vector<4x512xbf16>
    %c25_262 = arith.constant 25 : index
    %c0_263 = arith.constant 0 : index
    %283 = vector.load %arg4[%c25_262, %c0_263] : memref<27x512xbf16, #tpu.memory_space<vmem>>, vector<1x512xbf16>
    %284 = vector.broadcast %283 : vector<1x512xbf16> to vector<4x512xbf16>
    %285 = arith.mulf %282, %284 : vector<4x512xbf16>
    %c100_264 = arith.constant 100 : index
    %c0_265 = arith.constant 0 : index
    %286 = vector.load %arg7[%c100_264, %c0_265] : memref<128x512xbf16, #tpu.memory_space<vmem>>, vector<4x512xbf16>
    tpu.vector_store %arg7[%c100_264, %c0_265], %285 {strides = array<i32>} : memref<128x512xbf16, #tpu.memory_space<vmem>>, vector<4x512xbf16>,
    %c0_266 = arith.constant 0 : index
    %c201_267 = arith.constant 201 : index
    %287 = vector.load %arg6[%c0_266, %c201_267] : memref<4x768xbf16, #tpu.memory_space<vmem>>, vector<4x512xbf16>
    %c26_268 = arith.constant 26 : index
    %c0_269 = arith.constant 0 : index
    %288 = vector.load %arg4[%c26_268, %c0_269] : memref<27x512xbf16, #tpu.memory_space<vmem>>, vector<1x512xbf16>
    %289 = vector.broadcast %288 : vector<1x512xbf16> to vector<4x512xbf16>
    %290 = arith.mulf %287, %289 : vector<4x512xbf16>
    %c104_270 = arith.constant 104 : index
    %c0_271 = arith.constant 0 : index
    %291 = vector.load %arg7[%c104_270, %c0_271] : memref<128x512xbf16, #tpu.memory_space<vmem>>, vector<4x512xbf16>
    tpu.vector_store %arg7[%c104_270, %c0_271], %290 {strides = array<i32>} : memref<128x512xbf16, #tpu.memory_space<vmem>>, vector<4x512xbf16>,
    %c0_272 = arith.constant 0 : index
    %c0_273 = arith.constant 0 : index
    %292 = vector.load %arg3[%c0_272, %c0_273] : memref<4x128xbf16, #tpu.memory_space<vmem>>, vector<4x128xbf16>
    %c0_274 = arith.constant 0 : index
    %c0_275 = arith.constant 0 : index
    %293 = vector.load %arg7[%c0_274, %c0_275] : memref<128x512xbf16, #tpu.memory_space<vmem>>, vector<128x512xbf16>
    %cst_276 = arith.constant dense<0.000000e+00> : vector<4x512xf32>
    %294 = tpu.matmul %292, %293, %cst_276 {dimension_numbers = #tpu.dot_dimension_numbers<[1], [0], [0], [1], [0, 0, 1, 1], [], []>} : vector<4x128xbf16>, vector<128x512xbf16>, vector<4x512xf32> -> vector<4x512xf32>
    %c0_277 = arith.constant 0 : index
    %c0_278 = arith.constant 0 : index
    %c0_279 = arith.constant 0 : index
    %295 = vector.load %arg1[%c0_277, %c0_278, %c0_279] : memref<1x4x512xf32, #tpu.memory_space<vmem>>, vector<1x4x512xf32>
    %296 = vector.shape_cast %295 : vector<1x4x512xf32> to vector<4x512xf32>
    %297 = arith.addf %294, %296 : vector<4x512xf32>
    %cst_280 = arith.constant 0.000000e+00 : f32
    %298 = vector.broadcast %cst_280 : f32 to vector<4x512xf32>
    %299 = arith.maximumf %297, %298 : vector<4x512xf32>
    %c0_281 = arith.constant 0 : index
    %c0_282 = arith.constant 0 : index
    %c0_283 = arith.constant 0 : index
    %300 = vector.load %arg5[%c0_281, %c0_282, %c0_283] : memref<1x4x512xf32, #tpu.memory_space<vmem>>, vector<1x4x512xf32>
    %301 = vector.shape_cast %300 : vector<1x4x512xf32> to vector<4x512xf32>
    %302 = vector.shape_cast %299 : vector<4x512xf32> to vector<1x4x512xf32>
    tpu.vector_store %arg5[%c0_281, %c0_282, %c0_283], %302 {strides = array<i32>} : memref<1x4x512xf32, #tpu.memory_space<vmem>>, vector<1x4x512xf32>,
    return
  }
  func.func @transform_0(%arg0: i32) -> (i32, i32, i32) {
    %c0_i32 = arith.constant 0 : i32
    %c0_i32_0 = arith.constant 0 : i32
    %c0_i32_1 = arith.constant 0 : i32
    return %arg0, %c0_i32, %c0_i32_0 : i32, i32, i32
  }
  func.func @transform_1(%arg0: i32) -> (i32, i32) {
    %c0_i32 = arith.constant 0 : i32
    %c0_i32_0 = arith.constant 0 : i32
    %c0_i32_1 = arith.constant 0 : i32
    return %c0_i32, %c0_i32_0 : i32, i32
  }
  func.func @transform_2(%arg0: i32) -> (i32, i32) {
    %c0_i32 = arith.constant 0 : i32
    %c0_i32_0 = arith.constant 0 : i32
    %c0_i32_1 = arith.constant 0 : i32
    return %c0_i32, %c0_i32_0 : i32, i32
  }
  func.func @transform_3(%arg0: i32) -> (i32, i32) {
    %c0_i32 = arith.constant 0 : i32
    %c0_i32_0 = arith.constant 0 : i32
    %c0_i32_1 = arith.constant 0 : i32
    return %c0_i32, %c0_i32_0 : i32, i32
  }
  func.func @transform_4(%arg0: i32) -> (i32, i32, i32) {
    %c0_i32 = arith.constant 0 : i32
    %c0_i32_0 = arith.constant 0 : i32
    %c0_i32_1 = arith.constant 0 : i32
    return %arg0, %c0_i32, %c0_i32_0 : i32, i32, i32
  }
}

</mosaic_0001>

<bundles_post_ra>
// kernel: basic_block_forward.1
= control target key start
LH: loop header
LB: loop body
LE: loop exit
PB: predicated region body
PF: predicated region fallthrough
CT: control target
= control target key end

     0   :  { %s7783_s15 = smov 0   ;;  %s10013_s0 = inlined_call_operand.vmem [shape: f32[2,4,512], index: 0, kind: input, shape index: {}]   ;;  %s10014_s1 = inlined_call_operand.vmem [shape: bf16[4,128], index: 1, kind: input, shape index: {}]   ;;  %s10015_s2 = inlined_call_operand.vmem [shape: bf16[4,128], index: 2, kind: input, shape index: {}]   ;;  %s10016_s3 = inlined_call_operand.vmem [shape: bf16[27,512], index: 3, kind: input, shape index: {}]   ;;  %s10017_s4 = inlined_call_operand.vmem [shape: f32[2,4,512], index: 4, kind: output, shape index: {}]  }
   0x1 LB: > { %s7086_s16 = sadd.s32 4294967295, %s7733_s15   ;;  %p7090_p0 = scmp.ge.s32.totalorder %s7733_s15, 1  ;;  %s7733_s15 = sphi %s7783_s15, %s14_s15  }
   0x2   : > { %p162_p1 = scmp.lt.s32.totalorder %s7733_s15, 3 }
   0x4   : > { %p163_p2 = pnand %p7090_p0, %p162_p1 }
   0x5   : > { %s7736_s7 = smov (!%p163_p2), 73   ;;  %s7737_s12 = smov (!%p163_p2), 71  }
   0x6   : > { %166 = sbr.rel (%p163_p2) target bundleno = 1147 (0x47b), region = 36  ;;  %s7738_s19 = smov (!%p163_p2), 72  }
   0x7   : > { %s7739_s24 = smov (!%p163_p2), 57   ;;  %s7740_s29 = smov (!%p163_p2), 63  }
   0x8   : > { %s7741_s9 = smov (!%p163_p2), 64   ;;  %s7742_s20 = smov (!%p163_p2), 65  }
   0x9   : > { %s7743_s23 = smov (!%p163_p2), 8   ;;  %s7744_s30 = smov (!%p163_p2), 9  }
   0xa   : > { %s7745_s11 = smov (!%p163_p2), 55   ;;  %s7746_s25 = smov (!%p163_p2), 56  }
   0xb   : > { %v199_v0 = vlaneseq  ;;  %v3258_v1 = vld [vmem:[%s10016_s3 + $0x30] sm:$0x22]  ;;  %v7735_v2 = vmov 1983009808   ;;  %v3259_v4 = vld [vmem:[%s10016_s3 + $0x38] sm:$0x22] }
   0xc   : > { %v274_v3 = vunpack.c.l.s4 %v7735_v2  ;;  %v7203_v5 = vcombine.low %v3258_v1, %v3258_v1  ;;  %v7204_v6 = vcombine.high %v3258_v1, %v3258_v1  ;;  %v3029_v7 = vld [vmem:[%s10016_s3 + $0x30] sm:$0x11]  ;;  %v7205_v9 = vcombine.low %v3259_v4, %v3259_v4  ;;  %v3030_v11 = vld [vmem:[%s10016_s3 + $0x38] sm:$0x11]  ;;  %v2571_v51 = vld [vmem:[%s10016_s3 + $0x20] sm:$0x44] }
   0xd   : > { %v7800_v8 = vshrl.u32 %v199_v0, 7  ;;  %v7206_v10 = vcombine.high %v3259_v4, %v3259_v4  ;;  %v7195_v12 = vcombine.low %v3029_v7, %v3029_v7  ;;  %v7196_v16 = vcombine.high %v3029_v7, %v3029_v7  ;;  %v3141_v25 = vld [vmem:[%s10016_s3 + $0x30] sm:$0x11]  ;;  %v3142_v30 = vld [vmem:[%s10016_s3 + $0x38] sm:$0x11]  ;;  %s7747_s28 = smov 127  }
   0xe   : > { %v275_v13 = vunpack.c.0.s8 %v274_v3  ;;  %v3271_v14 = vpack.i.b16 %v7203_v5, %v7203_v5  ;;  %v3278_v15 = vpack.i.b16 %v7204_v6, %v7204_v6  ;;  %v3285_v19 = vpack.i.b16 %v7205_v9, %v7205_v9  ;;  %v2572_v56 = vld [vmem:[%s10016_s3 + $0x28] sm:$0x44]  ;;  %v2683_v1 = vld [vmem:[%s10016_s3 + $0x20] sm:$0x44]  ;;  %s7748_s13 = smov 1   ;;  %s7749_s10 = smov 7  }
   0xf   : > { %v7806_v17 = vsub.s32 0, %v7800_v8  ;;  %v7809_v18 = vsub.s32 1, %v7800_v8  ;;  %v3292_v20 = vpack.i.b16 %v7206_v10, %v7206_v10  ;;  %v7197_v22 = vcombine.low %v3030_v11, %v3030_v11  ;;  %s7750_s18 = smov 119   ;;  %s7751_s5 = smov 120  }
  0x10   : > { %v7812_v21 = vsub.s32 %v275_v13, %v7800_v8  ;;  %v7198_v23 = vcombine.high %v3030_v11, %v3030_v11  ;;  %v3042_v24 = vpack.i.b16 %v7195_v12, %v7195_v12  ;;  %v3049_v32 = vpack.i.b16 %v7196_v16, %v7196_v16  ;;  %v2684_v11 = vld [vmem:[%s10016_s3 + $0x28] sm:$0x44]  ;;  %p8065_p3 = scmp.lt.s32.totalorder %s7086_s16, 1  ;;  %s7752_s22 = smov 121  }
  0x11   : > { %v3276_v26 = vrot.slane %v3271_v14, %v7809_v18  ;;  %v3283_v27 = vrot.slane %v3278_v15, %v7809_v18  ;;  %v3290_v28 = vrot.slane %v3285_v19, %v7809_v18  ;;  %v3297_v29 = vrot.slane %v3292_v20, %v7809_v18 }
  0x12   : > { %v3047_v31 = vrot.slane %v3042_v24, %v7806_v17  ;;  %v3056_v33 = vpack.i.b16 %v7197_v22, %v7197_v22  ;;  %v3063_v34 = vpack.i.b16 %v7198_v23, %v7198_v23  ;;  %v7199_v37 = vcombine.low %v3141_v25, %v3141_v25  ;;  %s10046_s16 = smov (!%p8065_p3, %s7086_s16), 1 }
  0x13   : > { %v3302_v35 = vcombine.low %v3276_v26, %v3283_v27  ;;  %v3303_v36 = vcombine.low %v3290_v28, %v3297_v29  ;;  %v7200_v38 = vcombine.high %v3141_v25, %v3141_v25  ;;  %v3054_v39 = vrot.slane %v3049_v32, %v7806_v17  ;;  %s10020_s21 = sshll.u32 %s10046_s16, 4 }
  0x14   : > { %v3061_v40 = vrot.slane %v3056_v33, %v7806_v17  ;;  %v3068_v41 = vrot.slane %v3063_v34, %v7806_v17  ;;  %v7201_v42 = vcombine.low %v3142_v30, %v3142_v30  ;;  %v7202_v45 = vcombine.high %v3142_v30, %v3142_v30  ;;  %s8109_s14 = scalar_lea.vmem %s10013_s0, %s10020_s21 }
  0x15   : > { %v3310_v43 = vrot.slane %v3302_v35, %v7812_v21  ;;  %v3317_v44 = vrot.slane %v3303_v36, %v7812_v21  ;;  %v3154_v46 = vshrl.u32 %v7199_v37, 16  ;;  %v3073_v47 = vcombine.low %v3047_v31, %v3054_v39  ;;  %v2800_v31 = vld [vmem:[%s10016_s3 + $0x20] sm:$0x88]  ;;  %v2801_v36 = vld [vmem:[%s10016_s3 + $0x28] sm:$0x88] }
  0x16   : > { %v3074_v48 = vcombine.low %v3061_v40, %v3068_v41  ;;  %v3162_v49 = vshrl.u32 %v7200_v38, 16  ;;  %v3170_v50 = vshrl.u32 %v7201_v42, 16  ;;  %v3178_v54 = vshrl.u32 %v7202_v45, 16 }
  0x17   : > { %v3318_v52 = vcombine.low %v3310_v43, %v3317_v44  ;;  %v3155_v53 = vpack.i.b16 %v3154_v46, %v3154_v46  ;;  %v7834_v55 = vsub.s32 2, %v7800_v8  ;;  %v3081_v57 = vrot.slane %v3073_v47, %v7812_v21 }
  0x18   : > { %v3088_v58 = vrot.slane %v3074_v48, %v7812_v21  ;;  %v3163_v59 = vpack.i.b16 %v3162_v49, %v3162_v49  ;;  %v3171_v60 = vpack.i.b16 %v3170_v50, %v3170_v50  ;;  %v3179_v62 = vpack.i.b16 %v3178_v54, %v3178_v54  ;;  %v2912_v49 = vld [vmem:[%s10016_s3 + $0x20] sm:$0x88] }
  0x19   : > { %3319 = vrot.lane.b32.xlu1 %v3318_v52, %s7736_s7  ;;  %v3160_v61 = vrot.slane %v3155_v53, %v7806_v17  ;;  %v7179_v63 = vcombine.low %v2571_v51, %v2571_v51  ;;  %v7180_v0 = vcombine.high %v2571_v51, %v2571_v51  ;;  %v7181_v5 = vcombine.low %v2572_v56, %v2572_v56 }
  0x1a   : > { %v3089_v2 = vcombine.low %v3081_v57, %v3088_v58  ;;  %v3168_v3 = vrot.slane %v3163_v59, %v7806_v17  ;;  %v3176_v4 = vrot.slane %v3171_v60, %v7806_v17  ;;  %v3184_v6 = vrot.slane %v3179_v62, %v7806_v17  ;;  %v2913_v59 = vld [vmem:[%s10016_s3 + $0x28] sm:$0x88] }
  0x1b   : > { %v7182_v7 = vcombine.high %v2572_v56, %v2572_v56  ;;  %v2584_v9 = vpack.i.b16 %v7179_v63, %v7179_v63  ;;  %v2591_v10 = vpack.i.b16 %v7180_v0, %v7180_v0  ;;  %v2598_v13 = vpack.i.b16 %v7181_v5, %v7181_v5 }
  0x1c   : > { %3090 = vrot.lane.b32.xlu0 %v3089_v2, %s7737_s12  ;;  %v3189_v12 = vcombine.low %v3160_v61, %v3168_v3  ;;  %v7183_v14 = vcombine.low %v2683_v1, %v2683_v1  ;;  %v7184_v15 = vcombine.high %v2683_v1, %v2683_v1  ;;  %v3190_v16 = vcombine.low %v3176_v4, %v3184_v6  ;;  %v2113_v4 = vld [vmem:[%s10016_s3 + $0x20] sm:$0x11] }
  0x1d   : > { %v2589_v19 = vrot.slane %v2584_v9, %v7834_v55  ;;  %v2596_v20 = vrot.slane %v2591_v10, %v7834_v55  ;;  %v2605_v22 = vpack.i.b16 %v7182_v7, %v7182_v7  ;;  %v2603_v24 = vrot.slane %v2598_v13, %v7834_v55 }
  0x1e   : > { %v3197_v23 = vrot.slane %v3189_v12, %v7812_v21  ;;  %v7185_v25 = vcombine.low %v2684_v11, %v2684_v11  ;;  %v7186_v26 = vcombine.high %v2684_v11, %v2684_v11  ;;  %v3204_v27 = vrot.slane %v3190_v16, %v7812_v21 }
  0x1f   : > { %v2610_v28 = vrot.slane %v2605_v22, %v7834_v55  ;;  %v2615_v29 = vcombine.low %v2589_v19, %v2596_v20  ;;  %v2696_v30 = vshrl.u32 %v7183_v14, 16  ;;  %v2704_v32 = vshrl.u32 %v7184_v15, 16  ;;  %v2114_v14 = vld [vmem:[%s10016_s3 + $0x28] sm:$0x11] }
  0x20   : > { %v2712_v33 = vshrl.u32 %v7185_v25, 16  ;;  %v2720_v34 = vshrl.u32 %v7186_v26, 16  ;;  %v7863_v35 = vsub.s32 3, %v7800_v8  ;;  %v3205_v37 = vcombine.low %v3197_v23, %v3204_v27 }
  0x21   : > { %v2616_v38 = vcombine.low %v2603_v24, %v2610_v28  ;;  %v2623_v39 = vrot.slane %v2615_v29, %v7812_v21  ;;  %v2697_v40 = vpack.i.b16 %v2696_v30, %v2696_v30  ;;  %v2705_v41 = vpack.i.b16 %v2704_v32, %v2704_v32 }
  0x22   : > { %v2713_v42 = vpack.i.b16 %v2712_v33, %v2712_v33  ;;  %v2721_v43 = vpack.i.b16 %v2720_v34, %v2720_v34  ;;  %v7187_v44 = vcombine.low %v2800_v31, %v2800_v31  ;;  %3206 = vrot.lane.b32.xlu0 %v3205_v37, %s7738_s19  ;;  %v7188_v47 = vcombine.high %v2800_v31, %v2800_v31  ;;  %v2225_v34 = vld [vmem:[%s10016_s3 + $0x20] sm:$0x11] }
  0x23   : > { %v2630_v45 = vrot.slane %v2616_v38, %v7812_v21  ;;  %v2702_v46 = vrot.slane %v2697_v40, %v7834_v55  ;;  %v7189_v48 = vcombine.low %v2801_v36, %v2801_v36  ;;  %v2710_v50 = vrot.slane %v2705_v41, %v7834_v55 }
  0x24   : > { %v2718_v51 = vrot.slane %v2713_v42, %v7834_v55  ;;  %v2726_v52 = vrot.slane %v2721_v43, %v7834_v55  ;;  %v7190_v53 = vcombine.high %v2801_v36, %v2801_v36  ;;  %v2813_v56 = vpack.i.b16 %v7187_v44, %v7187_v44  ;;  %v2226_v44 = vld [vmem:[%s10016_s3 + $0x28] sm:$0x11] }
  0x25   : > { %v2631_v54 = vcombine.low %v2623_v39, %v2630_v45  ;;  %v2820_v57 = vpack.i.b16 %v7188_v47, %v7188_v47  ;;  %v2827_v58 = vpack.i.b16 %v7189_v48, %v7189_v48  ;;  %v2731_v60 = vcombine.low %v2702_v46, %v2710_v50 }
  0x26   : > { %v2732_v61 = vcombine.low %v2718_v51, %v2726_v52  ;;  %v2834_v62 = vpack.i.b16 %v7190_v53, %v7190_v53  ;;  %v7191_v63 = vcombine.low %v2912_v49, %v2912_v49  ;;  %v2818_v0 = vrot.slane %v2813_v56, %v7863_v35 }
  0x27   : > { %2632 = vrot.lane.b32.xlu1 %v2631_v54, %s7739_s24  ;;  %v2825_v1 = vrot.slane %v2820_v57, %v7863_v35  ;;  %v2832_v2 = vrot.slane %v2827_v58, %v7863_v35  ;;  %v7192_v3 = vcombine.high %v2912_v49, %v2912_v49  ;;  %v2739_v5 = vrot.slane %v2731_v60, %v7812_v21  ;;  %v2342_v49 = vld [vmem:[%s10016_s3 + $0x20] sm:$0x22] }
  0x28   : > { %v2746_v6 = vrot.slane %v2732_v61, %v7812_v21  ;;  %v2839_v7 = vrot.slane %v2834_v62, %v7863_v35  ;;  %v7193_v9 = vcombine.low %v2913_v59, %v2913_v59  ;;  %v7194_v11 = vcombine.high %v2913_v59, %v2913_v59  ;;  %v2343_v62 = vld [vmem:[%s10016_s3 + $0x28] sm:$0x22] }
  0x29   : > { %v2844_v10 = vcombine.low %v2818_v0, %v2825_v1  ;;  %v2925_v12 = vshrl.u32 %v7191_v63, 16  ;;  %v2933_v13 = vshrl.u32 %v7192_v3, 16  ;;  %v7163_v20 = vcombine.low %v2113_v4, %v2113_v4 }
  0x2a   : > { %v2747_v15 = vcombine.low %v2739_v5, %v2746_v6  ;;  %v2845_v16 = vcombine.low %v2832_v2, %v2839_v7  ;;  %v2941_v19 = vshrl.u32 %v7193_v9, 16  ;;  %v2949_v25 = vshrl.u32 %v7194_v11, 16 }
  0x2b   : > { %v2852_v22 = vrot.slane %v2844_v10, %v7812_v21  ;;  %v2926_v23 = vpack.i.b16 %v2925_v12, %v2925_v12  ;;  %v2934_v24 = vpack.i.b16 %v2933_v13, %v2933_v13  ;;  %v7164_v28 = vcombine.high %v2113_v4, %v2113_v4  ;;  %v2454_v13 = vld [vmem:[%s10016_s3 + $0x20] sm:$0x22] }
  0x2c   : > { %2748 = vrot.lane.b32.xlu0 %v2747_v15, %s7740_s29  ;;  %v2859_v26 = vrot.slane %v2845_v16, %v7812_v21  ;;  %v2942_v27 = vpack.i.b16 %v2941_v19, %v2941_v19  ;;  %v7165_v29 = vcombine.low %v2114_v14, %v2114_v14  ;;  %v2950_v32 = vpack.i.b16 %v2949_v25, %v2949_v25  ;;  %v2455_v25 = vld [vmem:[%s10016_s3 + $0x28] sm:$0x22] }
  0x2d   : > { %v2931_v30 = vrot.slane %v2926_v23, %v7863_v35  ;;  %v2939_v31 = vrot.slane %v2934_v24, %v7863_v35  ;;  %v7166_v33 = vcombine.high %v2114_v14, %v2114_v14  ;;  %v2126_v38 = vpack.i.b16 %v7163_v20, %v7163_v20 }
  0x2e   : > { %v2860_v36 = vcombine.low %v2852_v22, %v2859_v26  ;;  %v2947_v37 = vrot.slane %v2942_v27, %v7863_v35  ;;  %v2133_v39 = vpack.i.b16 %v7164_v28, %v7164_v28  ;;  %v2955_v40 = vrot.slane %v2950_v32, %v7863_v35 }
  0x2f   : > { %v2960_v41 = vcombine.low %v2931_v30, %v2939_v31  ;;  %v2140_v42 = vpack.i.b16 %v7165_v29, %v7165_v29  ;;  %v2147_v43 = vpack.i.b16 %v7166_v33, %v7166_v33  ;;  %v2131_v45 = vrot.slane %v2126_v38, %v7806_v17 }
  0x30   : > { %2861 = vrot.lane.b32.xlu1 %v2860_v36, %s7741_s9  ;;  %v2138_v46 = vrot.slane %v2133_v39, %v7806_v17  ;;  %v7167_v47 = vcombine.low %v2225_v34, %v2225_v34  ;;  %v7168_v48 = vcombine.high %v2225_v34, %v2225_v34  ;;  %v2961_v50 = vcombine.low %v2947_v37, %v2955_v40  ;;  %v1682_v34 = vld [vmem:[%s10016_s3 + $0x10] sm:$0x44] }
  0x31   : > { %v2968_v51 = vrot.slane %v2960_v41, %v7812_v21  ;;  %v2145_v52 = vrot.slane %v2140_v42, %v7806_v17  ;;  %v2152_v53 = vrot.slane %v2147_v43, %v7806_v17  ;;  %v7169_v56 = vcombine.low %v2226_v44, %v2226_v44 }
  0x32   : > { %v2157_v54 = vcombine.low %v2131_v45, %v2138_v46  ;;  %v7170_v57 = vcombine.high %v2226_v44, %v2226_v44  ;;  %v2238_v58 = vshrl.u32 %v7167_v47, 16  ;;  %v2975_v59 = vrot.slane %v2961_v50, %v7812_v21  ;;  %v1683_v47 = vld [vmem:[%s10016_s3 + $0x18] sm:$0x44] }
  0x33   : > { %v2158_v60 = vcombine.low %v2145_v52, %v2152_v53  ;;  %v2246_v61 = vshrl.u32 %v7168_v48, 16  ;;  %v7171_v63 = vcombine.low %v2342_v49, %v2342_v49  ;;  %v2254_v2 = vshrl.u32 %v7169_v56, 16 }
  0x34   : > { %v2165_v0 = vrot.slane %v2157_v54, %v7812_v21  ;;  %v2239_v1 = vpack.i.b16 %v2238_v58, %v2238_v58  ;;  %v2262_v3 = vshrl.u32 %v7170_v57, 16  ;;  %v2976_v4 = vcombine.low %v2968_v51, %v2975_v59 }
  0x35   : > { %v2172_v5 = vrot.slane %v2158_v60, %v7812_v21  ;;  %v2247_v6 = vpack.i.b16 %v2246_v61, %v2246_v61  ;;  %v7172_v7 = vcombine.high %v2342_v49, %v2342_v49  ;;  %v2255_v10 = vpack.i.b16 %v2254_v2, %v2254_v2 }
  0x36   : > { %v2244_v9 = vrot.slane %v2239_v1, %v7806_v17  ;;  %v2263_v11 = vpack.i.b16 %v2262_v3, %v2262_v3  ;;  %v7173_v12 = vcombine.low %v2343_v62, %v2343_v62  ;;  %2977 = vrot.lane.b32.xlu0 %v2976_v4, %s7742_s20  ;;  %v7174_v16 = vcombine.high %v2343_v62, %v2343_v62  ;;  %v1884_v62 = vld [vmem:[%s10016_s3 + $0x10] sm:$0x88] }
  0x37   : > { %v2173_v14 = vcombine.low %v2165_v0, %v2172_v5  ;;  %v2252_v15 = vrot.slane %v2247_v6, %v7806_v17  ;;  %v2355_v19 = vpack.i.b16 %v7171_v63, %v7171_v63  ;;  %v2260_v20 = vrot.slane %v2255_v10, %v7806_v17 }
  0x38   : > { %v2268_v22 = vrot.slane %v2263_v11, %v7806_v17  ;;  %v2362_v23 = vpack.i.b16 %v7172_v7, %v7172_v7  ;;  %v2369_v24 = vpack.i.b16 %v7173_v12, %v7173_v12  ;;  %v2376_v28 = vpack.i.b16 %v7174_v16, %v7174_v16  ;;  %v1885_v7 = vld [vmem:[%s10016_s3 + $0x18] sm:$0x88] }
  0x39   : > { %2174 = vrot.lane.b32.xlu1 %v2173_v14, %s7743_s23  ;;  %v2273_v26 = vcombine.low %v2244_v9, %v2252_v15  ;;  %v2360_v27 = vrot.slane %v2355_v19, %v7809_v18  ;;  %v7175_v29 = vcombine.low %v2454_v13, %v2454_v13  ;;  %v7176_v33 = vcombine.high %v2454_v13, %v2454_v13  ;;  %v1218_v13 = vld [vmem:[%s10016_s3 + $0x10] sm:$0x11] }
  0x3a   : > { %v2274_v30 = vcombine.low %v2260_v20, %v2268_v22  ;;  %v2367_v31 = vrot.slane %v2362_v23, %v7809_v18  ;;  %v2374_v32 = vrot.slane %v2369_v24, %v7809_v18  ;;  %v2381_v37 = vrot.slane %v2376_v28, %v7809_v18  ;;  %v1219_v28 = vld [vmem:[%s10016_s3 + $0x18] sm:$0x11] }
  0x3b   : > { %v2281_v36 = vrot.slane %v2273_v26, %v7812_v21  ;;  %v7177_v38 = vcombine.low %v2455_v25, %v2455_v25  ;;  %v7178_v39 = vcombine.high %v2455_v25, %v2455_v25  ;;  %v2467_v42 = vshrl.u32 %v7175_v29, 16 }
  0x3c   : > { %v2288_v40 = vrot.slane %v2274_v30, %v7812_v21  ;;  %v2386_v41 = vcombine.low %v2360_v27, %v2367_v31  ;;  %v2475_v43 = vshrl.u32 %v7176_v33, 16  ;;  %v2387_v44 = vcombine.low %v2374_v32, %v2381_v37 }
  0x3d   : > { %v2483_v45 = vshrl.u32 %v7177_v38, 16  ;;  %v2491_v46 = vshrl.u32 %v7178_v39, 16  ;;  %v7145_v48 = vcombine.low %v1682_v34, %v1682_v34  ;;  %v2468_v51 = vpack.i.b16 %v2467_v42, %v2467_v42  ;;  %v1996_v39 = vld [vmem:[%s10016_s3 + $0x10] sm:$0x88] }
  0x3e   : > { %v2289_v49 = vcombine.low %v2281_v36, %v2288_v40  ;;  %v2394_v50 = vrot.slane %v2386_v41, %v7812_v21  ;;  %v2476_v52 = vpack.i.b16 %v2475_v43, %v2475_v43  ;;  %v2401_v53 = vrot.slane %v2387_v44, %v7812_v21 }
  0x3f   : > { %v2484_v54 = vpack.i.b16 %v2483_v45, %v2483_v45  ;;  %v2492_v56 = vpack.i.b16 %v2491_v46, %v2491_v46  ;;  %v7146_v57 = vcombine.high %v1682_v34, %v1682_v34  ;;  %v2473_v58 = vrot.slane %v2468_v51, %v7809_v18 }
  0x40   : > { %2290 = vrot.lane.b32.xlu0 %v2289_v49, %s7744_s30  ;;  %v2481_v59 = vrot.slane %v2476_v52, %v7809_v18  ;;  %v7147_v60 = vcombine.low %v1683_v47, %v1683_v47  ;;  %v7148_v61 = vcombine.high %v1683_v47, %v1683_v47  ;;  %v2402_v63 = vcombine.low %v2394_v50, %v2401_v53 }
  0x41   : > { %v2489_v0 = vrot.slane %v2484_v54, %v7809_v18  ;;  %v2497_v1 = vrot.slane %v2492_v56, %v7809_v18  ;;  %v1695_v2 = vpack.i.b16 %v7145_v48, %v7145_v48  ;;  %v1702_v4 = vpack.i.b16 %v7146_v57, %v7146_v57  ;;  %v1997_v48 = vld [vmem:[%s10016_s3 + $0x18] sm:$0x88] }
  0x42   : > { %v2502_v3 = vcombine.low %v2473_v58, %v2481_v59  ;;  %v1709_v5 = vpack.i.b16 %v7147_v60, %v7147_v60  ;;  %v1716_v6 = vpack.i.b16 %v7148_v61, %v7148_v61  ;;  %2403 = vrot.lane.b32.xlu1 %v2402_v63, %s7745_s11  ;;  %v7155_v11 = vcombine.low %v1884_v62, %v1884_v62  ;;  %v1330_v58 = vld [vmem:[%s10016_s3 + $0x10] sm:$0x11] }
  0x43   : > { %v2503_v9 = vcombine.low %v2489_v0, %v2497_v1  ;;  %v1700_v10 = vrot.slane %v1695_v2, %v7834_v55  ;;  %v7156_v12 = vcombine.high %v1884_v62, %v1884_v62  ;;  %v1707_v15 = vrot.slane %v1702_v4, %v7834_v55 }
  0x44   : > { %v2510_v14 = vrot.slane %v2502_v3, %v7812_v21  ;;  %v1714_v16 = vrot.slane %v1709_v5, %v7834_v55  ;;  %v1721_v19 = vrot.slane %v1716_v6, %v7834_v55  ;;  %v7157_v22 = vcombine.low %v1885_v7, %v1885_v7  ;;  %v1331_v3 = vld [vmem:[%s10016_s3 + $0x18] sm:$0x11] }
  0x45   : > { %v2517_v20 = vrot.slane %v2503_v9, %v7812_v21  ;;  %v7158_v23 = vcombine.high %v1885_v7, %v1885_v7  ;;  %v1897_v24 = vpack.i.b16 %v7155_v11, %v7155_v11  ;;  %v1726_v25 = vcombine.low %v1700_v10, %v1707_v15 }
  0x46   : > { %v1727_v26 = vcombine.low %v1714_v16, %v1721_v19  ;;  %v1904_v27 = vpack.i.b16 %v7156_v12, %v7156_v12  ;;  %v7129_v29 = vcombine.low %v1218_v13, %v1218_v13  ;;  %v1911_v32 = vpack.i.b16 %v7157_v22, %v7157_v22 }
  0x47   : > { %v2518_v30 = vcombine.low %v2510_v14, %v2517_v20  ;;  %v1902_v31 = vrot.slane %v1897_v24, %v7863_v35  ;;  %v1918_v33 = vpack.i.b16 %v7158_v23, %v7158_v23  ;;  %v1734_v34 = vrot.slane %v1726_v25, %v7812_v21  ;;  %v1449_v24 = vld [vmem:[%s10016_s3 + $0x10] sm:$0x22] }
  0x48   : > { %v1741_v36 = vrot.slane %v1727_v26, %v7812_v21  ;;  %v1909_v37 = vrot.slane %v1904_v27, %v7863_v35  ;;  %v7130_v38 = vcombine.high %v1218_v13, %v1218_v13  ;;  %v1916_v40 = vrot.slane %v1911_v32, %v7863_v35 }
  0x49   : > { %2519 = vrot.lane.b32.xlu0 %v2518_v30, %s7746_s25  ;;  %v1923_v41 = vrot.slane %v1918_v33, %v7863_v35  ;;  %v7131_v42 = vcombine.low %v1219_v28, %v1219_v28  ;;  %v7132_v43 = vcombine.high %v1219_v28, %v1219_v28  ;;  %v1231_v46 = vpack.i.b16 %v7129_v29, %v7129_v29  ;;  %v1450_v33 = vld [vmem:[%s10016_s3 + $0x18] sm:$0x22] }
  0x4a   : > { %v1742_v44 = vcombine.low %v1734_v34, %v1741_v36  ;;  %v1928_v45 = vcombine.low %v1902_v31, %v1909_v37  ;;  %v1238_v47 = vpack.i.b16 %v7130_v38, %v7130_v38  ;;  %v7159_v52 = vcombine.low %v1996_v39, %v1996_v39 }
  0x4b   : > { %v1929_v49 = vcombine.low %v1916_v40, %v1923_v41  ;;  %v1245_v50 = vpack.i.b16 %v7131_v42, %v7131_v42  ;;  %v1252_v51 = vpack.i.b16 %v7132_v43, %v7132_v43  ;;  %v1236_v54 = vrot.slane %v1231_v46, %v7806_v17 }
  0x4c   : > { %1743 = vrot.lane.b32.xlu1 %v1742_v44, %s7747_s28  ;;  %v1936_v53 = vrot.slane %v1928_v45, %v7812_v21  ;;  %v1243_v56 = vrot.slane %v1238_v47, %v7806_v17  ;;  %v7160_v57 = vcombine.high %v1996_v39, %v1996_v39  ;;  %v7161_v62 = vcombine.low %v1997_v48, %v1997_v48  ;;  %v1563_v47 = vld [vmem:[%s10016_s3 + $0x10] sm:$0x22] }
  0x4d   : > { %v1943_v59 = vrot.slane %v1929_v49, %v7812_v21  ;;  %v1250_v60 = vrot.slane %v1245_v50, %v7806_v17  ;;  %v1257_v61 = vrot.slane %v1252_v51, %v7806_v17  ;;  %v7162_v0 = vcombine.high %v1997_v48, %v1997_v48 }
  0x4e   : > { %v1262_v63 = vcombine.low %v1236_v54, %v1243_v56  ;;  %v2009_v1 = vshrl.u32 %v7159_v52, 16  ;;  %v2017_v2 = vshrl.u32 %v7160_v57, 16  ;;  %v2025_v6 = vshrl.u32 %v7161_v62, 16  ;;  %v1564_v57 = vld [vmem:[%s10016_s3 + $0x18] sm:$0x22] }
  0x4f   : > { %v1944_v4 = vcombine.low %v1936_v53, %v1943_v59  ;;  %v1263_v5 = vcombine.low %v1250_v60, %v1257_v61  ;;  %v7133_v7 = vcombine.low %v1330_v58, %v1330_v58  ;;  %v2033_v12 = vshrl.u32 %v7162_v0, 16  ;;  %v759_v62 = vld [vmem:[%s10016_s3] sm:$0x44] }
  0x50   : > { %v1270_v9 = vrot.slane %v1262_v63, %v7812_v21  ;;  %v2010_v10 = vpack.i.b16 %v2009_v1, %v2009_v1  ;;  %v2018_v11 = vpack.i.b16 %v2017_v2, %v2017_v2  ;;  %v2026_v14 = vpack.i.b16 %v2025_v6, %v2025_v6 }
  0x51   : > { %1945 = vrot.lane.b32.xlu0 %v1944_v4, %s7748_s13  ;;  %v1277_v13 = vrot.slane %v1263_v5, %v7812_v21  ;;  %v7134_v15 = vcombine.high %v1330_v58, %v1330_v58  ;;  %v7135_v16 = vcombine.low %v1331_v3, %v1331_v3  ;;  %v2034_v22 = vpack.i.b16 %v2033_v12, %v2033_v12 }
  0x52   : > { %v2015_v19 = vrot.slane %v2010_v10, %v7863_v35  ;;  %v2023_v20 = vrot.slane %v2018_v11, %v7863_v35  ;;  %v7136_v23 = vcombine.high %v1331_v3, %v1331_v3  ;;  %v2031_v26 = vrot.slane %v2026_v14, %v7863_v35  ;;  %v760_v11 = vld [vmem:[%s10016_s3 + $0x8] sm:$0x44] }
  0x53   : > { %v1278_v25 = vcombine.low %v1270_v9, %v1277_v13  ;;  %v1343_v27 = vshrl.u32 %v7133_v7, 16  ;;  %v1351_v28 = vshrl.u32 %v7134_v15, 16  ;;  %v2039_v29 = vrot.slane %v2034_v22, %v7863_v35 }
  0x54   : > { %v2044_v30 = vcombine.low %v2015_v19, %v2023_v20  ;;  %v1359_v31 = vshrl.u32 %v7135_v16, 16  ;;  %v1367_v32 = vshrl.u32 %v7136_v23, 16  ;;  %v7137_v37 = vcombine.low %v1449_v24, %v1449_v24 }
  0x55   : > { %1279 = vrot.lane.b32.xlu0 %v1278_v25, %s7736_s7  ;;  %v1344_v34 = vpack.i.b16 %v1343_v27, %v1343_v27  ;;  %v1352_v36 = vpack.i.b16 %v1351_v28, %v1351_v28  ;;  %v7138_v38 = vcombine.high %v1449_v24, %v1449_v24  ;;  %v2045_v39 = vcombine.low %v2031_v26, %v2039_v29  ;;  %v872_v28 = vld [vmem:[%s10016_s3] sm:$0x44] }
  0x56   : > { %v2052_v40 = vrot.slane %v2044_v30, %v7812_v21  ;;  %v1360_v41 = vpack.i.b16 %v1359_v31, %v1359_v31  ;;  %v1368_v42 = vpack.i.b16 %v1367_v32, %v1367_v32  ;;  %v7139_v45 = vcombine.low %v1450_v33, %v1450_v33 }
  0x57   : > { %v1349_v43 = vrot.slane %v1344_v34, %v7806_v17  ;;  %v1357_v44 = vrot.slane %v1352_v36, %v7806_v17  ;;  %v7140_v46 = vcombine.high %v1450_v33, %v1450_v33  ;;  %v2059_v48 = vrot.slane %v2045_v39, %v7812_v21 }
  0x58   : > { %v1365_v49 = vrot.slane %v1360_v41, %v7806_v17  ;;  %v1373_v50 = vrot.slane %v1368_v42, %v7806_v17  ;;  %v1462_v51 = vpack.i.b16 %v7137_v37, %v7137_v37  ;;  %v1469_v53 = vpack.i.b16 %v7138_v38, %v7138_v38  ;;  %v873_v38 = vld [vmem:[%s10016_s3 + $0x8] sm:$0x44] }
  0x59   : > { %v1378_v52 = vcombine.low %v1349_v43, %v1357_v44  ;;  %v1476_v54 = vpack.i.b16 %v7139_v45, %v7139_v45  ;;  %v1483_v56 = vpack.i.b16 %v7140_v46, %v7140_v46  ;;  %v2060_v58 = vcombine.low %v2052_v40, %v2059_v48 }
  0x5a   : > { %v1379_v59 = vcombine.low %v1365_v49, %v1373_v50  ;;  %v1467_v60 = vrot.slane %v1462_v51, %v7809_v18  ;;  %v7141_v61 = vcombine.low %v1563_v47, %v1563_v47  ;;  %v1474_v0 = vrot.slane %v1469_v53, %v7809_v18  ;;  %v989_v51 = vld [vmem:[%s10016_s3] sm:$0x88] }
  0x5b   : > { %v1386_v63 = vrot.slane %v1378_v52, %v7812_v21  ;;  %v1481_v1 = vrot.slane %v1476_v54, %v7809_v18  ;;  %v1488_v2 = vrot.slane %v1483_v56, %v7809_v18  ;;  %2061 = vrot.lane.b32.xlu1 %v2060_v58, %s7749_s10  ;;  %v7142_v4 = vcombine.high %v1563_v47, %v1563_v47 }
  0x5c   : > { %v1393_v3 = vrot.slane %v1379_v59, %v7812_v21  ;;  %v7143_v5 = vcombine.low %v1564_v57, %v1564_v57  ;;  %v7144_v6 = vcombine.high %v1564_v57, %v1564_v57  ;;  %v1493_v7 = vcombine.low %v1467_v60, %v1474_v0 }
  0x5d   : > { %v1494_v9 = vcombine.low %v1481_v1, %v1488_v2  ;;  %v1576_v10 = vshrl.u32 %v7141_v61, 16  ;;  %v7113_v12 = vcombine.low %v759_v62, %v759_v62  ;;  %v1584_v14 = vshrl.u32 %v7142_v4, 16  ;;  %v990_v61 = vld [vmem:[%s10016_s3 + $0x8] sm:$0x88] }
  0x5e   : > { %v1394_v13 = vcombine.low %v1386_v63, %v1393_v3  ;;  %v1592_v15 = vshrl.u32 %v7143_v5, 16  ;;  %v1600_v16 = vshrl.u32 %v7144_v6, 16  ;;  %v1501_v19 = vrot.slane %v1493_v7, %v7812_v21 }
  0x5f   : > { %v1508_v20 = vrot.slane %v1494_v9, %v7812_v21  ;;  %v1577_v22 = vpack.i.b16 %v1576_v10, %v1576_v10  ;;  %v7114_v23 = vcombine.high %v759_v62, %v759_v62  ;;  %v1585_v24 = vpack.i.b16 %v1584_v14, %v1584_v14 }
  0x60   : > { %1395 = vrot.lane.b32.xlu1 %v1394_v13, %s7750_s18  ;;  %v1593_v25 = vpack.i.b16 %v1592_v15, %v1592_v15  ;;  %v1601_v26 = vpack.i.b16 %v1600_v16, %v1600_v16  ;;  %v7115_v27 = vcombine.low %v760_v11, %v760_v11  ;;  %v7116_v31 = vcombine.high %v760_v11, %v760_v11  ;;  %v1101_v11 = vld [vmem:[%s10016_s3] sm:$0x88] }
  0x61   : > { %v1509_v29 = vcombine.low %v1501_v19, %v1508_v20  ;;  %v1582_v30 = vrot.slane %v1577_v22, %v7809_v18  ;;  %v772_v32 = vpack.i.b16 %v7113_v12, %v7113_v12  ;;  %v1590_v33 = vrot.slane %v1585_v24, %v7809_v18 }
  0x62   : > { %v1598_v34 = vrot.slane %v1593_v25, %v7809_v18  ;;  %v1606_v36 = vrot.slane %v1601_v26, %v7809_v18  ;;  %v779_v37 = vpack.i.b16 %v7114_v23, %v7114_v23  ;;  %v786_v40 = vpack.i.b16 %v7115_v27, %v7115_v27  ;;  %v1102_v23 = vld [vmem:[%s10016_s3 + $0x8] sm:$0x88] }
  0x63   : > { %1510 = vrot.lane.b32.xlu0 %v1509_v29, %s7751_s5  ;;  %v777_v39 = vrot.slane %v772_v32, %v7834_v55  ;;  %v793_v41 = vpack.i.b16 %v7116_v31, %v7116_v31  ;;  %v7117_v42 = vcombine.low %v872_v28, %v872_v28  ;;  %v1611_v43 = vcombine.low %v1582_v30, %v1590_v33  ;;  %v292_v32 = vld [vmem:[%s10016_s3] sm:$0x11] }
  0x64   : > { %v1612_v44 = vcombine.low %v1598_v34, %v1606_v36  ;;  %v784_v45 = vrot.slane %v779_v37, %v7834_v55  ;;  %v7118_v46 = vcombine.high %v872_v28, %v872_v28  ;;  %v791_v47 = vrot.slane %v786_v40, %v7834_v55 }
  0x65   : > { %v798_v48 = vrot.slane %v793_v41, %v7834_v55  ;;  %v7119_v49 = vcombine.low %v873_v38, %v873_v38  ;;  %v7120_v50 = vcombine.high %v873_v38, %v873_v38  ;;  %v1619_v52 = vrot.slane %v1611_v43, %v7812_v21 }
  0x66   : > { %v1626_v53 = vrot.slane %v1612_v44, %v7812_v21  ;;  %v803_v54 = vcombine.low %v777_v39, %v784_v45  ;;  %v885_v56 = vshrl.u32 %v7117_v42, 16  ;;  %v893_v58 = vshrl.u32 %v7118_v46, 16  ;;  %v293_v42 = vld [vmem:[%s10016_s3 + $0x8] sm:$0x11] }
  0x67   : > { %v804_v57 = vcombine.low %v791_v47, %v798_v48  ;;  %v901_v59 = vshrl.u32 %v7119_v49, 16  ;;  %v909_v60 = vshrl.u32 %v7120_v50, 16  ;;  %v7121_v1 = vcombine.low %v989_v51, %v989_v51 }
  0x68   : > { %v1627_v62 = vcombine.low %v1619_v52, %v1626_v53  ;;  %v811_v63 = vrot.slane %v803_v54, %v7812_v21  ;;  %v886_v0 = vpack.i.b16 %v885_v56, %v885_v56  ;;  %v894_v3 = vpack.i.b16 %v893_v58, %v893_v58 }
  0x69   : > { %v818_v2 = vrot.slane %v804_v57, %v7812_v21  ;;  %v902_v4 = vpack.i.b16 %v901_v59, %v901_v59  ;;  %v910_v5 = vpack.i.b16 %v909_v60, %v909_v60  ;;  %v7122_v7 = vcombine.high %v989_v51, %v989_v51 }
  0x6a   : > { %1628 = vrot.lane.b32.xlu1 %v1627_v62, %s7752_s22  ;;  %v891_v6 = vrot.slane %v886_v0, %v7834_v55  ;;  %v7123_v9 = vcombine.low %v990_v61, %v990_v61  ;;  %v7124_v10 = vcombine.high %v990_v61, %v990_v61  ;;  %v899_v13 = vrot.slane %v894_v3, %v7834_v55  ;;  %v255_v0 = vld [vmem:[%s8109_s14] sm:$0xff] }
  0x6b   : > { %v819_v12 = vcombine.low %v811_v63, %v818_v2  ;;  %v907_v14 = vrot.slane %v902_v4, %v7834_v55  ;;  %v915_v15 = vrot.slane %v910_v5, %v7834_v55  ;;  %v1002_v16 = vpack.i.b16 %v7121_v1, %v7121_v1  ;;  %v256_v4 = vld [vmem:[%s8109_s14 + $0x8] sm:$0xff] }
  0x6c   : > { %v1009_v19 = vpack.i.b16 %v7122_v7, %v7122_v7  ;;  %v1016_v20 = vpack.i.b16 %v7123_v9, %v7123_v9  ;;  %v1023_v22 = vpack.i.b16 %v7124_v10, %v7124_v10  ;;  %v920_v24 = vcombine.low %v891_v6, %v899_v13  ;;  %v407_v10 = vld [vmem:[%s10016_s3] sm:$0x11] }
  0x6d   : > { %820 = vrot.lane.b32.xlu0 %v819_v12, %s7741_s9  ;;  %v921_v25 = vcombine.low %v907_v14, %v915_v15  ;;  %v7125_v26 = vcombine.low %v1101_v11, %v1101_v11  ;;  %v7126_v27 = vcombine.high %v1101_v11, %v1101_v11  ;;  %v1007_v28 = vrot.slane %v1002_v16, %v7863_v35  ;;  %v408_v15 = vld [vmem:[%s10016_s3 + $0x8] sm:$0x11] }
  0x6e   : > { %v1014_v29 = vrot.slane %v1009_v19, %v7863_v35  ;;  %v1021_v30 = vrot.slane %v1016_v20, %v7863_v35  ;;  %v1028_v31 = vrot.slane %v1023_v22, %v7863_v35  ;;  %v928_v33 = vrot.slane %v920_v24, %v7812_v21 }
  0x6f   : > { %v935_v34 = vrot.slane %v921_v25, %v7812_v21  ;;  %v7127_v36 = vcombine.low %v1102_v23, %v1102_v23  ;;  %v7128_v37 = vcombine.high %v1102_v23, %v1102_v23  ;;  %v1114_v40 = vshrl.u32 %v7125_v26, 16  ;;  %v526_v26 = vld [vmem:[%s10016_s3] sm:$0x22] }
  0x70   : > { %v1033_v38 = vcombine.low %v1007_v28, %v1014_v29  ;;  %v1034_v39 = vcombine.low %v1021_v30, %v1028_v31  ;;  %v1122_v41 = vshrl.u32 %v7126_v27, 16  ;;  %v7097_v46 = vcombine.low %v292_v32, %v292_v32 }
  0x71   : > { %v936_v43 = vcombine.low %v928_v33, %v935_v34  ;;  %v1130_v44 = vshrl.u32 %v7127_v36, 16  ;;  %v1138_v45 = vshrl.u32 %v7128_v37, 16  ;;  %v1115_v49 = vpack.i.b16 %v1114_v40, %v1114_v40  ;;  %v527_v36 = vld [vmem:[%s10016_s3 + $0x8] sm:$0x22] }
  0x72   : > { %v1041_v47 = vrot.slane %v1033_v38, %v7812_v21  ;;  %v1048_v48 = vrot.slane %v1034_v39, %v7812_v21  ;;  %v1123_v50 = vpack.i.b16 %v1122_v41, %v1122_v41  ;;  %v7098_v53 = vcombine.high %v292_v32, %v292_v32 }
  0x73   : > { %937 = vrot.lane.b32.xlu1 %v936_v43, %s7742_s20  ;;  %v1131_v51 = vpack.i.b16 %v1130_v44, %v1130_v44  ;;  %v1139_v52 = vpack.i.b16 %v1138_v45, %v1138_v45  ;;  %v7099_v54 = vcombine.low %v293_v42, %v293_v42  ;;  %v1120_v57 = vrot.slane %v1115_v49, %v7863_v35 }
  0x74   : > { %v1049_v56 = vcombine.low %v1041_v47, %v1048_v48  ;;  %v1128_v58 = vrot.slane %v1123_v50, %v7863_v35  ;;  %v7100_v59 = vcombine.high %v293_v42, %v293_v42  ;;  %v305_v62 = vpack.i.b16 %v7097_v46, %v7097_v46 }
  0x75   : > { %v1136_v60 = vrot.slane %v1131_v51, %v7863_v35  ;;  %v1144_v61 = vrot.slane %v1139_v52, %v7863_v35  ;;  %v312_v63 = vpack.i.b16 %v7098_v53, %v7098_v53  ;;  %v319_v2 = vpack.i.b16 %v7099_v54, %v7099_v54 }
  0x76   : > { %1050 = vrot.lane.b32.xlu0 %v1049_v56, %s7737_s12  ;;  %v1149_v1 = vcombine.low %v1120_v57, %v1128_v58  ;;  %v326_v3 = vpack.i.b16 %v7100_v59, %v7100_v59  ;;  %v310_v6 = vrot.slane %v305_v62, %v7806_v17  ;;  %v10021_v9 = vmov 0   ;;  %v640_v58 = vld [vmem:[%s10016_s3] sm:$0x22]  ;;  %v641_v62 = vld [vmem:[%s10016_s3 + $0x8] sm:$0x22] }
  0x77   : > { %v1150_v5 = vcombine.low %v1136_v60, %v1144_v61  ;;  %v317_v7 = vrot.slane %v312_v63, %v7806_v17  ;;  %254 = vst [vmem:[#allocation2 + $0xa] sm:$0x3] %v10021_v9  ;;  %253 = vst [vmem:[#allocation2] sm:$0x3] %v10021_v9  ;;  %3593 = vmatprep.mubr.bf16.mxu0 %v10021_v9  ;;  %3634 = vmatprep.mubr.bf16.mxu1 %v10021_v9  ;;  %vm590_vm0 = vcmask 465920   ;;  %vm823_vm1 = vcmask 523264  }
  0x78   : > { %v1157_v11 = vrot.slane %v1149_v1, %v7812_v21  ;;  %v324_v12 = vrot.slane %v319_v2, %v7806_v17  ;;  %v331_v13 = vrot.slane %v326_v3, %v7806_v17  ;;  %v259_v14 = vcombine.high %v255_v0, %v255_v0 }
  0x79   : > { %v1164_v16 = vrot.slane %v1150_v5, %v7812_v21  ;;  %v336_v19 = vcombine.low %v310_v6, %v317_v7  ;;  %v260_v20 = vcombine.high %v256_v4, %v256_v4  ;;  %v7101_v24 = vcombine.low %v407_v10, %v407_v10 }
  0x7a   : > { %v337_v22 = vcombine.low %v324_v12, %v331_v13  ;;  %v7095_v23 = vpack.c.bf16 %v259_v14, %v255_v0  ;;  %v7102_v25 = vcombine.high %v407_v10, %v407_v10  ;;  %v7103_v30 = vcombine.low %v408_v15, %v408_v15 }
  0x7b   : > { %v1165_v27 = vcombine.low %v1157_v11, %v1164_v16  ;;  %v344_v28 = vrot.slane %v336_v19, %v7812_v21  ;;  %v7096_v29 = vpack.c.bf16 %v260_v20, %v256_v4  ;;  %v7104_v33 = vcombine.high %v408_v15, %v408_v15 }
  0x7c   : > { %v351_v31 = vrot.slane %v337_v22, %v7812_v21  ;;  %v279_v32 = vrot.slane %v7095_v23, %v7812_v21  ;;  %v420_v34 = vshrl.u32 %v7101_v24, 16  ;;  %v428_v38 = vshrl.u32 %v7102_v25, 16 }
  0x7d   : > { %1166 = vrot.lane.b32.xlu1 %v1165_v27, %s7738_s19  ;;  %v286_v37 = vrot.slane %v7096_v29, %v7812_v21  ;;  %v436_v39 = vshrl.u32 %v7103_v30, 16  ;;  %v7105_v40 = vcombine.low %v526_v26, %v526_v26  ;;  %v444_v43 = vshrl.u32 %v7104_v33, 16 }
  0x7e   : > { %v352_v41 = vcombine.low %v344_v28, %v351_v31  ;;  %v421_v42 = vpack.i.b16 %v420_v34, %v420_v34  ;;  %v7106_v44 = vcombine.high %v526_v26, %v526_v26  ;;  %v429_v46 = vpack.i.b16 %v428_v38, %v428_v38  ;;  %v3028_v38 = vld [vmem:[#allocation2 + $0xa] sm:$0x3] }
  0x7f   : > { %v8146_v45 = vcombine.low %v279_v32, %v286_v37  ;;  %v437_v47 = vpack.i.b16 %v436_v39, %v436_v39  ;;  %v7107_v48 = vcombine.low %v527_v36, %v527_v36  ;;  %v445_v50 = vpack.i.b16 %v444_v43, %v444_v43 }
  0x80   : > { %353 = vrot.lane.b32.xlu0 %v352_v41, %s7745_s11  ;;  %v426_v49 = vrot.slane %v421_v42, %v7806_v17  ;;  %v7108_v51 = vcombine.high %v527_v36, %v527_v36  ;;  %v539_v52 = vpack.i.b16 %v7105_v40, %v7105_v40  ;;  %v434_v53 = vrot.slane %v429_v46, %v7806_v17  ;;  %v3257_v36 = vld [vmem:[#allocation2 + $0xa] sm:$0x3] }
  0x81   : > { %289 = vst [vmem:[#allocation2 + $0x2] sm:$0xff] %v8146_v45  ;;  %v442_v54 = vrot.slane %v437_v47, %v7806_v17  ;;  %v546_v56 = vpack.i.b16 %v7106_v44, %v7106_v44  ;;  %v553_v57 = vpack.i.b16 %v7107_v48, %v7107_v48  ;;  %v450_v59 = vrot.slane %v445_v50, %v7806_v17  ;;  %v2570_v50 = vld [vmem:[#allocation2 + $0xa] sm:$0x3] }
  0x82   : > { %v544_v60 = vrot.slane %v539_v52, %v7809_v18  ;;  %v560_v61 = vpack.i.b16 %v7108_v51, %v7108_v51  ;;  %v455_v63 = vcombine.low %v426_v49, %v434_v53  ;;  %v7109_v4 = vcombine.low %v640_v58, %v640_v58 }
  0x83   : > { %v551_v0 = vrot.slane %v546_v56, %v7809_v18  ;;  %v558_v1 = vrot.slane %v553_v57, %v7809_v18  ;;  %v456_v2 = vcombine.low %v442_v54, %v450_v59  ;;  %v7110_v5 = vcombine.high %v640_v58, %v640_v58  ;;  %v2799_v56 = vld [vmem:[#allocation2 + $0xa] sm:$0x3] }
  0x84   : > { %v565_v3 = vrot.slane %v560_v61, %v7809_v18  ;;  %v463_v6 = vrot.slane %v455_v63, %v7812_v21  ;;  %v7111_v10 = vcombine.low %v641_v62, %v641_v62  ;;  %v7112_v11 = vcombine.high %v641_v62, %v641_v62  ;;  %v2112_v63 = vld [vmem:[#allocation2 + $0xa] sm:$0x3] }
  0x85   : > { %v570_v7 = vcombine.low %v544_v60, %v551_v0  ;;  %v470_v12 = vrot.slane %v456_v2, %v7812_v21  ;;  %v653_v14 = vshrl.u32 %v7109_v4, 16  ;;  %v661_v15 = vshrl.u32 %v7110_v5, 16  ;;  %v2341_v5 = vld [vmem:[#allocation2 + $0xa] sm:$0x3] }
  0x86   : > { %v571_v13 = vcombine.low %v558_v1, %v565_v3  ;;  %v669_v19 = vshrl.u32 %v7111_v10, 16  ;;  %v677_v20 = vshrl.u32 %v7112_v11, 16  ;;  %vm630_vm2 = vcmask 580608  }
  0x87   : > { %v578_v16 = vrot.slane %v570_v7, %v7812_v21  ;;  %v471_v22 = vcombine.low %v463_v6, %v470_v12  ;;  %v654_v24 = vpack.i.b16 %v653_v14, %v653_v14  ;;  %v662_v25 = vpack.i.b16 %v661_v15, %v661_v15 }
  0x88   : > { %v585_v23 = vrot.slane %v571_v13, %v7812_v21  ;;  %v670_v26 = vpack.i.b16 %v669_v19, %v669_v19  ;;  %v678_v27 = vpack.i.b16 %v677_v20, %v677_v20  ;;  %v1681_v15 = vld [vmem:[#allocation2 + $0x8] sm:$0x3]  ;;  %vm10019_vm3 = vcmask 64512  }
  0x89   : > { %472 = vrot.lane.b32.xlu1 %v471_v22, %s7746_s25  ;;  %v659_v29 = vrot.slane %v654_v24, %v7809_v18  ;;  %v667_v30 = vrot.slane %v662_v25, %v7809_v18  ;;  %vm397_vm4 = vcmask 596992   ;;  %vm356_vm5 = vcmask 449536  }
  0x8a   : > { %v586_v28 = vcombine.low %v578_v16, %v585_v23  ;;  %v675_v31 = vrot.slane %v670_v26, %v7809_v18  ;;  %v683_v32 = vrot.slane %v678_v27, %v7809_v18  ;;  %v1883_v23 = vld [vmem:[#allocation2 + $0xa] sm:$0x3]  ;;  %vm1786_vm6 = vcmask 7168  }
  0x8b   : > { %v688_v33 = vcombine.low %v659_v29, %v667_v30  ;;  %v8174_v37 = vpop.permute.xlu1 %3319  ;;  %vm1746_vm7 = vcmask 1039360   ;;  %vm708_vm8 = vcmask 515072   ;;  %vm516_vm9 = vcmask 588800  }
  0x8c   : > { %587 = vrot.lane.b32.xlu0 %v586_v28, %s7739_s24  ;;  %v689_v34 = vcombine.low %v675_v31, %v683_v32  ;;  %v3321_v41 = vrot.slane %v8174_v37, 6  ;;  %vm749_vm10 = vcmask 531456   ;;  %vm10018_vm11 = vcmask 56320  }
  0x8d   : > { %v696_v40 = vrot.slane %v688_v33, %v7812_v21  ;;  %vm1439_vm12 = vcmask 72704   ;;  %vm475_vm13 = vcmask 457728   ;;  %vm203_vm14 = vcmp.eq.s32.totalorder %v7800_v8, 0 }
  0x8e   : > { %v3091_v39 = vpop.permute.xlu0 %3090  ;;  %v703_v43 = vrot.slane %v689_v34, %v7812_v21  ;;  %v3326_v44 = vmul.bf16 %v3321_v41, %v3257_v36  ;;  %v3322_v36 = vsel %vm397_vm4, %v3321_v41, %v8174_v37  ;;  %vm234_vm15 = vcmask 1041408  }
  0x8f   : > { %v3092_v42 = vrot.slane %v3091_v39, 6 }
  0x90   : > { %v704_v47 = vcombine.low %v696_v40, %v703_v43  ;;  %v3350_v49 = vrot.slane %v3326_v44, %v7812_v21 }
  0x91   : > { %v3097_v46 = vmul.bf16 %v3092_v42, %v3028_v38  ;;  %v3093_v28 = vsel %vm630_vm2, %v3092_v42, %v3091_v39  ;;  %v8236_v42 = vmul.bf16 %v3322_v36, %v8146_v45 }
  0x92   : > { %705 = vrot.lane.b32.xlu1 %v704_v47, %s7740_s29  ;;  %v8218_v32 = vmul.bf16 %v3093_v28, %v8146_v45 }
  0x93   : > { %v3121_v48 = vrot.slane %v3097_v46, %v7812_v21 }
  0x94   : > { %v8188_v59 = vpop.permute.xlu0 %3206  ;;  %v3107_v37 = vrot.slane %v8218_v32, %v7812_v21 }
  0x95   : > { %3126 = vrot.lane.b32.xlu0 %v3121_v48, %s7739_s24 }
  0x99   : > { %v2633_v51 = vpop.permute.xlu1 %2632  ;;  %3355 = vrot.lane.b32.xlu0 %v3350_v49, %s7745_s11  ;;  %v8251_v49 = vld [vmem:[#allocation2] sm:$0xff] }
  0x9a   : > { %v2634_v52 = vrot.slane %v2633_v51, 6 }
  0x9c   : > { %v2639_v53 = vmul.bf16 %v2634_v52, %v2570_v50  ;;  %v2635_v19 = vsel %vm590_vm0, %v2634_v52, %v2633_v51  ;;  %v3336_v52 = vrot.slane %v8236_v42, %v7812_v21 }
  0x9d   : > { %v8206_v22 = vmul.bf16 %v2635_v19, %v8146_v45 }
  0x9e   : > { %v2663_v54 = vrot.slane %v2639_v53, %v7812_v21  ;;  %v8192_v62 = vpop.permute.xlu0 %2748  ;;  %v3208_v53 = vrot.slane %v8188_v59, 6 }
  0x9f   : > { %v2649_v31 = vrot.slane %v8206_v22, %v7812_v21  ;;  %v2750_v48 = vrot.slane %v8192_v62, 6  ;;  %v2642_v28 = vcombine.high %v8206_v22, %v8206_v22 }
  0xa0   : > { %2668 = vrot.lane.b32.xlu1 %v2663_v54, %s7737_s12 }
  0xa1   : > { %v2656_v36 = vrot.slane %v2642_v28, %v7812_v21 }
  0xa2   : > { %v2862_v57 = vpop.permute.xlu1 %2861 }
  0xa3   : > { %v2863_v58 = vrot.slane %v2862_v57, 6 }
  0xa5   : > { %v2868_v60 = vmul.bf16 %v2863_v58, %v2799_v56  ;;  %v2864_v26 = vsel %vm823_vm1, %v2863_v58, %v2862_v57 }
  0xa6   : > { %v8213_v30 = vmul.bf16 %v2864_v26, %v8146_v45 }
  0xa7   : > { %v2892_v61 = vrot.slane %v2868_v60, %v7812_v21  ;;  %v2751_v60 = vsel %vm708_vm8, %v2750_v48, %v8192_v62 }
  0xa8   : > { %v8195_v4 = vpop.permute.xlu0 %2977  ;;  %v2878_v40 = vrot.slane %v8213_v30, %v7812_v21  ;;  %v8287_v62 = vmul.bf16 %v2751_v60, %v8146_v45  ;;  %v3100_v60 = vcombine.high %v8218_v32, %v8218_v32 }
  0xa9   : > { %2897 = vrot.lane.b32.xlu1 %v2892_v61, %s7741_s9  ;;  %v2979_v61 = vrot.slane %v8195_v4, 6 }
  0xab   : > { %v2175_v0 = vpop.permute.xlu1 %2174 }
  0xac   : > { %v2176_v1 = vrot.slane %v2175_v0, 6 }
  0xae   : > { %v2181_v2 = vmul.bf16 %v2176_v1, %v2112_v63  ;;  %v2177_v33 = vsel %vm10019_vm3, %v2176_v1, %v2175_v0  ;;  %v3209_v1 = vsel %vm516_vm9, %v3208_v53, %v8188_v59  ;;  %v2980_v59 = vsel %vm749_vm10, %v2979_v61, %v8195_v4 }
  0xaf   : > { %v8231_v39 = vmul.bf16 %v2177_v33, %v8146_v45  ;;  %v2772_v4 = vrot.slane %v8287_v62, %v7812_v21  ;;  %vm395_vm3 = vcmask 1043456  }
  0xb0   : > { %v2205_v3 = vrot.slane %v2181_v2, %v7812_v21 }
  0xb1   : > { %v2191_v47 = vrot.slane %v8231_v39, %v7812_v21 }
  0xb2   : > { %2210 = vrot.lane.b32.xlu1 %v2205_v3, %s7751_s5  ;;  %v8198_v10 = vpop.permute.xlu0 %2290 }
  0xb4   : > { %v2404_v6 = vpop.permute.xlu1 %2403 }
  0xb5   : > { %v2405_v7 = vrot.slane %v2404_v6, 6 }
  0xb7   : > { %v2410_v11 = vmul.bf16 %v2405_v7, %v2341_v5  ;;  %v2406_v43 = vsel %vm356_vm5, %v2405_v7, %v2404_v6  ;;  %v8292_v5 = vmul.bf16 %v3209_v1, %v8146_v45  ;;  %v2292_v6 = vrot.slane %v8198_v10, 6 }
  0xb8   : > { %v8246_v46 = vmul.bf16 %v2406_v43, %v8146_v45 }
  0xb9   : > { %v2434_v12 = vrot.slane %v2410_v11, %v7812_v21 }
  0xba   : > { %v2420_v58 = vrot.slane %v8246_v46, %v7812_v21 }
  0xbb   : > { %2439 = vrot.lane.b32.xlu1 %v2434_v12, %s7736_s7  ;;  %v8202_v13 = vpop.permute.xlu0 %2519  ;;  %v2682_v12 = vld [vmem:[#allocation2 + $0xa] sm:$0x3] }
  0xbe   : > { %v1744_v14 = vpop.permute.xlu1 %1743 }
  0xbf   : > { %v1745_v16 = vrot.slane %v1744_v14, 6 }
  0xc1   : > { %v1751_v20 = vmul.bf16 %v1745_v16, %v1681_v15  ;;  %v1747_v50 = vsel %vm1746_vm7, %v1745_v16, %v1744_v14  ;;  %v8306_v14 = vmul.bf16 %v2980_v59, %v8146_v45  ;;  %v2293_v15 = vsel %vm1439_vm12, %v2292_v6, %v8198_v10 }
  0xc2   : > { %v8269_v57 = vmul.bf16 %v1747_v50, %v8251_v49  ;;  %v2521_v16 = vrot.slane %v8202_v13, 6 }
  0xc3   : > { %v1946_v24 = vpop.permute.xlu0 %1945  ;;  %v1775_v25 = vrot.slane %v1751_v20, %v7812_v21  ;;  %v3230_v20 = vrot.slane %v8292_v5, %v7812_v21 }
  0xc4   : > { %v1947_v27 = vrot.slane %v1946_v24, 6  ;;  %v1761_v3 = vrot.slane %v8269_v57, %v7812_v21  ;;  %v2522_v26 = vsel %vm475_vm13, %v2521_v16, %v8202_v13 }
  0xc5   : > { %1780 = vrot.lane.b32.xlu1 %v1775_v25, %s7748_s13  ;;  %v3001_v25 = vrot.slane %v8306_v14, %v7812_v21  ;;  %v8338_v33 = vmul.bf16 %v2522_v26, %v8146_v45  ;;  %v3329_v26 = vcombine.high %v8236_v42, %v8236_v42 }
  0xc6   : > { %v1952_v29 = vmul.bf16 %v1947_v27, %v1883_v23  ;;  %v1948_v41 = vsel %vm1786_vm6, %v1947_v27, %v1946_v24  ;;  %v2755_v23 = vmul.bf16 %v2750_v48, %v2682_v12  ;;  %v8323_v24 = vmul.bf16 %v2293_v15, %v8146_v45 }
  0xc7   : > { %v8228_v38 = vpop.permute.xlu0 %1279  ;;  %v8255_v51 = vmul.bf16 %v1948_v41, %v8146_v45  ;;  %v7756_v48 = vmov 0.0   ;;  %v3114_v15 = vrot.slane %v3100_v60, %v7812_v21 }
  0xc8   : > { %v1976_v34 = vrot.slane %v1952_v29, %v7812_v21  ;;  %v1281_v44 = vrot.slane %v8228_v38, 6  ;;  %v2773_v29 = vcombine.low %v2755_v23, %v2755_v23 }
  0xc9   : > { %2664 = vrot.lane.b32.xlu1 %v2649_v31, %s7737_s12  ;;  %v1962_v0 = vrot.slane %v8255_v51, %v7812_v21  ;;  %v3140_v31 = vld [vmem:[#allocation2 + $0xa] sm:$0x3]  ;;  %v1955_v60 = vcombine.high %v8255_v51, %v8255_v51 }
  0xca   : > { %1981 = vrot.lane.b32.xlu0 %v1976_v34, %s7747_s28  ;;  %v1282_v54 = vsel %vm397_vm4, %v1281_v44, %v8228_v38  ;;  %v2314_v34 = vrot.slane %v8323_v24, %v7812_v21  ;;  %v3213_v22 = vmul.bf16 %v3208_v53, %v3140_v31 }
  0xcb   : > { %v8277_v63 = vmul.bf16 %v8251_v49, %v1282_v54  ;;  %v2543_v54 = vrot.slane %v8338_v33, %v7812_v21 }
  0xcd   : > { %2893 = vrot.lane.b32.xlu1 %v2878_v40, %s7741_s9  ;;  %v8266_v56 = vpop.permute.xlu1 %2061  ;;  %v1296_v7 = vrot.slane %v8277_v63, %v7812_v21  ;;  %v7754_v40 = vmov 839922192   ;;  %v1289_v13 = vcombine.high %v8277_v63, %v8277_v63  ;;  %v3216_v63 = vcombine.low %v8292_v5, %v8292_v5 }
  0xce   : > { %3122 = vrot.lane.b32.xlu0 %v3107_v37, %s7739_s24  ;;  %v2063_v2 = vrot.slane %v8266_v56, 6  ;;  %v214_v43 = vunpack.c.l.s4 %v7754_v40  ;;  %v7755_v37 = vmov 1985246804  }
  0xcf   : > { %v221_v41 = vunpack.c.l.s4 %v7755_v37  ;;  %v1995_v37 = vld [vmem:[#allocation2 + $0xa] sm:$0x3] }
  0xd0   : > { %v2064_v11 = vsel %vm10018_vm11, %v2063_v2, %v8266_v56  ;;  %v215_v50 = vunpack.c.0.s8 %v214_v43 }
  0xd1   : > { %2206 = vrot.lane.b32.xlu1 %v2191_v47, %s7751_s5  ;;  %v8316_v19 = vmul.bf16 %v2064_v11, %v8146_v45  ;;  %v2911_v47 = vld [vmem:[#allocation2 + $0xa] sm:$0x3]  ;;  %v206_v45 = vsel %vm203_vm14, 1.0, %v7756_v48  ;;  %vm235_vm14 = vcmask 1045508  }
  0xd2   : > { %3351 = vrot.lane.b32.xlu0 %v3336_v52, %s7745_s11  ;;  %v222_v52 = vunpack.c.0.s8 %v221_v41  ;;  %v2984_v1 = vmul.bf16 %v2979_v61, %v2911_v47  ;;  %v218_v53 = vsub.s32 %v215_v50, %v7800_v8  ;;  %vm8372_vm11 = vmor %vm234_vm15, %vm235_vm14  ;;  %v3343_v50 = vrot.slane %v3329_v26, %v7812_v21 }
  0xd3   : > { %v2085_v27 = vrot.slane %v8316_v19, %v7812_v21  ;;  %vm10025_vm15 = vcmask 982016   ;;  %vm10024_vm14 = vcmask 990208  }
  0xd4   : > { %v225_v59 = vsub.s32 %v222_v52, %v7800_v8  ;;  %v3002_v61 = vcombine.low %v2984_v1, %v2984_v1  ;;  %v1795_v8 = vld [vmem:[%s10016_s3 + $0x10] sm:$0x44] }
  0xd5   : > { %2435 = vrot.lane.b32.xlu1 %v2420_v58, %s7736_s7  ;;  %v2780_v58 = vrot.slane %v2773_v29, %v7812_v21  ;;  %v7149_v40 = vcombine.low %v1795_v8, %v1795_v8  ;;  %v7150_v42 = vcombine.high %v1795_v8, %v1795_v8 }
  0xd6   : > { %1977 = vrot.lane.b32.xlu0 %v1962_v0, %s7747_s28  ;;  %v209_v0 = vpack.c.bf16 %v7756_v48, %v206_v45  ;;  %v3009_v10 = vrot.slane %v3002_v61, %v7812_v21 }
  0xd7   : > { %v1816_v48 = vshrl.u32 %v7150_v42, 16  ;;  %v1794_v42 = vld [vmem:[#allocation2 + $0x2] sm:$0xff] }
  0xd8   : > { %v219_v11 = vrot.slane %v209_v0, %v218_v53  ;;  %v226_v12 = vrot.slane %v209_v0, %v225_v59 }
  0xd9   : > { %1776 = vrot.lane.b32.xlu1 %v1761_v3, %s7748_s13  ;;  %v2871_v3 = vcombine.high %v8213_v30, %v8213_v30  ;;  %v1817_v59 = vpack.i.b16 %v1816_v48, %v1816_v48  ;;  %v2071_v48 = vcombine.low %v8316_v19, %v8316_v19 }
  0xda   : > { %1311 = vrot.lane.b32.xlu0 %v1296_v7, %s7745_s11  ;;  %v3231_v7 = vcombine.low %v3213_v22, %v3213_v22  ;;  %v237_v30 = vrot.slane %v219_v11, 6  ;;  %v1808_v22 = vshrl.u32 %v7149_v40, 16  ;;  %v2453_v11 = vld [vmem:[#allocation2 + $0xa] sm:$0x3]  ;;  %v8417_v40 = vpop.permute.xlu0 %1510 }
  0xdb   : > { %v2885_v32 = vrot.slane %v2871_v3, %v7812_v21  ;;  %v2526_v61 = vmul.bf16 %v2521_v16, %v2453_v11 }
  0xdc   : > { %v3238_v28 = vrot.slane %v3231_v7, %v7812_v21  ;;  %v238_v31 = vrot.slane %v237_v30, 4  ;;  %247 = vst [vmem:[#allocation3 + $0xd0] sm:$0xcc] %v237_v30  ;;  %248 = vst [vmem:[#allocation3 + $0xd8] sm:$0xcc] %v237_v30 }
  0xdd   : > { %2783 = vrot.lane.b32.xlu1 %v2772_v4, %s7742_s20  ;;  %v2224_v4 = vld [vmem:[#allocation2 + $0xa] sm:$0x3]  ;;  %v2544_v16 = vcombine.low %v2526_v61, %v2526_v61 }
  0xde   : > { %3241 = vrot.lane.b32.xlu0 %v3230_v20, %s7746_s25  ;;  %v7757_v20 = vmov 0.0|0.0  }
  0xdf   : > { %v233_v23 = vrot.slane %v7757_v20, %v218_v53  ;;  %v1809_v53 = vpack.i.b16 %v1808_v22, %v1808_v22  ;;  %v2413_v20 = vcombine.high %v8246_v46, %v8246_v46  ;;  %v3223_v22 = vrot.slane %v3216_v63, %v7812_v21 }
  0xe1   : > { %3012 = vrot.lane.b32.xlu1 %v3001_v25, %s7740_s29  ;;  %v1796_v25 = vld [vmem:[%s10016_s3 + $0x18] sm:$0x44]  ;;  %v2427_v46 = vrot.slane %v2413_v20, %v7812_v21  ;;  %v1217_v20 = vld [vmem:[#allocation2 + $0x8] sm:$0x3] }
  0xe2   : > { %2096 = vrot.lane.b32.xlu0 %v2085_v27, %s7752_s22  ;;  %v2297_v27 = vmul.bf16 %v2292_v6, %v2224_v4  ;;  %v7151_v43 = vcombine.low %v1796_v25, %v1796_v25  ;;  %v2184_v6 = vcombine.high %v8231_v39, %v8231_v39  ;;  %v7152_v39 = vcombine.high %v1796_v25, %v1796_v25 }
  0xe4   : > { %v1824_v45 = vshrl.u32 %v7151_v43, 16  ;;  %v2315_v52 = vcombine.low %v2297_v27, %v2297_v27  ;;  %v2198_v3 = vrot.slane %v2184_v6, %v7812_v21  ;;  %v1832_v51 = vshrl.u32 %v7152_v39, 16 }
  0xe5   : > { %2325 = vrot.lane.b32.xlu1 %v2314_v34, %s7750_s18  ;;  %v239_v34 = vrot.slane %v226_v12, 6  ;;  %v1969_v12 = vrot.slane %v1955_v60, %v7812_v21  ;;  %v2551_v43 = vrot.slane %v2544_v16, %v7812_v21  ;;  %v2078_v60 = vrot.slane %v2071_v48, %v7812_v21 }
  0xe6   : > { %2666 = vrot.lane.b32.xlu0 %v2656_v36, %s7737_s12  ;;  %v242_v36 = vrot.slane %v233_v23, 6  ;;  %v1825_v7 = vpack.i.b16 %v1824_v45, %v1824_v45  ;;  %v2322_v56 = vrot.slane %v2315_v52, %v7812_v21  ;;  %v1833_v30 = vpack.i.b16 %v1832_v51, %v1832_v51  ;;  %v8459_v51 = vpop.permute.xlu0 %820 }
  0xe7   : > { %v240_v41 = vsel %vm8372_vm11, %v238_v31, %v239_v34  ;;  %v241_v47 = vrot.slane %v239_v34, 4 }
  0xe8   : > { %250 = vst [vmem:[#allocation3 + $0xe8] sm:$0xff] %v240_v41  ;;  %249 = vst [vmem:[#allocation3 + $0xe0] sm:$0xff] %v240_v41  ;;  %v1830_v23 = vrot.slane %v1825_v7, %v7834_v55  ;;  %v1838_v26 = vrot.slane %v1833_v30, %v7834_v55 }
  0xe9   : > { %2554 = vrot.lane.b32.xlu1 %v2543_v54, %s7738_s19  ;;  %v243_v54 = vsel %vm8372_vm11, %v241_v47, %v242_v36  ;;  %vm1398_vm11 = vcmask 973824   ;;  %v1303_v36 = vrot.slane %v1289_v13, %v7812_v21  ;;  %v1512_v47 = vrot.slane %v8417_v40, 6 }
  0xea   : > { %2785 = vrot.lane.b32.xlu0 %v2780_v58, %s7742_s20  ;;  %v2068_v58 = vmul.bf16 %v2063_v2, %v1995_v37  ;;  %252 = vst [vmem:[#allocation3 + $0xf8] sm:$0xff] %v243_v54  ;;  %v7238_v0 = vcombine.high %v240_v41, %v243_v54  ;;  %251 = vst [vmem:[#allocation3 + $0xf0] sm:$0xff] %v243_v54  ;;  %v7237_v1 = vcombine.low %v240_v41, %v243_v54  ;;  %v1329_v41 = vld [vmem:[#allocation2 + $0x8] sm:$0x3]  ;;  %v8491_v38 = vpop.permute.xlu0 %1050 }
  0xeb   : > { %v1814_v2 = vrot.slane %v1809_v53, %v7834_v55  ;;  %v1754_v37 = vcombine.high %v8269_v57, %v8269_v57  ;;  %v1514_v19 = vsel %vm10025_vm15, %v1512_v47, %v8417_v40 }
  0xec   : > { %3602 = vmatprep.subr.bf16.mxu1 %v7238_v0  ;;  %v2086_v4 = vcombine.low %v2068_v58, %v2068_v58  ;;  %3561 = vmatprep.subr.bf16.mxu0 %v7238_v0 }
  0xed   : > { %3124 = vrot.lane.b32.xlu1 %v3114_v15, %s7739_s24  ;;  %v1396_v15 = vpop.permute.xlu1 %1395  ;;  %3603 = vmatpush1.bf16.msra.mxu1 %v7237_v1  ;;  %v1768_v57 = vrot.slane %v1754_v37, %v7812_v21 }
  0xee   : > { %2895 = vrot.lane.b32.xlu0 %v2885_v32, %s7741_s9  ;;  %v1822_v32 = vrot.slane %v1817_v59, %v7834_v55  ;;  %3562 = vmatpush1.bf16.msra.mxu0 %v7237_v1  ;;  %v1397_v25 = vrot.slane %v1396_v15, 6  ;;  %v2093_v27 = vrot.slane %v2086_v4, %v7812_v21  ;;  %v2987_v1 = vcombine.low %v8306_v14, %v8306_v14 }
  0xf0   : > { %v1843_v8 = vcombine.low %v1814_v2, %v1822_v32  ;;  %v1399_v31 = vsel %vm1398_vm11, %v1397_v25, %v1396_v15  ;;  %v1403_v54 = vmul.bf16 %v1397_v25, %v1329_v41  ;;  %v2994_v11 = vrot.slane %v2987_v1, %v7812_v21  ;;  %v1562_v15 = vld [vmem:[#allocation2 + $0x8] sm:$0x3] }
  0xf1   : > { %3243 = vrot.lane.b32.xlu1 %v3238_v28, %s7746_s25  ;;  %v1844_v28 = vcombine.low %v1830_v23, %v1838_v26  ;;  %v8424_v6 = vmul.bf16 %v8251_v49, %v1399_v31  ;;  %v1629_v45 = vpop.permute.xlu1 %1628  ;;  %v822_v32 = vrot.slane %v8459_v51, 6  ;;  %v1100_v1 = vld [vmem:[#allocation2 + $0x8] sm:$0x3] }
  0xf2   : > { %3014 = vrot.lane.b32.xlu0 %v3009_v10, %s7740_s29  ;;  %v1851_v29 = vrot.slane %v1843_v8, %v7812_v21  ;;  %v1630_v58 = vrot.slane %v1629_v45, 6  ;;  %v1421_v59 = vcombine.low %v1403_v54, %v1403_v54 }
  0xf3   : > { %v1858_v34 = vrot.slane %v1844_v28, %v7812_v21  ;;  %v1406_v39 = vcombine.low %v8424_v6, %v8424_v6  ;;  %v824_v25 = vsel %vm823_vm1, %v822_v32, %v8459_v51  ;;  %v1420_v37 = vrot.slane %v8424_v6, %v7812_v21 }
  0xf4   : > { %v1632_v7 = vsel %vm10024_vm14, %v1630_v58, %v1629_v45  ;;  %v1428_v2 = vrot.slane %v1421_v59, %v7812_v21  ;;  %v1636_v23 = vmul.bf16 %v1630_v58, %v1562_v15  ;;  %v758_v59 = vld [vmem:[#allocation2 + $0x8] sm:$0x3] }
  0xf5   : > { %3353 = vrot.lane.b32.xlu1 %v3343_v50, %s7745_s11  ;;  %v1859_v10 = vcombine.low %v1851_v29, %v1858_v34  ;;  %v2758_v50 = vcombine.low %v8287_v62, %v8287_v62  ;;  %v938_v62 = vpop.permute.xlu1 %937  ;;  %v1413_v53 = vrot.slane %v1406_v39, %v7812_v21  ;;  %v8456_v14 = vmul.bf16 %v8251_v49, %v1632_v7 }
  0xf6   : > { %2208 = vrot.lane.b32.xlu0 %v2198_v3, %s7751_s5  ;;  %v1517_v3 = vmul.bf16 %v8251_v49, %v1514_v19  ;;  %v939_v26 = vrot.slane %v938_v62, 6  ;;  %v1654_v28 = vcombine.low %v1636_v23, %v1636_v23 }
  0xf7   : > { %v1861_v5 = vmul.bf16 %v1859_v10, %v1794_v42  ;;  %v2765_v0 = vrot.slane %v2758_v50, %v7812_v21  ;;  %v1639_v8 = vcombine.low %v8456_v14, %v8456_v14  ;;  %v871_v42 = vld [vmem:[#allocation2 + $0x8] sm:$0x3] }
  0xf8   : > { %v940_v29 = vsel %vm749_vm10, %v939_v26, %v938_v62  ;;  %v1448_v10 = vld [vmem:[#allocation2 + $0x8] sm:$0x3]  ;;  %v944_v41 = vmul.bf16 %v939_v26, %v871_v42  ;;  %v1528_v50 = vrot.slane %v1517_v3, %v7812_v21 }
  0xf9   : > { %1979 = vrot.lane.b32.xlu1 %v1969_v12, %s7747_s28  ;;  %7154 = vst.sshfl [vmem:[#allocation3 + $0x68] sm:$0xf0 pattern:$0x76325410] %v1861_v5  ;;  %v1863_v52 = vcombine.low %v1861_v5, %v1861_v5  ;;  %v1521_v12 = vcombine.high %v1517_v3, %v1517_v3  ;;  %v8461_v4 = vpop.permute.xlu1 %1166  ;;  %v1646_v16 = vrot.slane %v1639_v8, %v7812_v21 }
  0xfa   : > { %2327 = vrot.lane.b32.xlu0 %v2322_v56, %s7750_s18  ;;  %v2300_v56 = vcombine.low %v8323_v24, %v8323_v24  ;;  %v2529_v24 = vcombine.low %v8338_v33, %v8338_v33  ;;  %v1286_v33 = vmul.bf16 %v1281_v44, %v1217_v20  ;;  %v8489_v34 = vmul.bf16 %v8251_v49, %v940_v29 }
  0xfb   : > { %7153 = vst.sshfl [vmem:[#allocation3 + $0x60] sm:$0xf0 pattern:$0x76325410] %v1863_v52  ;;  %v1535_v30 = vrot.slane %v1521_v12, %v7812_v21  ;;  %v1661_v44 = vrot.slane %v1654_v28, %v7812_v21  ;;  %v1518_v6 = vmul.bf16 %v1512_v47, %v1448_v10  ;;  %v962_v39 = vcombine.low %v944_v41, %v944_v41 }
  0xfc   : > { %v2307_v61 = vrot.slane %v2300_v56, %v7812_v21  ;;  %v2536_v13 = vrot.slane %v2529_v24, %v7812_v21  ;;  %v1310_v31 = vrot.slane %v1286_v33, %v7812_v21  ;;  %v828_v12 = vmul.bf16 %v822_v32, %v758_v59  ;;  %v406_v33 = vld [vmem:[#allocation2 + $0x8] sm:$0x3] }
  0xfd   : > { %2098 = vrot.lane.b32.xlu1 %v2093_v27, %s7752_s22  ;;  %v8477_v27 = vpop.permute.xlu1 %472  ;;  %v1542_v58 = vrot.slane %v1518_v6, %v7812_v21  ;;  %v969_v40 = vrot.slane %v962_v39, %v7812_v21  ;;  %v639_v39 = vld [vmem:[#allocation2 + $0x8] sm:$0x3] }
  0xfe   : > { %2437 = vrot.lane.b32.xlu0 %v2427_v46, %s7736_s7  ;;  %v827_v46 = vmul.bf16 %v8251_v49, %v824_v25  ;;  %v852_v23 = vrot.slane %v828_v12, %v7812_v21 }
 0x100   : > { %v838_v15 = vrot.slane %v827_v46, %v7812_v21 }
 0x101   : > { %1313 = vrot.lane.b32.xlu1 %v1303_v36, %s7745_s11  ;;  %v831_v36 = vcombine.high %v827_v46, %v827_v46 }
 0x102   : > { %2556 = vrot.lane.b32.xlu0 %v2551_v43, %s7738_s19  ;;  %v1052_v43 = vrot.slane %v8491_v38, 6 }
 0x103   : > { %v845_v5 = vrot.slane %v831_v36, %v7812_v21 }
 0x104   : > { %v8495_v63 = vpop.permute.xlu1 %705  ;;  %v1053_v48 = vsel %vm630_vm2, %v1052_v43, %v8491_v38 }
 0x105   : > { %3239 = vrot.lane.b32.xlu1 %v3223_v22, %s7746_s25  ;;  %v947_v22 = vcombine.low %v8489_v34, %v8489_v34  ;;  %v1056_v52 = vmul.bf16 %v8251_v49, %v1053_v48 }
 0x106   : > { %1778 = vrot.lane.b32.xlu0 %v1768_v57, %s7748_s13  ;;  %v1168_v57 = vrot.slane %v8461_v4, 6 }
 0x107   : > { %v954_v54 = vrot.slane %v947_v22, %v7812_v21  ;;  %v1067_v10 = vrot.slane %v1056_v52, %v7812_v21 }
 0x108   : > { %v1169_v19 = vsel %vm516_vm9, %v1168_v57, %v8461_v4  ;;  %v474_v4 = vrot.slane %v8477_v27, 6 }
 0x109   : > { %2094 = vrot.lane.b32.xlu1 %v2078_v60, %s7752_s22  ;;  %v1060_v60 = vcombine.high %v1056_v52, %v1056_v52  ;;  %v8529_v62 = vmul.bf16 %v8251_v49, %v1169_v19 }
 0x10a   : > { %2781 = vrot.lane.b32.xlu0 %v2765_v0, %s7742_s20  ;;  %v8531_v0 = vpop.permute.xlu0 %353  ;;  %v476_v20 = vsel %vm475_vm13, %v474_v4, %v8477_v27  ;;  %v961_v27 = vrot.slane %v8489_v34, %v7812_v21  ;;  %v480_v28 = vmul.bf16 %v474_v4, %v406_v33 }
 0x10b   : > { %v355_v3 = vrot.slane %v8531_v0, 6  ;;  %v1074_v7 = vrot.slane %v1060_v60, %v7812_v21  ;;  %v479_v8 = vmul.bf16 %v8251_v49, %v476_v20 }
 0x10d   : > { %1429 = vrot.lane.b32.xlu1 %v1413_v53, %s7744_s30  ;;  %v1653_v53 = vrot.slane %v8456_v14, %v7812_v21  ;;  %v357_v14 = vsel %vm356_vm5, %v355_v3, %v8531_v0 }
 0x10e   : > { %3010 = vrot.lane.b32.xlu0 %v2994_v11, %s7740_s29  ;;  %v1173_v11 = vmul.bf16 %v1168_v57, %v1100_v1  ;;  %v360_v24 = vmul.bf16 %v8251_v49, %v357_v14 }
 0x110   : > { %v1191_v32 = vcombine.low %v1173_v11, %v1173_v11  ;;  %v364_v26 = vcombine.high %v360_v24, %v360_v24 }
 0x111   : > { %1433 = vrot.lane.b32.xlu1 %v1428_v2, %s7744_s30  ;;  %v1176_v2 = vcombine.low %v8529_v62, %v8529_v62 }
 0x112   : > { %2323 = vrot.lane.b32.xlu0 %v2307_v61, %s7750_s18  ;;  %v8510_v45 = vpop.permute.xlu1 %2668  ;;  %v8552_v61 = vpop.permute.xlu0 %587  ;;  %v1198_v25 = vrot.slane %v1191_v32, %v7812_v21 }
 0x113   : > { %v1183_v51 = vrot.slane %v1176_v2, %v7812_v21 }
 0x115   : > { %1545 = vrot.lane.b32.xlu1 %v1535_v30, %s7743_s23 }
 0x116   : > { %2552 = vrot.lane.b32.xlu0 %v2536_v13, %s7738_s19  ;;  %v589_v13 = vrot.slane %v8552_v61, 6  ;;  %v8567_v46 = vpop.permute.xlu0 %3126 }
 0x117   : > { %v3130_v33 = vrot.slane %v8567_v46, 4 }
 0x118   : > { %v591_v42 = vsel %vm590_vm0, %v589_v13, %v8552_v61  ;;  %v525_v61 = vld [vmem:[#allocation2 + $0x8] sm:$0x3] }
 0x119   : > { %1662 = vrot.lane.b32.xlu1 %v1646_v16, %s7749_s10  ;;  %v988_v16 = vld [vmem:[#allocation2 + $0x8] sm:$0x3]  ;;  %v594_v41 = vmul.bf16 %v8251_v49, %v591_v42 }
 0x11a   : > { %1315 = vrot.lane.b32.xlu0 %v1310_v31, %s7745_s11  ;;  %v378_v31 = vrot.slane %v364_v26, %v7812_v21  ;;  %v1057_v36 = vmul.bf16 %v1052_v43, %v988_v16  ;;  %v8581_v34 = vpop.permute.xlu0 %3355  ;;  %v498_v43 = vcombine.low %v480_v28, %v480_v28 }
 0x11b   : > { %v8525_v47 = vpop.permute.xlu1 %2897  ;;  %v598_v57 = vcombine.high %v594_v41, %v594_v41  ;;  %v605_v32 = vrot.slane %v594_v41, %v7812_v21 }
 0x11c   : > { %v1081_v6 = vrot.slane %v1057_v36, %v7812_v21  ;;  %v2901_v16 = vrot.slane %v8525_v47, 4 }
 0x11d   : > { %1666 = vrot.lane.b32.xlu1 %v1661_v44, %s7749_s10  ;;  %v483_v44 = vcombine.low %v479_v8, %v479_v8 }
 0x11e   : > { %1431 = vrot.lane.b32.xlu0 %v1420_v37, %s7744_s30  ;;  %v707_v37 = vrot.slane %v8495_v63, 6 }
 0x11f   : > { %v490_v38 = vrot.slane %v483_v44, %v7812_v21 }
 0x120   : > { %v709_v22 = vsel %vm708_vm8, %v707_v37, %v8495_v63  ;;  %v1190_v63 = vrot.slane %v8529_v62, %v7812_v21 }
 0x121   : > { %855 = vrot.lane.b32.xlu1 %v845_v5, %s7741_s9 }
 0x122   : > { %1543 = vrot.lane.b32.xlu0 %v1528_v50, %s7743_s23  ;;  %v712_v50 = vmul.bf16 %v8251_v49, %v709_v22  ;;  %v612_v49 = vrot.slane %v598_v57, %v7812_v21 }
 0x124   : > { %v8539_v56 = vpop.permute.xlu1 %2210  ;;  %v716_v60 = vcombine.low %v712_v50, %v712_v50  ;;  %v730_v26 = vrot.slane %v712_v50, %v7812_v21 }
 0x125   : > { %970 = vrot.lane.b32.xlu1 %v954_v54, %s7740_s29  ;;  %v505_v54 = vrot.slane %v498_v43, %v7812_v21  ;;  %v2214_v28 = vrot.slane %v8539_v56, 4 }
 0x126   : > { %1547 = vrot.lane.b32.xlu0 %v1542_v58, %s7743_s23  ;;  %v291_v58 = vld [vmem:[#allocation2 + $0x8] sm:$0x3]  ;;  %v723_v2 = vrot.slane %v716_v60, %v7812_v21 }
 0x129   : > { %974 = vrot.lane.b32.xlu1 %v969_v40, %s7740_s29  ;;  %v713_v40 = vmul.bf16 %v707_v37, %v639_v39 }
 0x12a   : > { %1664 = vrot.lane.b32.xlu0 %v1653_v53, %s7749_s10  ;;  %v361_v53 = vmul.bf16 %v355_v3, %v291_v58 }
 0x12b   : > { %v731_v62 = vcombine.low %v713_v40, %v713_v40 }
 0x12c   : > { %v385_v14 = vrot.slane %v361_v53, %v7812_v21 }
 0x12d   : > { %1084 = vrot.lane.b32.xlu1 %v1074_v7, %s7739_s24  ;;  %v8561_v30 = vpop.permute.xlu1 %2439  ;;  %v371_v7 = vrot.slane %v360_v24, %v7812_v21  ;;  %v738_v3 = vrot.slane %v731_v62, %v7812_v21 }
 0x12e   : > { %853 = vrot.lane.b32.xlu0 %v838_v15, %s7741_s9  ;;  %v497_v15 = vrot.slane %v479_v8, %v7812_v21  ;;  %v2443_v36 = vrot.slane %v8561_v30, 4 }
 0x131   : > { %1199 = vrot.lane.b32.xlu1 %v1183_v51, %s7746_s25  ;;  %v595_v51 = vmul.bf16 %v589_v13, %v525_v61  ;;  %v2672_v13 = vrot.slane %v8510_v45, 4  ;;  %v6396_v61 = vld [vmem:[%s10016_s3 + $0x38] sm:$0x11] }
 0x132   : > { %857 = vrot.lane.b32.xlu0 %v852_v23, %s7741_s9 }
 0x133   : > { %v619_v8 = vrot.slane %v595_v51, %v7812_v21  ;;  %v6507_v51 = vld [vmem:[%s10016_s3 + $0x30] sm:$0x11] }
 0x135   : > { %1203 = vrot.lane.b32.xlu1 %v1198_v25, %s7746_s25 }
 0x136   : > { %972 = vrot.lane.b32.xlu0 %v961_v27, %s7740_s29 }
 0x137   : > { %v8573_v29 = vpop.permute.xlu1 %1780 }
 0x138   : > { %v1784_v42 = vrot.slane %v8573_v29, 4 }
 0x139   : > { %388 = vrot.lane.b32.xlu1 %v378_v31, %s7736_s7  ;;  %v3359_v31 = vrot.slane %v8581_v34, 4 }
 0x13a   : > { %1082 = vrot.lane.b32.xlu0 %v1067_v10, %s7739_s24 }
 0x13b   : > { %v8587_v5 = vpop.permute.xlu1 %2664 }
 0x13c   : > { %v8592_v48 = vpop.permute.xlu0 %1981  ;;  %v2670_v37 = vrot.slane %v8587_v5, 4 }
 0x13d   : > { %506 = vrot.lane.b32.xlu1 %v490_v38, %s7738_s19  ;;  %v1985_v46 = vrot.slane %v8592_v48, 4 }
 0x13e   : > { %1086 = vrot.lane.b32.xlu0 %v1081_v6, %s7739_s24 }
 0x13f   : > { %v8598_v52 = vpop.permute.xlu1 %2893 }
 0x140   : > { %v8601_v19 = vpop.permute.xlu0 %3122  ;;  %v2899_v45 = vrot.slane %v8598_v52, 4 }
 0x141   : > { %510 = vrot.lane.b32.xlu1 %v505_v54, %s7738_s19  ;;  %v3128_v41 = vrot.slane %v8601_v19, 4 }
 0x142   : > { %1201 = vrot.lane.b32.xlu0 %v1190_v63, %s7746_s25 }
 0x143   : > { %v8607_v1 = vpop.permute.xlu1 %2206 }
 0x144   : > { %v8612_v59 = vpop.permute.xlu0 %3351  ;;  %v2212_v47 = vrot.slane %v8607_v1, 4 }
 0x145   : > { %622 = vrot.lane.b32.xlu1 %v612_v49, %s7737_s12  ;;  %v3357_v38 = vrot.slane %v8612_v59, 4 }
 0x146   : > { %386 = vrot.lane.b32.xlu0 %v371_v7, %s7736_s7 }
 0x147   : > { %v8617_v11 = vpop.permute.xlu1 %2435 }
 0x148   : > { %v8620_v12 = vpop.permute.xlu0 %1977  ;;  %v2441_v43 = vrot.slane %v8617_v11, 4 }
 0x149   : > { %739 = vrot.lane.b32.xlu1 %v723_v2, %s7742_s20  ;;  %v1983_v50 = vrot.slane %v8620_v12, 4 }
 0x14a   : > { %390 = vrot.lane.b32.xlu0 %v385_v14, %s7736_s7 }
 0x14b   : > { %v8625_v0 = vpop.permute.xlu1 %1776 }
 0x14c   : > { %v8628_v4 = vpop.permute.xlu0 %1311  ;;  %v1782_v54 = vrot.slane %v8625_v0, 4 }
 0x14d   : > { %743 = vrot.lane.b32.xlu1 %v738_v3, %s7742_s20  ;;  %v1317_v40 = vrot.slane %v8628_v4, 4 }
 0x14e   : > { %508 = vrot.lane.b32.xlu0 %v497_v15, %s7738_s19  ;;  %v6395_v15 = vld [vmem:[%s10016_s3 + $0x30] sm:$0x11] }
 0x14f   : > { %v8633_v24 = vpop.permute.xlu1 %2783 }
 0x150   : > { %v8636_v20 = vpop.permute.xlu0 %3241  ;;  %v10023_v60 = vrot.slane %v8633_v24, 4 }
 0x151   : > { %v3246_v49 = vrot.slane %v8636_v20, 4 }
 0x152   : > { %620 = vrot.lane.b32.xlu0 %v605_v32, %s7737_s12 }
 0x153   : > { %v8639_v23 = vpop.permute.xlu1 %3012 }
 0x154   : > { %v8641_v25 = vpop.permute.xlu0 %2096  ;;  %v3017_v7 = vrot.slane %v8639_v23, 4 }
 0x155   : > { %v2101_v62 = vrot.slane %v8641_v25, 4 }
 0x156   : > { %624 = vrot.lane.b32.xlu0 %v619_v8, %s7737_s12 }
 0x157   : > { %v8647_v27 = vpop.permute.xlu1 %2325 }
 0x158   : > { %v2667_v44 = vpop.permute.xlu0 %2666  ;;  %v2330_v2 = vrot.slane %v8647_v27, 4 }
 0x159   : > { %v2671_v10 = vrot.slane %v2667_v44, 4 }
 0x15a   : > { %741 = vrot.lane.b32.xlu0 %v730_v26, %s7742_s20 }
 0x15b   : > { %v2673_v22 = vsel %vm395_vm3, %v2670_v37, %v2671_v10  ;;  %v2675_v6 = vsel %vm395_vm3, %v2671_v10, %v2672_v13  ;;  %v8665_v57 = vpop.permute.xlu1 %2554  ;;  %v7339_v13 = vcombine.low %v6395_v15, %v6395_v15  ;;  %v7341_v10 = vcombine.low %v6396_v61, %v6396_v61 }
 0x15c   : > { %v2674_v39 = vsel %vm630_vm2, %v8587_v5, %v2673_v22  ;;  %v2676_v63 = vsel %vm630_vm2, %v2667_v44, %v2675_v6  ;;  %v2786_v58 = vpop.permute.xlu0 %2785  ;;  %v2559_v5 = vrot.slane %v8665_v57, 4  ;;  %v7340_v44 = vcombine.high %v6395_v15, %v6395_v15 }
 0x15d   : > { %2679 = vst [vmem:[#allocation3 + $0xa0] sm:$0x33] %v2674_v39  ;;  %2680 = vst [vmem:[#allocation3 + $0xa8] sm:$0x33] %v2676_v63  ;;  %v2789_v53 = vrot.slane %v2786_v58, 4  ;;  %v7342_v22 = vcombine.high %v6396_v61, %v6396_v61  ;;  %v7343_v6 = vcombine.low %v6507_v51, %v6507_v51  ;;  %v6408_v58 = vpack.i.b16 %v7339_v13, %v7339_v13 }
 0x15e   : > { %v6508_v61 = vld [vmem:[%s10016_s3 + $0x38] sm:$0x11]  ;;  %v6422_v13 = vpack.i.b16 %v7341_v10, %v7341_v10 }
 0x15f   : > { %v2792_v14 = vsel %vm395_vm3, %v10023_v60, %v2789_v53  ;;  %v3125_v3 = vpop.permute.xlu1 %3124  ;;  %v6415_v53 = vpack.i.b16 %v7340_v44, %v7340_v44  ;;  %v6429_v44 = vpack.i.b16 %v7342_v22, %v7342_v22 }
 0x160   : > { %v2793_v32 = vsel %vm749_vm10, %v8633_v24, %v2792_v14  ;;  %v3129_v8 = vrot.slane %v3125_v3, 4  ;;  %v2896_v26 = vpop.permute.xlu0 %2895 }
 0x161   : > { %2797 = vst [vmem:[#allocation3 + $0xa8] sm:$0xcc] %v2793_v32  ;;  %v2900_v37 = vrot.slane %v2896_v26, 4  ;;  %v6434_v10 = vrot.slane %v6429_v44, %v7806_v17 }
 0x162   : > { %v3131_v39 = vsel %vm395_vm3, %v3128_v41, %v3129_v8  ;;  %v3133_v63 = vsel %vm395_vm3, %v3129_v8, %v3130_v33 }
 0x163   : > { %v3132_v9 = vsel %vm590_vm0, %v8601_v19, %v3131_v39  ;;  %v3134_v14 = vsel %vm590_vm0, %v3125_v3, %v3133_v63  ;;  %v2902_v60 = vsel %vm395_vm3, %v2899_v45, %v2900_v37  ;;  %v2904_v15 = vsel %vm395_vm3, %v2900_v37, %v2901_v16  ;;  %v3244_v32 = vpop.permute.xlu1 %3243 }
 0x164   : > { %3137 = vst [vmem:[#allocation3 + $0xc0] sm:$0x33] %v3132_v9  ;;  %3138 = vst [vmem:[#allocation3 + $0xc8] sm:$0x33] %v3134_v14  ;;  %v2903_v33 = vsel %vm823_vm1, %v8598_v52, %v2902_v60  ;;  %v2905_v41 = vsel %vm823_vm1, %v2896_v26, %v2904_v15  ;;  %v3247_v8 = vrot.slane %v3244_v32, 4  ;;  %v3015_v19 = vpop.permute.xlu0 %3014  ;;  %v6413_v3 = vrot.slane %v6408_v58, %v7806_v17 }
 0x165   : > { %2908 = vst [vmem:[#allocation3 + $0xb0] sm:$0x33] %v2903_v33  ;;  %2909 = vst [vmem:[#allocation3 + $0xb8] sm:$0x33] %v2905_v41  ;;  %v3018_v45 = vrot.slane %v3015_v19, 4  ;;  %v6420_v16 = vrot.slane %v6415_v53, %v7806_v17  ;;  %v7344_v37 = vcombine.high %v6507_v51, %v6507_v51  ;;  %v7345_v39 = vcombine.low %v6508_v61, %v6508_v61 }
 0x166   : > { %v3250_v9 = vsel %vm395_vm3, %v3246_v49, %v3247_v8  ;;  %v7346_v52 = vcombine.high %v6508_v61, %v6508_v61  ;;  %v6427_v58 = vrot.slane %v6422_v13, %v7806_v17  ;;  %v6520_v15 = vshrl.u32 %v7343_v6, 16 }
 0x167   : > { %v3251_v60 = vsel %vm475_vm13, %v8636_v20, %v3250_v9  ;;  %v3021_v26 = vsel %vm395_vm3, %v3017_v7, %v3018_v45  ;;  %v3354_v63 = vpop.permute.xlu1 %3353  ;;  %v6439_v14 = vcombine.low %v6413_v3, %v6420_v16  ;;  %v6528_v33 = vshrl.u32 %v7344_v37, 16  ;;  %v6049_v20 = vld [vmem:[%s10016_s3 + $0x20] sm:$0x44] }
 0x168   : > { %3255 = vst [vmem:[#allocation3 + $0xc8] sm:$0xcc] %v3251_v60  ;;  %v3022_v22 = vsel %vm708_vm8, %v8639_v23, %v3021_v26  ;;  %v3358_v53 = vrot.slane %v3354_v63, 4  ;;  %v2209_v51 = vpop.permute.xlu0 %2208  ;;  %v6440_v61 = vcombine.low %v6427_v58, %v6434_v10  ;;  %v6536_v41 = vshrl.u32 %v7345_v39, 16  ;;  %v6624_v58 = vld [vmem:[%s10016_s3 + $0x30] sm:$0x22] }
 0x169   : > { %3026 = vst [vmem:[#allocation3 + $0xb8] sm:$0xcc] %v3022_v22  ;;  %v2213_v32 = vrot.slane %v2209_v51, 4  ;;  %v6447_v45 = vrot.slane %v6439_v14, %v7812_v21  ;;  %v6521_v13 = vpack.i.b16 %v6520_v15, %v6520_v15  ;;  %v6529_v56 = vpack.i.b16 %v6528_v33, %v6528_v33 }
 0x16a   : > { %v3360_v8 = vsel %vm395_vm3, %v3357_v38, %v3358_v53  ;;  %v3362_v19 = vsel %vm395_vm3, %v3358_v53, %v3359_v31  ;;  %v6454_v37 = vrot.slane %v6440_v61, %v7812_v21  ;;  %v6537_v60 = vpack.i.b16 %v6536_v41, %v6536_v41 }
 0x16b   : > { %v3361_v3 = vsel %vm356_vm5, %v8612_v59, %v3360_v8  ;;  %v3363_v6 = vsel %vm356_vm5, %v3354_v63, %v3362_v19  ;;  %v2215_v16 = vsel %vm395_vm3, %v2212_v47, %v2213_v32  ;;  %v2217_v38 = vsel %vm395_vm3, %v2213_v32, %v2214_v28  ;;  %v1980_v44 = vpop.permute.xlu1 %1979 }
 0x16c   : > { %3366 = vst [vmem:[#allocation3 + $0xd0] sm:$0x33] %v3361_v3  ;;  %3367 = vst [vmem:[#allocation3 + $0xd8] sm:$0x33] %v3363_v6  ;;  %v2216_v34 = vsel %vm10025_vm15, %v8607_v1, %v2215_v16  ;;  %v2218_v31 = vsel %vm10025_vm15, %v2209_v51, %v2217_v38  ;;  %v1984_v9 = vrot.slane %v1980_v44, 4  ;;  %v2328_v59 = vpop.permute.xlu0 %2327  ;;  %v6526_v47 = vrot.slane %v6521_v13, %v7806_v17 }
 0x16d   : > { %2221 = vst [vmem:[#allocation3 + $0x80] sm:$0x33] %v2216_v34  ;;  %2222 = vst [vmem:[#allocation3 + $0x88] sm:$0x33] %v2218_v31  ;;  %v2331_v39 = vrot.slane %v2328_v59, 4  ;;  %v6455_v26 = vcombine.low %v6447_v45, %v6454_v37  ;;  %v6544_v63 = vshrl.u32 %v7346_v52, 16  ;;  %v6534_v48 = vrot.slane %v6529_v56, %v7806_v17 }
 0x16e   : > { %v1986_v28 = vsel %vm395_vm3, %v1983_v50, %v1984_v9  ;;  %v1988_v1 = vsel %vm395_vm3, %v1984_v9, %v1985_v46  ;;  %v6625_v46 = vld [vmem:[%s10016_s3 + $0x38] sm:$0x22]  ;;  %v6542_v14 = vrot.slane %v6537_v60, %v7806_v17  ;;  %v7347_v33 = vcombine.low %v6624_v58, %v6624_v58  ;;  %v5937_v3 = vld [vmem:[%s10016_s3 + $0x20] sm:$0x44] }
 0x16f   : > { %v1987_v10 = vsel %vm1746_vm7, %v8620_v12, %v1986_v28  ;;  %v1989_v22 = vsel %vm1746_vm7, %v1980_v44, %v1988_v1  ;;  %v2334_v53 = vsel %vm395_vm3, %v2330_v2, %v2331_v39  ;;  %v2099_v50 = vpop.permute.xlu1 %2098  ;;  %6456 = vrot.lane.b32.xlu0 %v6455_v26, %s7737_s12  ;;  %v6545_v15 = vpack.i.b16 %v6544_v63, %v6544_v63 }
 0x170   : > { %1992 = vst [vmem:[#allocation3 + $0x70] sm:$0x33] %v1987_v10  ;;  %1993 = vst [vmem:[#allocation3 + $0x78] sm:$0x33] %v1989_v22  ;;  %v2335_v52 = vsel %vm1398_vm11, %v8647_v27, %v2334_v53  ;;  %v2102_v51 = vrot.slane %v2099_v50, 4  ;;  %v2438_v12 = vpop.permute.xlu0 %2437  ;;  %v6555_v61 = vcombine.low %v6526_v47, %v6534_v48  ;;  %v7348_v41 = vcombine.high %v6624_v58, %v6624_v58 }
 0x171   : > { %2339 = vst [vmem:[#allocation3 + $0x88] sm:$0xcc] %v2335_v52  ;;  %v2442_v32 = vrot.slane %v2438_v12, 4  ;;  %v6550_v19 = vrot.slane %v6545_v15, %v7806_v17  ;;  %v7349_v45 = vcombine.low %v6625_v46, %v6625_v46  ;;  %v7350_v13 = vcombine.high %v6625_v46, %v6625_v46  ;;  %v6278_v27 = vld [vmem:[%s10016_s3 + $0x20] sm:$0x88] }
 0x172   : > { %v2105_v8 = vsel %vm395_vm3, %v2101_v62, %v2102_v51  ;;  %v6563_v9 = vrot.slane %v6555_v61, %v7812_v21  ;;  %v6637_v56 = vpack.i.b16 %v7347_v33, %v7347_v33  ;;  %v6644_v60 = vpack.i.b16 %v7348_v41, %v7348_v41  ;;  %v7529_v51 = vld [vmem:[#allocation3 + $0xa8] ss:$16 sps:$4 sm:$0xff]  }
 0x173   : > { %v2106_v6 = vsel %vm10024_vm14, %v8641_v25, %v2105_v8  ;;  %v2444_v16 = vsel %vm395_vm3, %v2441_v43, %v2442_v32  ;;  %v2446_v38 = vsel %vm395_vm3, %v2442_v32, %v2443_v36  ;;  %v8779_v44 = vpop.permute.xlu1 %1313  ;;  %v7524_v34 = vld [vmem:[#allocation3 + $0xcc] ss:$16 sps:$4 sm:$0xff]   ;;  %v7526_v31 = vld [vmem:[#allocation3 + $0xc8] ss:$16 sps:$4 sm:$0xff]   ;;  %v6556_v43 = vcombine.low %v6542_v14, %v6550_v19 }
 0x174   : > { %2110 = vst [vmem:[#allocation3 + $0x78] sm:$0xcc] %v2106_v6  ;;  %v2445_v59 = vsel %vm397_vm4, %v8617_v11, %v2444_v16  ;;  %v2447_v37 = vsel %vm397_vm4, %v2438_v12, %v2446_v38  ;;  %v2557_v39 = vpop.permute.xlu0 %2556  ;;  %v1318_v47 = vrot.slane %v8779_v44, 4  ;;  %3604 = vmatprep.subr.bf16.mxu1 %v7524_v34  ;;  %v7527_v36 = vld [vmem:[#allocation3 + $0xac] ss:$16 sps:$4 sm:$0xff]   ;;  %v6651_v28 = vpack.i.b16 %v7349_v45, %v7349_v45 }
 0x175   : > { %2450 = vst [vmem:[#allocation3 + $0x90] sm:$0x33] %v2445_v59  ;;  %2451 = vst [vmem:[#allocation3 + $0x98] sm:$0x33] %v2447_v37  ;;  %v2560_v30 = vrot.slane %v2557_v39, 4  ;;  %3605 = vmatpush1.bf16.msra.mxu1 %v7526_v31  ;;  %v6570_v1 = vrot.slane %v6556_v43, %v7812_v21  ;;  %v6658_v26 = vpack.i.b16 %v7350_v13, %v7350_v13 }
 0x176   : > { %v1320_v11 = vsel %vm395_vm3, %v1317_v40, %v1318_v47  ;;  %v7323_v63 = vcombine.low %v5937_v3, %v5937_v3  ;;  %3606 = vmatprep.subr.bf16.mxu1 %v7527_v36  ;;  %v6642_v53 = vrot.slane %v6637_v56, %v7809_v18  ;;  %v6649_v50 = vrot.slane %v6644_v60, %v7809_v18  ;;  %v5938_v40 = vld [vmem:[%s10016_s3 + $0x28] sm:$0x44] }
 0x177   : > { %v2563_v58 = vsel %vm395_vm3, %v2559_v5, %v2560_v30  ;;  %v1321_v10 = vsel %vm356_vm5, %v8628_v4, %v1320_v11  ;;  %v3240_v22 = vpop.permute.xlu1 %3239  ;;  %v6571_v12 = vcombine.low %v6563_v9, %v6570_v1  ;;  %v6656_v4 = vrot.slane %v6651_v28, %v7809_v18  ;;  %v6050_v39 = vld [vmem:[%s10016_s3 + $0x28] sm:$0x44] }
 0x178   : > { %v2564_v48 = vsel %vm516_vm9, %v8665_v57, %v2563_v58  ;;  %1326 = vst [vmem:[#allocation3 + $0x40] sm:$0x33] %v1321_v10  ;;  %v1779_v46 = vpop.permute.xlu0 %1778  ;;  %v3245_v52 = vrot.slane %v3240_v22, 4  ;;  %v6663_v15 = vrot.slane %v6658_v26, %v7809_v18  ;;  %v6668_v32 = vcombine.low %v6642_v53, %v6649_v50  ;;  %v6166_v50 = vld [vmem:[%s10016_s3 + $0x20] sm:$0x88] }
 0x179   : > { %2568 = vst [vmem:[#allocation3 + $0x98] sm:$0xcc] %v2564_v48  ;;  %v1783_v14 = vrot.slane %v1779_v46, 4  ;;  %v7324_v61 = vcombine.high %v5937_v3, %v5937_v3  ;;  %3607 = vmatpush1.bf16.msra.mxu1 %v7529_v51  ;;  %6572 = vrot.lane.b32.xlu1 %v6571_v12, %s7738_s19  ;;  %v7325_v41 = vcombine.low %v5938_v40, %v5938_v40  ;;  %v10029_v30 = vrot.slane %v8633_v24, 4  ;;  %v6167_v51 = vld [vmem:[%s10016_s3 + $0x28] sm:$0x88] }
 0x17a   : > { %v3248_v33 = vsel %vm395_vm3, %v3245_v52, %v3246_v49  ;;  %v7326_v8 = vcombine.high %v5938_v40, %v5938_v40  ;;  %v6669_v6 = vcombine.low %v6656_v4, %v6663_v15  ;;  %v6676_v29 = vrot.slane %v6668_v32, %v7812_v21  ;;  %v3395_v15 = vld [vmem:[#allocation3 + $0xd0] sm:$0xff] }
 0x17b   : > { %v1785_v19 = vsel %vm395_vm3, %v1782_v54, %v1783_v14  ;;  %v1788_v45 = vsel %vm395_vm3, %v1783_v14, %v1784_v42  ;;  %v3249_v13 = vsel %vm475_vm13, %v3240_v22, %v3248_v33  ;;  %v2095_v3 = vpop.permute.xlu1 %2094  ;;  %v5950_v31 = vpack.i.b16 %v7323_v63, %v7323_v63 }
 0x17c   : > { %v1787_v49 = vsel %vm1786_vm6, %v8625_v0, %v1785_v19  ;;  %v1789_v16 = vsel %vm1786_vm6, %v1779_v46, %v1788_v45  ;;  %3254 = vst [vmem:[#allocation3 + $0xc0] sm:$0xcc] %v3249_v13  ;;  %v2782_v38 = vpop.permute.xlu0 %2781  ;;  %v2100_v54 = vrot.slane %v2095_v3, 4  ;;  %v6683_v34 = vrot.slane %v6669_v6, %v7812_v21 }
 0x17d   : > { %1792 = vst [vmem:[#allocation3 + $0x60] sm:$0x33] %v1787_v49  ;;  %1793 = vst [vmem:[#allocation3 + $0x68] sm:$0x33] %v1789_v16  ;;  %v2787_v42 = vrot.slane %v2782_v38, 4  ;;  %v5957_v9 = vpack.i.b16 %v7324_v61, %v7324_v61  ;;  %v5964_v37 = vpack.i.b16 %v7325_v41, %v7325_v41  ;;  %v5971_v0 = vpack.i.b16 %v7326_v8, %v7326_v8 }
 0x17e   : > { %v2103_v59 = vsel %vm395_vm3, %v2100_v54, %v2101_v62  ;;  %v7327_v43 = vcombine.low %v6049_v20, %v6049_v20  ;;  %v6684_v28 = vcombine.low %v6676_v29, %v6683_v34  ;;  %v5955_v25 = vrot.slane %v5950_v31, %v7834_v55 }
 0x17f   : > { %v2790_v36 = vsel %vm395_vm3, %v2787_v42, %v10029_v30  ;;  %v2104_v56 = vsel %vm10024_vm14, %v2095_v3, %v2103_v59  ;;  %v8835_v60 = vpop.permute.xlu1 %1429  ;;  %v5962_v63 = vrot.slane %v5957_v9, %v7834_v55  ;;  %v5969_v58 = vrot.slane %v5964_v37, %v7834_v55 }
 0x180   : > { %v2791_v62 = vsel %vm749_vm10, %v2782_v38, %v2790_v36  ;;  %2109 = vst [vmem:[#allocation3 + $0x70] sm:$0xcc] %v2104_v56  ;;  %v3011_v11 = vpop.permute.xlu0 %3010  ;;  %v7530_v1 = vld [vmem:[#allocation3 + $0x8c] ss:$16 sps:$4 sm:$0xff]   ;;  %v7532_v26 = vld [vmem:[#allocation3 + $0x88] ss:$16 sps:$4 sm:$0xff]   ;;  %6685 = vrot.lane.b32.xlu0 %v6684_v28, %s7736_s7  ;;  %v5976_v10 = vrot.slane %v5971_v0, %v7834_v55  ;;  %v7328_v22 = vcombine.high %v6049_v20, %v6049_v20 }
 0x181   : > { %2796 = vst [vmem:[#allocation3 + $0xa0] sm:$0xcc] %v2791_v62  ;;  %v3016_v24 = vrot.slane %v3011_v11, 4  ;;  %v7329_v53 = vcombine.low %v6050_v39, %v6050_v39  ;;  %v1435_v40 = vrot.slane %v8835_v60, 4  ;;  %3608 = vmatprep.subr.bf16.mxu1 %v7530_v1  ;;  %v5981_v48 = vcombine.low %v5955_v25, %v5962_v63 }
 0x182   : > { %v7330_v46 = vcombine.high %v6050_v39, %v6050_v39  ;;  %v6062_v52 = vshrl.u32 %v7327_v43, 16  ;;  %3609 = vmatpush1.bf16.msra.mxu1 %v7532_v26  ;;  %v5982_v61 = vcombine.low %v5969_v58, %v5976_v10  ;;  %v6070_v33 = vshrl.u32 %v7328_v22, 16  ;;  %v6279_v22 = vld [vmem:[%s10016_s3 + $0x28] sm:$0x88] }
 0x183   : > { %v3019_v12 = vsel %vm395_vm3, %v3016_v24, %v3017_v7  ;;  %v8853_v4 = vpop.permute.xlu1 %1433  ;;  %v3393_v14 = vld [vmem:[#allocation3 + $0xc0] sm:$0xff]  ;;  %v6078_v41 = vshrl.u32 %v7329_v53, 16  ;;  %v5989_v6 = vrot.slane %v5981_v48, %v7812_v21  ;;  %v7331_v23 = vcombine.low %v6166_v50, %v6166_v50 }
 0x184   : > { %v7533_v32 = vld [vmem:[#allocation3 + $0xc4] ss:$16 sps:$4 sm:$0xff]   ;;  %v3020_v8 = vsel %vm708_vm8, %v3011_v11, %v3019_v12  ;;  %v2324_v19 = vpop.permute.xlu0 %2323  ;;  %v7539_v45 = vld [vmem:[#allocation3 + $0x6c] ss:$16 sps:$4 sm:$0xff]   ;;  %v7545_v13 = vld [vmem:[#allocation3 + $0x68] ss:$16 sps:$4 sm:$0xff]   ;;  %v7231_v3 = vcombine.low %v3393_v14, %v3395_v15  ;;  %v5996_v20 = vrot.slane %v5982_v61, %v7812_v21  ;;  %v6063_v49 = vpack.i.b16 %v6062_v52, %v6062_v52 }
 0x185   : > { %3025 = vst [vmem:[#allocation3 + $0xb0] sm:$0xcc] %v3020_v8  ;;  %v2329_v7 = vrot.slane %v2324_v19, 4  ;;  %3563 = vmatprep.subr.bf16.mxu0 %v7533_v32  ;;  %v6071_v16 = vpack.i.b16 %v6070_v33, %v6070_v33  ;;  %3610 = vmatprep.subr.bf16.mxu1 %v7539_v45  ;;  %v6079_v38 = vpack.i.b16 %v6078_v41, %v6078_v41  ;;  %v6086_v54 = vshrl.u32 %v7330_v46, 16 }
 0x186   : > { %3564 = vmatpush1.bf16.msra.mxu0 %v7231_v3  ;;  %v7332_v29 = vcombine.high %v6166_v50, %v6166_v50  ;;  %v7333_v42 = vcombine.low %v6167_v51, %v6167_v51  ;;  %3611 = vmatpush1.bf16.msra.mxu1 %v7545_v13  ;;  %v5997_v9 = vcombine.low %v5989_v6, %v5996_v20  ;;  %v1437_v39 = vrot.slane %v8853_v4, 4 }
 0x187   : > { %v2332_v34 = vsel %vm395_vm3, %v2329_v7, %v2330_v2  ;;  %v8861_v31 = vpop.permute.xlu1 %1545  ;;  %v6068_v59 = vrot.slane %v6063_v49, %v7834_v55  ;;  %v6076_v37 = vrot.slane %v6071_v16, %v7834_v55  ;;  %v6084_v30 = vrot.slane %v6079_v38, %v7834_v55 }
 0x188   : > { %v2333_v0 = vsel %vm1398_vm11, %v2324_v19, %v2332_v34  ;;  %v2553_v43 = vpop.permute.xlu0 %2552  ;;  %v6087_v36 = vpack.i.b16 %v6086_v54, %v6086_v54  ;;  %5998 = vrot.lane.b32.xlu1 %v5997_v9, %s7739_s24  ;;  %v7334_v28 = vcombine.high %v6167_v51, %v6167_v51  ;;  %v6179_v25 = vpack.i.b16 %v7331_v23, %v7331_v23  ;;  %v5479_v23 = vld [vmem:[%s10016_s3 + $0x20] sm:$0x11] }
 0x189   : > { %2338 = vst [vmem:[#allocation3 + $0x80] sm:$0xcc] %v2333_v0  ;;  %v2558_v2 = vrot.slane %v2553_v43, 4  ;;  %v6097_v56 = vcombine.low %v6068_v59, %v6076_v37  ;;  %v1550_v62 = vrot.slane %v8861_v31, 4  ;;  %v6186_v1 = vpack.i.b16 %v7332_v29, %v7332_v29 }
 0x18a   : > { %v6092_v11 = vrot.slane %v6087_v36, %v7834_v55  ;;  %v6193_v26 = vpack.i.b16 %v7333_v42, %v7333_v42  ;;  %v6184_v24 = vrot.slane %v6179_v25, %v7863_v35  ;;  %v6200_v10 = vpack.i.b16 %v7334_v28, %v7334_v28 }
 0x18b   : > { %v2561_v63 = vsel %vm395_vm3, %v2558_v2, %v2559_v5  ;;  %v8877_v58 = vpop.permute.xlu1 %1662  ;;  %v7335_v53 = vcombine.low %v6278_v27, %v6278_v27  ;;  %v6105_v57 = vrot.slane %v6097_v56, %v7812_v21  ;;  %v6191_v5 = vrot.slane %v6186_v1, %v7863_v35 }
 0x18c   : > { %v2562_v50 = vsel %vm516_vm9, %v2553_v43, %v2561_v63  ;;  %v1316_v48 = vpop.permute.xlu0 %1315  ;;  %v7546_v46 = vld [vmem:[#allocation3 + $0xa4] ss:$16 sps:$4 sm:$0xff]   ;;  %v7548_v52 = vld [vmem:[#allocation3 + $0xa0] ss:$16 sps:$4 sm:$0xff]   ;;  %v6098_v51 = vcombine.low %v6084_v30, %v6092_v11  ;;  %v6198_v14 = vrot.slane %v6193_v26, %v7863_v35  ;;  %v6205_v15 = vrot.slane %v6200_v10, %v7863_v35 }
 0x18d   : > { %2567 = vst [vmem:[#allocation3 + $0x90] sm:$0xcc] %v2562_v50  ;;  %v1319_v12 = vrot.slane %v1316_v48, 4  ;;  %v7336_v32 = vcombine.high %v6278_v27, %v6278_v27  ;;  %3565 = vmatprep.subr.bf16.mxu0 %v7546_v46  ;;  %v6210_v33 = vcombine.low %v6184_v24, %v6191_v5  ;;  %v7337_v41 = vcombine.low %v6279_v22, %v6279_v22  ;;  %v7552_v24 = vld [vmem:[#allocation3 + $0x64] ss:$16 sps:$4 sm:$0xff]  }
 0x18e   : > { %v6112_v61 = vrot.slane %v6098_v51, %v7812_v21  ;;  %v7338_v8 = vcombine.high %v6279_v22, %v6279_v22  ;;  %3566 = vmatpush1.bf16.msra.mxu0 %v7548_v52  ;;  %v6211_v13 = vcombine.low %v6198_v14, %v6205_v15  ;;  %v6291_v3 = vshrl.u32 %v7335_v53, 16  ;;  %v5592_v5 = vld [vmem:[%s10016_s3 + $0x28] sm:$0x11] }
 0x18f   : > { %v1322_v19 = vsel %vm395_vm3, %v1318_v47, %v1319_v12  ;;  %v8892_v45 = vpop.permute.xlu1 %1666  ;;  %v6299_v6 = vshrl.u32 %v7336_v32, 16  ;;  %v1668_v20 = vrot.slane %v8877_v58, 4  ;;  %v6218_v38 = vrot.slane %v6210_v33, %v7812_v21 }
 0x190   : > { %v1323_v7 = vsel %vm356_vm5, %v8779_v44, %v1322_v19  ;;  %v1432_v49 = vpop.permute.xlu0 %1431  ;;  %v6113_v16 = vcombine.low %v6105_v57, %v6112_v61  ;;  %v6225_v54 = vrot.slane %v6211_v13, %v7812_v21  ;;  %v6292_v29 = vpack.i.b16 %v6291_v3, %v6291_v3  ;;  %v5480_v44 = vld [vmem:[%s10016_s3 + $0x28] sm:$0x11]  ;;  %v5591_v57 = vld [vmem:[%s10016_s3 + $0x20] sm:$0x11] }
 0x191   : > { %1327 = vst [vmem:[#allocation3 + $0x48] sm:$0x33] %v1323_v7  ;;  %v1436_v47 = vrot.slane %v1432_v49, 4  ;;  %v6300_v42 = vpack.i.b16 %v6299_v6, %v6299_v6  ;;  %v6307_v34 = vshrl.u32 %v7337_v41, 16  ;;  %v6315_v9 = vshrl.u32 %v7338_v8, 16 }
 0x192   : > { %6114 = vrot.lane.b32.xlu0 %v6113_v16, %s7740_s29  ;;  %v7307_v59 = vcombine.low %v5479_v23, %v5479_v23  ;;  %v7308_v37 = vcombine.high %v5479_v23, %v5479_v23  ;;  %v6226_v36 = vcombine.low %v6218_v38, %v6225_v54  ;;  %v6297_v27 = vrot.slane %v6292_v29, %v7863_v35  ;;  %v7554_v41 = vld [vmem:[#allocation3 + $0x60] ss:$16 sps:$4 sm:$0xff]  }
 0x193   : > { %v1438_v0 = vsel %vm395_vm3, %v1435_v40, %v1436_v47  ;;  %v1441_v43 = vsel %vm395_vm3, %v1436_v47, %v1437_v39  ;;  %v8912_v30 = vpop.permute.xlu1 %855  ;;  %v1670_v28 = vrot.slane %v8892_v45, 4  ;;  %v6305_v40 = vrot.slane %v6300_v42, %v7863_v35 }
 0x194   : > { %v1440_v2 = vsel %vm1439_vm12, %v8835_v60, %v1438_v0  ;;  %v1442_v56 = vsel %vm1439_vm12, %v1432_v49, %v1441_v43  ;;  %v1544_v25 = vpop.permute.xlu0 %1543  ;;  %v7549_v11 = vld [vmem:[#allocation3 + $0x84] ss:$16 sps:$4 sm:$0xff]   ;;  %v7551_v1 = vld [vmem:[#allocation3 + $0x80] ss:$16 sps:$4 sm:$0xff]   ;;  %6227 = vrot.lane.b32.xlu1 %v6226_v36, %s7741_s9  ;;  %v6308_v39 = vpack.i.b16 %v6307_v34, %v6307_v34  ;;  %v6316_v26 = vpack.i.b16 %v6315_v9, %v6315_v9 }
 0x195   : > { %1445 = vst [vmem:[#allocation3 + $0x40] sm:$0xcc] %v1440_v2  ;;  %1446 = vst [vmem:[#allocation3 + $0x48] sm:$0xcc] %v1442_v56  ;;  %v1549_v4 = vrot.slane %v1544_v25, 4  ;;  %v7309_v63 = vcombine.low %v5480_v44, %v5480_v44  ;;  %3567 = vmatprep.subr.bf16.mxu0 %v7549_v11  ;;  %v6326_v60 = vcombine.low %v6297_v27, %v6305_v40  ;;  %vm10030_vm14 = vcmask 64512  }
 0x196   : > { %v7310_v10 = vcombine.high %v5480_v44, %v5480_v44  ;;  %v5492_v22 = vpack.i.b16 %v7307_v59, %v7307_v59  ;;  %v5499_v53 = vpack.i.b16 %v7308_v37, %v7308_v37  ;;  %3568 = vmatpush1.bf16.msra.mxu0 %v7551_v1  ;;  %v6313_v46 = vrot.slane %v6308_v39, %v7863_v35  ;;  %v5708_v43 = vld [vmem:[%s10016_s3 + $0x20] sm:$0x22] }
 0x197   : > { %v1552_v50 = vsel %vm395_vm3, %v1549_v4, %v1550_v62  ;;  %v8924_v48 = vpop.permute.xlu1 %970  ;;  %v6321_v52 = vrot.slane %v6316_v26, %v7863_v35  ;;  %v5506_v51 = vpack.i.b16 %v7309_v63, %v7309_v63  ;;  %v860_v14 = vrot.slane %v8912_v30, 4  ;;  %3569 = vmatprep.subr.bf16.mxu0 %v7552_v24  ;;  %v5709_v4 = vld [vmem:[%s10016_s3 + $0x28] sm:$0x22] }
 0x198   : > { %v1554_v12 = vsel %vm10030_vm14, %v1544_v25, %v1552_v50  ;;  %v1548_v15 = vpop.permute.xlu0 %1547  ;;  %v6334_v32 = vrot.slane %v6326_v60, %v7812_v21  ;;  %v5497_v61 = vrot.slane %v5492_v22, %v7806_v17  ;;  %v5504_v19 = vrot.slane %v5499_v53, %v7806_v17 }
 0x199   : > { %1559 = vst [vmem:[#allocation3 + $0x50] sm:$0x33] %v1554_v12  ;;  %v1551_v33 = vrot.slane %v1548_v15, 4  ;;  %v6327_v8 = vcombine.low %v6313_v46, %v6321_v52  ;;  %v5511_v13 = vrot.slane %v5506_v51, %v7806_v17  ;;  %v5513_v3 = vpack.i.b16 %v7310_v10, %v7310_v10  ;;  %v5820_v12 = vld [vmem:[%s10016_s3 + $0x20] sm:$0x22] }
 0x19a   : > { %v7311_v6 = vcombine.low %v5591_v57, %v5591_v57  ;;  %v7312_v23 = vcombine.high %v5591_v57, %v5591_v57  ;;  %v7313_v7 = vcombine.low %v5592_v5, %v5592_v5  ;;  %3570 = vmatpush1.bf16.msra.mxu0 %v7554_v41  ;;  %v5523_v47 = vcombine.low %v5497_v61, %v5504_v19 }
 0x19b   : > { %v1555_v49 = vsel %vm395_vm3, %v1550_v62, %v1551_v33  ;;  %v8943_v16 = vpop.permute.xlu1 %974  ;;  %v6341_v38 = vrot.slane %v6327_v8, %v7812_v21  ;;  %v7314_v54 = vcombine.high %v5592_v5, %v5592_v5  ;;  %v976_v42 = vrot.slane %v8924_v48, 4 }
 0x19c   : > { %v1556_v29 = vsel %vm10030_vm14, %v8861_v31, %v1555_v49  ;;  %v1665_v34 = vpop.permute.xlu0 %1664  ;;  %v5518_v9 = vrot.slane %v5513_v3, %v7806_v17  ;;  %v5604_v44 = vshrl.u32 %v7311_v6, 16  ;;  %v5531_v62 = vrot.slane %v5523_v47, %v7812_v21  ;;  %v5821_v49 = vld [vmem:[%s10016_s3 + $0x28] sm:$0x22] }
 0x19d   : > { %1560 = vst [vmem:[#allocation3 + $0x58] sm:$0x33] %v1556_v29  ;;  %v1669_v59 = vrot.slane %v1665_v34, 4  ;;  %v6342_v37 = vcombine.low %v6334_v32, %v6341_v38  ;;  %v5612_v0 = vshrl.u32 %v7312_v23, 16  ;;  %v5620_v2 = vshrl.u32 %v7313_v7, 16 }
 0x19e   : > { %v5524_v36 = vcombine.low %v5511_v13, %v5518_v9  ;;  %v5605_v27 = vpack.i.b16 %v5604_v44, %v5604_v44  ;;  %v5628_v31 = vshrl.u32 %v7314_v54, 16  ;;  %v978_v11 = vrot.slane %v8943_v16, 4 }
 0x19f   : > { %v1671_v56 = vsel %vm395_vm3, %v1668_v20, %v1669_v59  ;;  %v1674_v25 = vsel %vm395_vm3, %v1669_v59, %v1670_v28  ;;  %v8961_v1 = vpop.permute.xlu1 %1084  ;;  %6343 = vrot.lane.b32.xlu0 %v6342_v37, %s7742_s20  ;;  %v5613_v40 = vpack.i.b16 %v5612_v0, %v5612_v0  ;;  %vm10031_vm14 = vcmask 56320  }
 0x1a0   : > { %v1673_v39 = vsel %vm10031_vm14, %v8877_v58, %v1671_v56  ;;  %vm10032_vm15 = vmmov %vm10031_vm14  ;;  %v854_v26 = vpop.permute.xlu0 %853  ;;  %v5538_v45 = vrot.slane %v5524_v36, %v7812_v21  ;;  %v7315_v28 = vcombine.low %v5708_v43, %v5708_v43  ;;  %v5610_v24 = vrot.slane %v5605_v27, %v7806_v17 }
 0x1a1   : > { %v1675_v20 = vsel %vm10032_vm15, %v1665_v34, %v1674_v25  ;;  %1678 = vst [vmem:[#allocation3 + $0x50] sm:$0xcc] %v1673_v39  ;;  %v859_v63 = vrot.slane %v854_v26, 4  ;;  %v5618_v60 = vrot.slane %v5613_v40, %v7806_v17  ;;  %v5621_v10 = vpack.i.b16 %v5620_v2, %v5620_v2 }
 0x1a2   : > { %1679 = vst [vmem:[#allocation3 + $0x58] sm:$0xcc] %v1675_v20  ;;  %v5539_v22 = vcombine.low %v5531_v62, %v5538_v45  ;;  %v5629_v53 = vpack.i.b16 %v5628_v31, %v5628_v31  ;;  %v7316_v50 = vcombine.high %v5708_v43, %v5708_v43  ;;  %v7317_v46 = vcombine.low %v5709_v4, %v5709_v4 }
 0x1a3   : > { %v862_v58 = vsel %vm395_vm3, %v859_v63, %v860_v14  ;;  %v8976_v52 = vpop.permute.xlu1 %1199  ;;  %v5626_v51 = vrot.slane %v5621_v10, %v7806_v17  ;;  %v5639_v57 = vcombine.low %v5610_v24, %v5618_v60  ;;  %v7318_v5 = vcombine.high %v5709_v4, %v5709_v4  ;;  %v5050_v24 = vld [vmem:[%s10016_s3 + $0x10] sm:$0x44] }
 0x1a4   : > { %v863_v15 = vsel %vm823_vm1, %v854_v26, %v862_v58  ;;  %v1089_v32 = vrot.slane %v8961_v1, 4  ;;  %v858_v61 = vpop.permute.xlu0 %857  ;;  %5540 = vrot.lane.b32.xlu1 %v5539_v22, %s7743_s23  ;;  %v5634_v33 = vrot.slane %v5629_v53, %v7806_v17  ;;  %v5721_v41 = vpack.i.b16 %v7315_v28, %v7315_v28 }
 0x1a5   : > { %868 = vst [vmem:[#allocation3 + $0x20] sm:$0x33] %v863_v15  ;;  %v861_v8 = vrot.slane %v858_v61, 4  ;;  %v5647_v19 = vrot.slane %v5639_v57, %v7812_v21  ;;  %v5728_v13 = vpack.i.b16 %v7316_v50, %v7316_v50  ;;  %v5735_v3 = vpack.i.b16 %v7317_v46, %v7317_v46 }
 0x1a6   : > { %v5640_v6 = vcombine.low %v5626_v51, %v5634_v33  ;;  %v5726_v23 = vrot.slane %v5721_v41, %v7809_v18  ;;  %v5742_v7 = vpack.i.b16 %v7318_v5, %v7318_v5  ;;  %v7319_v38 = vcombine.low %v5820_v12, %v5820_v12 }
 0x1a7   : > { %v864_v47 = vsel %vm395_vm3, %v860_v14, %v861_v8  ;;  %v8994_v54 = vpop.permute.xlu1 %1203  ;;  %v5733_v29 = vrot.slane %v5728_v13, %v7809_v18  ;;  %v5740_v34 = vrot.slane %v5735_v3, %v7809_v18  ;;  %v7320_v9 = vcombine.high %v5820_v12, %v5820_v12 }
 0x1a8   : > { %v865_v44 = vsel %vm823_vm1, %v8912_v30, %v864_v47  ;;  %v1205_v59 = vrot.slane %v8976_v52, 4  ;;  %v973_v37 = vpop.permute.xlu0 %972  ;;  %v7555_v62 = vld [vmem:[#allocation3 + $0x44] ss:$16 sps:$4 sm:$0xff]   ;;  %v5654_v0 = vrot.slane %v5640_v6, %v7812_v21  ;;  %v5747_v43 = vrot.slane %v5742_v7, %v7809_v18  ;;  %v7559_v27 = vld [vmem:[#allocation3 + $0x40] ss:$16 sps:$4 sm:$0xff]  }
 0x1a9   : > { %869 = vst [vmem:[#allocation3 + $0x28] sm:$0x33] %v865_v44  ;;  %v977_v14 = vrot.slane %v973_v37, 4  ;;  %v7557_v36 = vld [vmem:[#allocation3 + $0x4c] ss:$16 sps:$4 sm:$0xff]   ;;  %v5752_v2 = vcombine.low %v5726_v23, %v5733_v29  ;;  %v7321_v31 = vcombine.low %v5821_v49, %v5821_v49  ;;  %v7322_v56 = vcombine.high %v5821_v49, %v5821_v49  ;;  %3571 = vmatprep.subr.bf16.mxu0 %v7555_v62 }
 0x1aa   : > { %v7560_v25 = vld [vmem:[#allocation3 + $0x48] ss:$16 sps:$4 sm:$0xff]   ;;  %v5655_v40 = vcombine.low %v5647_v19, %v5654_v0  ;;  %v5753_v4 = vcombine.low %v5740_v34, %v5747_v43  ;;  %v5833_v30 = vshrl.u32 %v7319_v38, 16  ;;  %v5841_v39 = vshrl.u32 %v7320_v9, 16  ;;  %3612 = vmatprep.subr.bf16.mxu1 %v7557_v36  ;;  %3572 = vmatpush1.bf16.msra.mxu0 %v7559_v27  ;;  %v5251_v43 = vld [vmem:[%s10016_s3 + $0x18] sm:$0x88] }
 0x1ab   : > { %v979_v20 = vsel %vm395_vm3, %v976_v42, %v977_v14  ;;  %v981_v26 = vsel %vm395_vm3, %v977_v14, %v978_v11  ;;  %v9009_v45 = vpop.permute.xlu1 %388  ;;  %v5760_v28 = vrot.slane %v5752_v2, %v7812_v21  ;;  %v5849_v63 = vshrl.u32 %v7321_v31, 16  ;;  %3613 = vmatpush1.bf16.msra.mxu1 %v7560_v25  ;;  %v5250_v23 = vld [vmem:[%s10016_s3 + $0x10] sm:$0x88] }
 0x1ac   : > { %v980_v60 = vsel %vm708_vm8, %v8924_v48, %v979_v20  ;;  %v982_v42 = vsel %vm708_vm8, %v973_v37, %v981_v26  ;;  %v1207_v16 = vrot.slane %v8994_v54, 4  ;;  %v1083_v11 = vpop.permute.xlu0 %1082  ;;  %5656 = vrot.lane.b32.xlu0 %v5655_v40, %s7744_s30  ;;  %v5767_v10 = vrot.slane %v5753_v4, %v7812_v21  ;;  %v5051_v48 = vld [vmem:[%s10016_s3 + $0x18] sm:$0x44] }
 0x1ad   : > { %985 = vst [vmem:[#allocation3 + $0x20] sm:$0xcc] %v980_v60  ;;  %986 = vst [vmem:[#allocation3 + $0x28] sm:$0xcc] %v982_v42  ;;  %v1088_v22 = vrot.slane %v1083_v11, 4  ;;  %v5834_v53 = vpack.i.b16 %v5833_v30, %v5833_v30  ;;  %v5842_v50 = vpack.i.b16 %v5841_v39, %v5841_v39  ;;  %v5850_v46 = vpack.i.b16 %v5849_v63, %v5849_v63 }
 0x1ae   : > { %v5768_v58 = vcombine.low %v5760_v28, %v5767_v10  ;;  %v5857_v51 = vshrl.u32 %v7322_v56, 16  ;;  %v7289_v57 = vcombine.low %v5050_v24, %v5050_v24  ;;  %v7290_v5 = vcombine.high %v5050_v24, %v5050_v24  ;;  %v5362_v42 = vld [vmem:[%s10016_s3 + $0x10] sm:$0x88] }
 0x1af   : > { %v1091_v12 = vsel %vm395_vm3, %v1088_v22, %v1089_v32  ;;  %v393_v15 = vrot.slane %v9009_v45, 4  ;;  %v9028_v61 = vpop.permute.xlu1 %506  ;;  %v5839_v33 = vrot.slane %v5834_v53, %v7809_v18  ;;  %v5847_v41 = vrot.slane %v5842_v50, %v7809_v18 }
 0x1b0   : > { %v1092_v8 = vsel %vm590_vm0, %v1083_v11, %v1091_v12  ;;  %v1087_v19 = vpop.permute.xlu0 %1086  ;;  %5769 = vrot.lane.b32.xlu1 %v5768_v58, %s7745_s11  ;;  %v5855_v13 = vrot.slane %v5850_v46, %v7809_v18  ;;  %v5858_v3 = vpack.i.b16 %v5857_v51, %v5857_v51  ;;  %v7291_v6 = vcombine.low %v5051_v48, %v5051_v48 }
 0x1b1   : > { %1097 = vst [vmem:[#allocation3 + $0x30] sm:$0x33] %v1092_v8  ;;  %v1090_v7 = vrot.slane %v1087_v19, 4  ;;  %v5868_v49 = vcombine.low %v5839_v33, %v5847_v41  ;;  %v7292_v38 = vcombine.high %v5051_v48, %v5051_v48  ;;  %v5063_v47 = vpack.i.b16 %v7289_v57, %v7289_v57 }
 0x1b2   : > { %v512_v54 = vrot.slane %v9028_v61, 4  ;;  %v5863_v29 = vrot.slane %v5858_v3, %v7809_v18  ;;  %v5070_v34 = vpack.i.b16 %v7290_v5, %v7290_v5  ;;  %v5077_v9 = vpack.i.b16 %v7291_v6, %v7291_v6 }
 0x1b3   : > { %v1093_v44 = vsel %vm395_vm3, %v1089_v32, %v1090_v7  ;;  %v9043_v37 = vpop.permute.xlu1 %510  ;;  %v5068_v62 = vrot.slane %v5063_v47, %v7834_v55  ;;  %v5084_v0 = vpack.i.b16 %v7292_v38, %v7292_v38  ;;  %v7299_v14 = vcombine.low %v5250_v23, %v5250_v23 }
 0x1b4   : > { %v1094_v36 = vsel %vm590_vm0, %v8961_v1, %v1093_v44  ;;  %v1202_v27 = vpop.permute.xlu0 %1201  ;;  %v5869_v2 = vcombine.low %v5855_v13, %v5863_v29  ;;  %v5876_v31 = vrot.slane %v5868_v49, %v7812_v21  ;;  %v5075_v56 = vrot.slane %v5070_v34, %v7834_v55  ;;  %v4592_v34 = vld [vmem:[%s10016_s3 + $0x10] sm:$0x11] }
 0x1b5   : > { %1098 = vst [vmem:[#allocation3 + $0x38] sm:$0x33] %v1094_v36  ;;  %v1206_v32 = vrot.slane %v1202_v27, 4  ;;  %v5082_v25 = vrot.slane %v5077_v9, %v7834_v55  ;;  %v5089_v40 = vrot.slane %v5084_v0, %v7834_v55  ;;  %v7300_v4 = vcombine.high %v5250_v23, %v5250_v23 }
 0x1b6   : > { %v5883_v30 = vrot.slane %v5869_v2, %v7812_v21  ;;  %v5094_v39 = vcombine.low %v5068_v62, %v5075_v56  ;;  %v7301_v20 = vcombine.low %v5251_v43, %v5251_v43  ;;  %v7302_v26 = vcombine.high %v5251_v43, %v5251_v43  ;;  %v4593_v2 = vld [vmem:[%s10016_s3 + $0x18] sm:$0x11] }
 0x1b7   : > { %v1208_v1 = vsel %vm395_vm3, %v1205_v59, %v1206_v32  ;;  %v1210_v28 = vsel %vm395_vm3, %v1206_v32, %v1207_v16  ;;  %v9060_v63 = vpop.permute.xlu1 %622  ;;  %v5095_v24 = vcombine.low %v5082_v25, %v5089_v40  ;;  %v5263_v60 = vpack.i.b16 %v7299_v14, %v7299_v14  ;;  %v5363_v59 = vld [vmem:[%s10016_s3 + $0x18] sm:$0x88] }
 0x1b8   : > { %v1209_v11 = vsel %vm475_vm13, %v8976_v52, %v1208_v1  ;;  %v1211_v10 = vsel %vm475_vm13, %v1202_v27, %v1210_v28  ;;  %v514_v22 = vrot.slane %v9043_v37, 4  ;;  %v387_v53 = vpop.permute.xlu0 %386  ;;  %v5884_v50 = vcombine.low %v5876_v31, %v5883_v30 }
 0x1b9   : > { %1214 = vst [vmem:[#allocation3 + $0x30] sm:$0xcc] %v1209_v11  ;;  %1215 = vst [vmem:[#allocation3 + $0x38] sm:$0xcc] %v1211_v10  ;;  %v392_v16 = vrot.slane %v387_v53, 4  ;;  %v5102_v46 = vrot.slane %v5094_v39, %v7812_v21  ;;  %v5109_v48 = vrot.slane %v5095_v24, %v7812_v21  ;;  %v5268_v58 = vrot.slane %v5263_v60, %v7863_v35 }
 0x1ba   : > { %5885 = vrot.lane.b32.xlu0 %v5884_v50, %s7746_s25  ;;  %v5270_v52 = vpack.i.b16 %v7300_v4, %v7300_v4  ;;  %v5277_v51 = vpack.i.b16 %v7301_v20, %v7301_v20  ;;  %v5284_v57 = vpack.i.b16 %v7302_v26, %v7302_v26  ;;  %v7303_v5 = vcombine.low %v5362_v42, %v5362_v42 }
 0x1bb   : > { %v396_v12 = vsel %vm395_vm3, %v392_v16, %v393_v15  ;;  %v9079_v33 = vpop.permute.xlu1 %739  ;;  %v5110_v41 = vcombine.low %v5102_v46, %v5109_v48  ;;  %v7304_v8 = vcombine.high %v5362_v42, %v5362_v42  ;;  %v7305_v19 = vcombine.low %v5363_v59, %v5363_v59  ;;  %v4704_v16 = vld [vmem:[%s10016_s3 + $0x10] sm:$0x11] }
 0x1bc   : > { %v398_v13 = vsel %vm397_vm4, %v387_v53, %v396_v12  ;;  %v627_v3 = vrot.slane %v9060_v63, 4  ;;  %v391_v6 = vpop.permute.xlu0 %390  ;;  %v5275_v23 = vrot.slane %v5270_v52, %v7863_v35  ;;  %v5282_v7 = vrot.slane %v5277_v51, %v7863_v35 }
 0x1bd   : > { %403 = vst [vmem:[#allocation3] sm:$0x33] %v398_v13  ;;  %v394_v49 = vrot.slane %v391_v6, 4  ;;  %5111 = vrot.lane.b32.xlu1 %v5110_v41, %s7747_s28  ;;  %v5289_v38 = vrot.slane %v5284_v57, %v7863_v35  ;;  %v7306_v47 = vcombine.high %v5363_v59, %v5363_v59  ;;  %v5375_v29 = vshrl.u32 %v7303_v5, 16 }
 0x1be   : > { %v745_v9 = vrot.slane %v9079_v33, 4  ;;  %v5294_v44 = vcombine.low %v5268_v58, %v5275_v23  ;;  %v5383_v62 = vshrl.u32 %v7304_v8, 16  ;;  %v5391_v0 = vshrl.u32 %v7305_v19, 16 }
 0x1bf   : > { %v399_v43 = vsel %vm395_vm3, %v393_v15, %v394_v49  ;;  %v5295_v14 = vcombine.low %v5282_v7, %v5289_v38  ;;  %v5376_v36 = vpack.i.b16 %v5375_v29, %v5375_v29  ;;  %v5399_v27 = vshrl.u32 %v7306_v47, 16  ;;  %v9099_v32 = vpop.permute.xlu1 %743 }
 0x1c0   : > { %v400_v31 = vsel %vm397_vm4, %v9009_v45, %v399_v43  ;;  %v509_v56 = vpop.permute.xlu0 %508  ;;  %v7561_v25 = vld [vmem:[#allocation3 + $0x24] ss:$16 sps:$4 sm:$0xff]   ;;  %v5302_v40 = vrot.slane %v5294_v44, %v7812_v21  ;;  %v5384_v4 = vpack.i.b16 %v5383_v62, %v5383_v62  ;;  %v7273_v30 = vcombine.low %v4592_v34, %v4592_v34  ;;  %v7563_v39 = vld [vmem:[#allocation3 + $0x2c] ss:$16 sps:$4 sm:$0xff]   ;;  %v7565_v20 = vld [vmem:[#allocation3 + $0x20] ss:$16 sps:$4 sm:$0xff]  }
 0x1c1   : > { %404 = vst [vmem:[#allocation3 + $0x8] sm:$0x33] %v400_v31  ;;  %v513_v15 = vrot.slane %v509_v56, 4  ;;  %v5309_v26 = vrot.slane %v5295_v14, %v7812_v21  ;;  %v5381_v1 = vrot.slane %v5376_v36, %v7863_v35  ;;  %v5392_v28 = vpack.i.b16 %v5391_v0, %v5391_v0  ;;  %3573 = vmatprep.subr.bf16.mxu0 %v7561_v25  ;;  %v7566_v24 = vld [vmem:[#allocation3 + $0x28] ss:$16 sps:$4 sm:$0xff]  }
 0x1c2   : > { %v5389_v45 = vrot.slane %v5384_v4, %v7863_v35  ;;  %v5400_v60 = vpack.i.b16 %v5399_v27, %v5399_v27  ;;  %v7274_v42 = vcombine.high %v4592_v34, %v4592_v34  ;;  %v7275_v11 = vcombine.low %v4593_v2, %v4593_v2  ;;  %3614 = vmatprep.subr.bf16.mxu1 %v7563_v39 }
 0x1c3   : > { %v515_v10 = vsel %vm395_vm3, %v512_v54, %v513_v15  ;;  %v518_v53 = vsel %vm395_vm3, %v513_v15, %v514_v22  ;;  %v747_v50 = vrot.slane %v9099_v32, 4  ;;  %3574 = vmatpush1.bf16.msra.mxu0 %v7565_v20  ;;  %v5310_v59 = vcombine.low %v5302_v40, %v5309_v26  ;;  %3615 = vmatpush1.bf16.msra.mxu1 %v7566_v24  ;;  %v4821_v40 = vld [vmem:[%s10016_s3 + $0x10] sm:$0x22] }
 0x1c4   : > { %v517_v46 = vsel %vm516_vm9, %v9028_v61, %v515_v10  ;;  %v519_v48 = vsel %vm516_vm9, %v509_v56, %v518_v53  ;;  %v621_v54 = vpop.permute.xlu0 %620  ;;  %v5397_v37 = vrot.slane %v5392_v28, %v7863_v35  ;;  %v5405_v22 = vrot.slane %v5400_v60, %v7863_v35  ;;  %v4705_v61 = vld [vmem:[%s10016_s3 + $0x18] sm:$0x11] }
 0x1c5   : > { %522 = vst [vmem:[#allocation3] sm:$0xcc] %v517_v46  ;;  %523 = vst [vmem:[#allocation3 + $0x8] sm:$0xcc] %v519_v48  ;;  %v626_v58 = vrot.slane %v621_v54, 4  ;;  %5311 = vrot.lane.b32.xlu0 %v5310_v59, %s7748_s13  ;;  %v5410_v52 = vcombine.low %v5381_v1, %v5389_v45  ;;  %v7276_v51 = vcombine.high %v4593_v2, %v4593_v2  ;;  %vm10034_vm15 = vcmask 64512  }
 0x1c6   : > { %v4605_v57 = vpack.i.b16 %v7273_v30, %v7273_v30  ;;  %v5411_v5 = vcombine.low %v5397_v37, %v5405_v22  ;;  %v4612_v12 = vpack.i.b16 %v7274_v42, %v7274_v42  ;;  %v4619_v41 = vpack.i.b16 %v7275_v11, %v7275_v11 }
 0x1c7   : > { %v7277_v8 = vcombine.low %v4704_v16, %v4704_v16  ;;  %v629_v19 = vsel %vm395_vm3, %v626_v58, %v627_v3  ;;  %v5418_v13 = vrot.slane %v5410_v52, %v7812_v21  ;;  %v4626_v23 = vpack.i.b16 %v7276_v51, %v7276_v51  ;;  %v4934_v58 = vld [vmem:[%s10016_s3 + $0x18] sm:$0x22] }
 0x1c8   : > { %v4610_v6 = vrot.slane %v4605_v57, %v7806_v17  ;;  %v631_v7 = vsel %vm630_vm2, %v621_v54, %v629_v19  ;;  %v625_v49 = vpop.permute.xlu0 %624  ;;  %v5425_v38 = vrot.slane %v5411_v5, %v7812_v21  ;;  %v4617_v47 = vrot.slane %v4612_v12, %v7806_v17 }
 0x1c9   : > { %v4624_v29 = vrot.slane %v4619_v41, %v7806_v17  ;;  %636 = vst [vmem:[#allocation3 + $0x10] sm:$0x33] %v631_v7  ;;  %v628_v34 = vrot.slane %v625_v49, 4  ;;  %v4631_v44 = vrot.slane %v4626_v23, %v7806_v17  ;;  %v7278_v62 = vcombine.high %v4704_v16, %v4704_v16  ;;  %v4933_v16 = vld [vmem:[%s10016_s3 + $0x10] sm:$0x22] }
 0x1ca   : > { %v7279_v0 = vcombine.low %v4705_v61, %v4705_v61  ;;  %v5426_v43 = vcombine.low %v5418_v13, %v5425_v38  ;;  %v4636_v14 = vcombine.low %v4610_v6, %v4617_v47  ;;  %v7280_v36 = vcombine.high %v4705_v61, %v4705_v61  ;;  %v4134_v23 = vld [vmem:[%s10016_s3] sm:$0x44] }
 0x1cb   : > { %v4717_v27 = vshrl.u32 %v7277_v8, 16  ;;  %v632_v2 = vsel %vm395_vm3, %v627_v3, %v628_v34  ;;  %v4637_v31 = vcombine.low %v4624_v29, %v4631_v44  ;;  %v4725_v56 = vshrl.u32 %v7278_v62, 16 }
 0x1cc   : > { %v4733_v25 = vshrl.u32 %v7279_v0, 16  ;;  %v633_v4 = vsel %vm630_vm2, %v9060_v63, %v632_v2  ;;  %v742_v30 = vpop.permute.xlu0 %741  ;;  %5427 = vrot.lane.b32.xlu1 %v5426_v43, %s7749_s10  ;;  %v4644_v15 = vrot.slane %v4636_v14, %v7812_v21  ;;  %v4741_v20 = vshrl.u32 %v7280_v36, 16  ;;  %v4822_v63 = vld [vmem:[%s10016_s3 + $0x18] sm:$0x22]  ;;  %v4135_v0 = vld [vmem:[%s10016_s3 + $0x8] sm:$0x44] }
 0x1cd   : > { %v4718_v39 = vpack.i.b16 %v4717_v27, %v4717_v27  ;;  %637 = vst [vmem:[#allocation3 + $0x18] sm:$0x33] %v633_v4  ;;  %v746_v26 = vrot.slane %v742_v30, 4  ;;  %v4651_v3 = vrot.slane %v4637_v31, %v7812_v21  ;;  %v4726_v1 = vpack.i.b16 %v4725_v56, %v4725_v56 }
 0x1ce   : > { %v4734_v28 = vpack.i.b16 %v4733_v25, %v4733_v25  ;;  %v4742_v45 = vpack.i.b16 %v4741_v20, %v4741_v20  ;;  %v7281_v60 = vcombine.low %v4821_v40, %v4821_v40  ;;  %v7282_v42 = vcombine.high %v4821_v40, %v4821_v40 }
 0x1cf   : > { %v4723_v24 = vrot.slane %v4718_v39, %v7806_v17  ;;  %v748_v11 = vsel %vm395_vm3, %v745_v9, %v746_v26  ;;  %v751_v10 = vsel %vm395_vm3, %v746_v26, %v747_v50  ;;  %v4652_v53 = vcombine.low %v4644_v15, %v4651_v3 }
 0x1d0   : > { %v4731_v59 = vrot.slane %v4726_v1, %v7806_v17  ;;  %v750_v46 = vsel %vm749_vm10, %v9079_v33, %v748_v11  ;;  %v752_v48 = vsel %vm749_vm10, %v742_v30, %v751_v10  ;;  %v4739_v54 = vrot.slane %v4734_v28, %v7806_v17 }
 0x1d1   : > { %v4747_v9 = vrot.slane %v4742_v45, %v7806_v17  ;;  %755 = vst [vmem:[#allocation3 + $0x10] sm:$0xcc] %v750_v46  ;;  %756 = vst [vmem:[#allocation3 + $0x18] sm:$0xcc] %v752_v48  ;;  %4653 = vrot.lane.b32.xlu0 %v4652_v53, %s7736_s7  ;;  %v7283_v50 = vcombine.low %v4822_v63, %v4822_v63  ;;  %v7284_v37 = vcombine.high %v4822_v63, %v4822_v63  ;;  %v4246_v63 = vld [vmem:[%s10016_s3] sm:$0x44] }
 0x1d2   : > { %v4752_v32 = vcombine.low %v4723_v24, %v4731_v59  ;;  %v4834_v22 = vpack.i.b16 %v7281_v60, %v7281_v60  ;;  %v4841_v33 = vpack.i.b16 %v7282_v42, %v7282_v42  ;;  %v7285_v51 = vcombine.low %v4933_v16, %v4933_v16  ;;  %v3368_v60 = vld [vmem:[%s10014_s1] sm:$0x3]  ;;  %v4247_v53 = vld [vmem:[%s10016_s3 + $0x8] sm:$0x44] }
 0x1d3   : > { %v4753_v52 = vcombine.low %v4739_v54, %v4747_v9  ;;  %v7286_v57 = vcombine.high %v4933_v16, %v4933_v16  ;;  %v4848_v41 = vpack.i.b16 %v7283_v50, %v7283_v50  ;;  %v4855_v61 = vpack.i.b16 %v7284_v37, %v7284_v37  ;;  %v4363_v37 = vld [vmem:[%s10016_s3] sm:$0x88] }
 0x1d4   : > { %v4760_v5 = vrot.slane %v4752_v32, %v7812_v21  ;;  %v4839_v12 = vrot.slane %v4834_v22, %v7809_v18  ;;  %v4846_v19 = vrot.slane %v4841_v33, %v7809_v18  ;;  %v7287_v13 = vcombine.low %v4934_v58, %v4934_v58 }
 0x1d5   : > { %v4767_v8 = vrot.slane %v4753_v52, %v7812_v21  ;;  %v7288_v6 = vcombine.high %v4934_v58, %v4934_v58  ;;  %v4853_v7 = vrot.slane %v4848_v41, %v7809_v18  ;;  %v4860_v49 = vrot.slane %v4855_v61, %v7809_v18  ;;  %v4364_v41 = vld [vmem:[%s10016_s3 + $0x8] sm:$0x88] }
 0x1d6   : > { %v4946_v38 = vshrl.u32 %v7285_v51, 16  ;;  %v4954_v47 = vshrl.u32 %v7286_v57, 16  ;;  %v4865_v34 = vcombine.low %v4839_v12, %v4846_v19  ;;  %v4962_v44 = vshrl.u32 %v7287_v13, 16 }
 0x1d7   : > { %v4768_v29 = vcombine.low %v4760_v5, %v4767_v8  ;;  %v4970_v62 = vshrl.u32 %v7288_v6, 16  ;;  %v4866_v43 = vcombine.low %v4853_v7, %v4860_v49  ;;  %v7257_v27 = vcombine.low %v4134_v23, %v4134_v23 }
 0x1d8   : > { %v4947_v14 = vpack.i.b16 %v4946_v38, %v4946_v38  ;;  %v4955_v36 = vpack.i.b16 %v4954_v47, %v4954_v47  ;;  %v7567_v2 = vld [vmem:[#allocation3 + $0x4] ss:$16 sps:$4 sm:$0xff]   ;;  %v4873_v31 = vrot.slane %v4865_v34, %v7812_v21  ;;  %v4963_v56 = vpack.i.b16 %v4962_v44, %v4962_v44  ;;  %v7569_v4 = vld [vmem:[#allocation3 + $0xc] ss:$16 sps:$4 sm:$0xff]   ;;  %v7571_v30 = vld [vmem:[#allocation3] ss:$16 sps:$4 sm:$0xff]  }
 0x1d9   : > { %4769 = vrot.lane.b32.xlu1 %v4768_v29, %s7750_s18  ;;  %v4971_v25 = vpack.i.b16 %v4970_v62, %v4970_v62  ;;  %v7258_v40 = vcombine.high %v4134_v23, %v4134_v23  ;;  %v7572_v15 = vld [vmem:[#allocation3 + $0x8] ss:$16 sps:$4 sm:$0xff]   ;;  %v4880_v39 = vrot.slane %v4866_v43, %v7812_v21  ;;  %v7259_v3 = vcombine.low %v4135_v0, %v4135_v0 }
 0x1da   : > { %v4952_v20 = vrot.slane %v4947_v14, %v7809_v18  ;;  %v4960_v26 = vrot.slane %v4955_v36, %v7809_v18  ;;  %3575 = vmatprep.subr.bf16.mxu0 %v7567_v2  ;;  %v4968_v1 = vrot.slane %v4963_v56, %v7809_v18  ;;  %v7260_v24 = vcombine.high %v4135_v0, %v4135_v0  ;;  %v4475_v36 = vld [vmem:[%s10016_s3] sm:$0x88] }
 0x1db   : > { %v4976_v28 = vrot.slane %v4971_v25, %v7809_v18  ;;  %v4147_v45 = vpack.i.b16 %v7257_v27, %v7257_v27  ;;  %3616 = vmatprep.subr.bf16.mxu1 %v7569_v4  ;;  %3576 = vmatpush1.bf16.msra.mxu0 %v7571_v30  ;;  %v4881_v42 = vcombine.low %v4873_v31, %v4880_v39  ;;  %v10033_v61 = vmov 0  }
 0x1dc   : > { %v4981_v11 = vcombine.low %v4952_v20, %v4960_v26  ;;  %v4154_v10 = vpack.i.b16 %v7258_v40, %v7258_v40  ;;  %3617 = vmatpush1.bf16.msra.mxu1 %v7572_v15  ;;  %v4161_v46 = vpack.i.b16 %v7259_v3, %v7259_v3  ;;  %v4168_v48 = vpack.i.b16 %v7260_v24, %v7260_v24  ;;  %v4476_v15 = vld [vmem:[%s10016_s3 + $0x8] sm:$0x88] }
 0x1dd   : > { %v4982_v59 = vcombine.low %v4968_v1, %v4976_v28  ;;  %v4152_v16 = vrot.slane %v4147_v45, %v7834_v55  ;;  %4882 = vrot.lane.b32.xlu0 %v4881_v42, %s7751_s5  ;;  %v7261_v32 = vcombine.low %v4246_v63, %v4246_v63  ;;  %v7262_v50 = vcombine.high %v4246_v63, %v4246_v63  ;;  %v3676_v1 = vld [vmem:[%s10016_s3] sm:$0x11] }
 0x1de   : > { %v4989_v54 = vrot.slane %v4981_v11, %v7812_v21  ;;  %v4159_v9 = vrot.slane %v4154_v10, %v7834_v55  ;;  %3594 = vmatmul.mubr.bf16.vlgmr.msra.gmra.mxu0 %v3368_v60  ;;  %v4166_v58 = vrot.slane %v4161_v46, %v7834_v55  ;;  %v4173_v52 = vrot.slane %v4168_v48, %v7834_v55  ;;  %v3677_v46 = vld [vmem:[%s10016_s3 + $0x8] sm:$0x11] }
 0x1df   : > { %v4996_v22 = vrot.slane %v4982_v59, %v7812_v21  ;;  %v7263_v33 = vcombine.low %v4247_v53, %v4247_v53  ;;  %3635 = vmatmul.mubr.bf16.vlgmr.msra.gmra.mxu1 %v3368_v60  ;;  %v7264_v57 = vcombine.high %v4247_v53, %v4247_v53  ;;  %v4259_v5 = vshrl.u32 %v7261_v32, 16  ;;  %6967 = vmatprep.mubr.bf16.mxu0 %v10033_v61 }
 0x1e0   : > { %v4178_v51 = vcombine.low %v4152_v16, %v4159_v9  ;;  %v4267_v12 = vshrl.u32 %v7262_v50, 16  ;;  %v4179_v19 = vcombine.low %v4166_v58, %v4173_v52  ;;  %v7265_v6 = vcombine.low %v4363_v37, %v4363_v37  ;;  %7008 = vmatprep.mubr.bf16.mxu1 %v10033_v61 }
 0x1e1   : > { %v4997_v8 = vcombine.low %v4989_v54, %v4996_v22  ;;  %v4275_v13 = vshrl.u32 %v7263_v33, 16  ;;  %v4260_v7 = vpack.i.b16 %v4259_v5, %v4259_v5  ;;  %v4283_v38 = vshrl.u32 %v7264_v57, 16 }
 0x1e2   : > { %v4186_v23 = vrot.slane %v4178_v51, %v7812_v21  ;;  %v4268_v49 = vpack.i.b16 %v4267_v12, %v4267_v12  ;;  %v4193_v47 = vrot.slane %v4179_v19, %v7812_v21  ;;  %v7266_v34 = vcombine.high %v4363_v37, %v4363_v37  ;;  %v3788_v12 = vld [vmem:[%s10016_s3] sm:$0x11] }
 0x1e3   : > { %4998 = vrot.lane.b32.xlu1 %v4997_v8, %s7752_s22  ;;  %v4276_v29 = vpack.i.b16 %v4275_v13, %v4275_v13  ;;  %v7267_v44 = vcombine.low %v4364_v41, %v4364_v41  ;;  %v4265_v62 = vrot.slane %v4260_v7, %v7834_v55  ;;  %v4284_v43 = vpack.i.b16 %v4283_v38, %v4283_v38 }
 0x1e4   : > { %v4273_v0 = vrot.slane %v4268_v49, %v7834_v55  ;;  %v7268_v14 = vcombine.high %v4364_v41, %v4364_v41  ;;  %v4194_v27 = vcombine.low %v4186_v23, %v4193_v47  ;;  %v4376_v31 = vpack.i.b16 %v7265_v6, %v7265_v6  ;;  %v3789_v49 = vld [vmem:[%s10016_s3 + $0x8] sm:$0x11] }
 0x1e5   : > { %v4281_v2 = vrot.slane %v4276_v29, %v7834_v55  ;;  %v4383_v56 = vpack.i.b16 %v7266_v34, %v7266_v34  ;;  %v4289_v25 = vrot.slane %v4284_v43, %v7834_v55  ;;  %v4390_v4 = vpack.i.b16 %v7267_v44, %v7267_v44 }
 0x1e6   : > { %v4294_v40 = vcombine.low %v4265_v62, %v4273_v0  ;;  %v4397_v30 = vpack.i.b16 %v7268_v14, %v7268_v14  ;;  %4195 = vrot.lane.b32.xlu0 %v4194_v27, %s7741_s9  ;;  %v4381_v39 = vrot.slane %v4376_v31, %v7863_v35  ;;  %v7269_v26 = vcombine.low %v4475_v36, %v4475_v36 }
 0x1e7   : > { %v4388_v20 = vrot.slane %v4383_v56, %v7863_v35  ;;  %v7270_v3 = vcombine.high %v4475_v36, %v4475_v36  ;;  %v4295_v28 = vcombine.low %v4281_v2, %v4289_v25  ;;  %v4395_v45 = vrot.slane %v4390_v4, %v7863_v35 }
 0x1e8   : > { %v4302_v24 = vrot.slane %v4294_v40, %v7812_v21  ;;  %v4402_v63 = vrot.slane %v4397_v30, %v7863_v35  ;;  %v7271_v42 = vcombine.low %v4476_v15, %v4476_v15  ;;  %v7272_v11 = vcombine.high %v4476_v15, %v4476_v15 }
 0x1e9   : > { %v4407_v60 = vcombine.low %v4381_v39, %v4388_v20  ;;  %v4488_v10 = vshrl.u32 %v7269_v26, 16  ;;  %v4309_v53 = vrot.slane %v4295_v28, %v7812_v21  ;;  %v4496_v16 = vshrl.u32 %v7270_v3, 16  ;;  %v3906_v39 = vld [vmem:[%s10016_s3 + $0x8] sm:$0x22] }
 0x1ea   : > { %v4408_v59 = vcombine.low %v4395_v45, %v4402_v63  ;;  %v7241_v48 = vcombine.low %v3676_v1, %v3676_v1  ;;  %v4504_v32 = vshrl.u32 %v7271_v42, 16  ;;  %v4512_v50 = vshrl.u32 %v7272_v11, 16 }
 0x1eb   : > { %v4415_v54 = vrot.slane %v4407_v60, %v7812_v21  ;;  %v4489_v9 = vpack.i.b16 %v4488_v10, %v4488_v10  ;;  %v4310_v37 = vcombine.low %v4302_v24, %v4309_v53  ;;  %v4497_v58 = vpack.i.b16 %v4496_v16, %v4496_v16 }
 0x1ec   : > { %v4422_v22 = vrot.slane %v4408_v59, %v7812_v21  ;;  %v7242_v52 = vcombine.high %v3676_v1, %v3676_v1  ;;  %v4505_v51 = vpack.i.b16 %v4504_v32, %v4504_v32  ;;  %v4513_v57 = vpack.i.b16 %v4512_v50, %v4512_v50  ;;  %v4017_v59 = vld [vmem:[%s10016_s3] sm:$0x22] }
 0x1ed   : > { %v4494_v33 = vrot.slane %v4489_v9, %v7863_v35  ;;  %v7243_v5 = vcombine.low %v3677_v46, %v3677_v46  ;;  %4311 = vrot.lane.b32.xlu1 %v4310_v37, %s7742_s20  ;;  %v4502_v61 = vrot.slane %v4497_v58, %v7863_v35  ;;  %v7244_v8 = vcombine.high %v3677_v46, %v3677_v46 }
 0x1ee   : > { %v4423_v41 = vcombine.low %v4415_v54, %v4422_v22  ;;  %v3689_v19 = vpack.i.b16 %v7241_v48, %v7241_v48  ;;  %v4510_v13 = vrot.slane %v4505_v51, %v7863_v35  ;;  %v4518_v6 = vrot.slane %v4513_v57, %v7863_v35  ;;  %v3905_v35 = vld [vmem:[%s10016_s3] sm:$0x22]  ;;  %v4018_v22 = vld [vmem:[%s10016_s3 + $0x8] sm:$0x22]  ;;  %v9278_v57 = vpop.permute.xlu0 %6456 }
 0x1ef   : > { %v3696_v23 = vpack.i.b16 %v7242_v52, %v7242_v52  ;;  %v3703_v7 = vpack.i.b16 %v7243_v5, %v7243_v5  ;;  %v4523_v38 = vcombine.low %v4494_v33, %v4502_v61  ;;  %v3710_v29 = vpack.i.b16 %v7244_v8, %v7244_v8 }
 0x1f0   : > { %4424 = vrot.lane.b32.xlu0 %v4423_v41, %s7737_s12  ;;  %v3694_v47 = vrot.slane %v3689_v19, %v7806_v17  ;;  %v7245_v34 = vcombine.low %v3788_v12, %v3788_v12  ;;  %v4524_v44 = vcombine.low %v4510_v13, %v4518_v6  ;;  %v7246_v43 = vcombine.high %v3788_v12, %v3788_v12 }
 0x1f1   : > { %v3701_v62 = vrot.slane %v3696_v23, %v7806_v17  ;;  %v3708_v0 = vrot.slane %v3703_v7, %v7806_v17  ;;  %v4531_v14 = vrot.slane %v4523_v38, %v7812_v21  ;;  %v3715_v36 = vrot.slane %v3710_v29, %v7806_v17 }
 0x1f2   : > { %v7247_v27 = vcombine.low %v3789_v49, %v3789_v49  ;;  %v7248_v2 = vcombine.high %v3789_v49, %v3789_v49  ;;  %v4538_v31 = vrot.slane %v4524_v44, %v7812_v21  ;;  %v3801_v25 = vshrl.u32 %v7245_v34, 16  ;;  %v6394_v49 = vld [vmem:[#allocation2 + $0xa] sm:$0x3] }
 0x1f3   : > { %v3720_v56 = vcombine.low %v3694_v47, %v3701_v62  ;;  %v3809_v40 = vshrl.u32 %v7246_v43, 16  ;;  %v3721_v4 = vcombine.low %v3708_v0, %v3715_v36  ;;  %v7249_v20 = vcombine.low %v3905_v35, %v3905_v35 }
 0x1f4   : > { %v3817_v30 = vshrl.u32 %v7247_v27, 16  ;;  %v3825_v15 = vshrl.u32 %v7248_v2, 16  ;;  %v4539_v26 = vcombine.low %v4531_v14, %v4538_v31  ;;  %v3802_v1 = vpack.i.b16 %v3801_v25, %v3801_v25  ;;  %v6506_v2 = vld [vmem:[#allocation2 + $0xa] sm:$0x3]  ;;  %v9292_v31 = vpop.permute.xlu1 %6572 }
 0x1f5   : > { %v3728_v3 = vrot.slane %v3720_v56, %v7812_v21  ;;  %v3810_v28 = vpack.i.b16 %v3809_v40, %v3809_v40  ;;  %v3735_v24 = vrot.slane %v3721_v4, %v7812_v21  ;;  %v7250_v60 = vcombine.high %v3905_v35, %v3905_v35  ;;  %v9294_v56 = vpop.permute.xlu0 %6685 }
 0x1f6   : > { %v3818_v45 = vpack.i.b16 %v3817_v30, %v3817_v30  ;;  %v3826_v63 = vpack.i.b16 %v3825_v15, %v3825_v15  ;;  %4540 = vrot.lane.b32.xlu1 %v4539_v26, %s7738_s19  ;;  %v3807_v42 = vrot.slane %v3802_v1, %v7806_v17  ;;  %v7251_v10 = vcombine.low %v3906_v39, %v3906_v39  ;;  %v6623_v30 = vld [vmem:[#allocation2 + $0xa] sm:$0x3] }
 0x1f7   : > { %v3815_v11 = vrot.slane %v3810_v28, %v7806_v17  ;;  %v7252_v53 = vcombine.high %v3906_v39, %v3906_v39  ;;  %v3736_v16 = vcombine.low %v3728_v3, %v3735_v24  ;;  %v3918_v54 = vpack.i.b16 %v7249_v20, %v7249_v20 }
 0x1f8   : > { %v3823_v46 = vrot.slane %v3818_v45, %v7806_v17  ;;  %v3831_v48 = vrot.slane %v3826_v63, %v7806_v17  ;;  %v3925_v32 = vpack.i.b16 %v7250_v60, %v7250_v60  ;;  %v3932_v50 = vpack.i.b16 %v7251_v10, %v7251_v10 }
 0x1f9   : > { %v3836_v9 = vcombine.low %v3807_v42, %v3815_v11  ;;  %v3939_v37 = vpack.i.b16 %v7252_v53, %v7252_v53  ;;  %3737 = vrot.lane.b32.xlu0 %v3736_v16, %s7745_s11  ;;  %v3923_v52 = vrot.slane %v3918_v54, %v7809_v18  ;;  %v7253_v33 = vcombine.low %v4017_v59, %v4017_v59  ;;  %v5936_v42 = vld [vmem:[#allocation2 + $0xa] sm:$0x3] }
 0x1fa   : > { %v3837_v58 = vcombine.low %v3823_v46, %v3831_v48  ;;  %v7254_v51 = vcombine.high %v4017_v59, %v4017_v59  ;;  %v3930_v5 = vrot.slane %v3925_v32, %v7809_v18  ;;  %v3937_v12 = vrot.slane %v3932_v50, %v7809_v18  ;;  %v9309_v11 = vpop.permute.xlu1 %5998  ;;  %v6165_v32 = vld [vmem:[#allocation2 + $0xa] sm:$0x3] }
 0x1fb   : > { %v3844_v17 = vrot.slane %v3836_v9, %v7812_v21  ;;  %v3944_v41 = vrot.slane %v3939_v37, %v7809_v18  ;;  %v7255_v8 = vcombine.low %v4018_v22, %v4018_v22  ;;  %v7256_v19 = vcombine.high %v4018_v22, %v4018_v22  ;;  %v6048_v9 = vld [vmem:[#allocation2 + $0xa] sm:$0x3] }
 0x1fc   : > { %v3851_v61 = vrot.slane %v3837_v58, %v7812_v21  ;;  %v4030_v13 = vshrl.u32 %v7253_v33, 16  ;;  %v3949_v6 = vcombine.low %v3923_v52, %v3930_v5  ;;  %v4038_v7 = vshrl.u32 %v7254_v51, 16  ;;  %v6277_v58 = vld [vmem:[#allocation2 + $0xa] sm:$0x3] }
 0x1fd   : > { %v3950_v23 = vcombine.low %v3937_v12, %v3944_v41  ;;  %v6458_v38 = vrot.slane %v9278_v57, 6  ;;  %v4046_v34 = vshrl.u32 %v7255_v8, 16  ;;  %v4054_v44 = vshrl.u32 %v7256_v19, 16  ;;  %v5478_v41 = vld [vmem:[#allocation2 + $0xa] sm:$0x3] }
 0x1fe   : > { %v3852_v47 = vcombine.low %v3844_v17, %v3851_v61  ;;  %v4031_v29 = vpack.i.b16 %v4030_v13, %v4030_v13  ;;  %v3957_v62 = vrot.slane %v3949_v6, %v7812_v21  ;;  %v4039_v43 = vpack.i.b16 %v4038_v7, %v4038_v7 }
 0x1ff   : > { %v3964_v0 = vrot.slane %v3950_v23, %v7812_v21  ;;  %v4047_v14 = vpack.i.b16 %v4046_v34, %v4046_v34  ;;  %v4055_v36 = vpack.i.b16 %v4054_v44, %v4054_v44  ;;  %v6463_v27 = vmul.bf16 %v6458_v38, %v6394_v49 }
 0x200   : > { %3853 = vrot.lane.b32.xlu1 %v3852_v47, %s7746_s25  ;;  %v4036_v35 = vrot.slane %v4031_v29, %v7809_v18  ;;  %v4044_v40 = vrot.slane %v4039_v43, %v7809_v18  ;;  %v6574_v4 = vrot.slane %v9292_v31, 6  ;;  %v6687_v15 = vrot.slane %v9294_v56, 6  ;;  %v5590_v29 = vld [vmem:[#allocation2 + $0xa] sm:$0x3] }
 0x201   : > { %v3965_v25 = vcombine.low %v3957_v62, %v3964_v0  ;;  %v4052_v39 = vrot.slane %v4047_v14, %v7809_v18  ;;  %v4060_v20 = vrot.slane %v4055_v36, %v7809_v18  ;;  %v6487_v1 = vrot.slane %v6463_v27, %v7812_v21  ;;  %v5707_v43 = vld [vmem:[#allocation2 + $0xa] sm:$0x3] }
 0x202   : > { %v4065_v26 = vcombine.low %v4036_v35, %v4044_v40  ;;  %v6579_v3 = vmul.bf16 %v6574_v4, %v6506_v2  ;;  %v6692_v24 = vmul.bf16 %v6687_v15, %v6623_v30  ;;  %v6000_v53 = vrot.slane %v9309_v11, 6  ;;  %v5819_v30 = vld [vmem:[#allocation2 + $0xa] sm:$0x3] }
 0x203   : > { %3966 = vrot.lane.b32.xlu0 %v3965_v25, %s7739_s24  ;;  %v4066_v28 = vcombine.low %v4052_v39, %v4060_v20 }
 0x204   : > { %v4073_v45 = vrot.slane %v4065_v26, %v7812_v21  ;;  %v6597_v60 = vcombine.low %v6579_v3, %v6579_v3  ;;  %v6716_v18 = vrot.slane %v6692_v24, %v7812_v21  ;;  %v6005_v59 = vmul.bf16 %v6000_v53, %v5936_v42  ;;  %v9319_v46 = vpop.permute.xlu0 %6114  ;;  %v5249_v24 = vld [vmem:[#allocation2 + $0xa] sm:$0x3] }
 0x205   : > { %v4080_v63 = vrot.slane %v4066_v28, %v7812_v21  ;;  %v6116_v48 = vrot.slane %v9319_v46, 6 }
 0x206   : > { %v6604_v16 = vrot.slane %v6597_v60, %v7812_v21  ;;  %v6029_v54 = vrot.slane %v6005_v59, %v7812_v21  ;;  %v9324_v50 = vpop.permute.xlu1 %6227  ;;  %v5361_v59 = vld [vmem:[#allocation2 + $0xa] sm:$0x3] }
 0x207   : > { %6492 = vrot.lane.b32.xlu0 %v6487_v1, %s7739_s24  ;;  %v4081_v10 = vcombine.low %v4073_v45, %v4080_v63  ;;  %v6121_v37 = vmul.bf16 %v6116_v48, %v6048_v9  ;;  %v6229_v22 = vrot.slane %v9324_v50, 6 }
 0x209   : > { %4082 = vrot.lane.b32.xlu1 %v4081_v10, %s7740_s29  ;;  %v6234_v51 = vmul.bf16 %v6229_v22, %v6165_v32  ;;  %v6139_v12 = vcombine.low %v6121_v37, %v6121_v37 }
 0x20b   : > { %6721 = vrot.lane.b32.xlu0 %v6716_v18, %s7745_s11  ;;  %v6258_v13 = vrot.slane %v6234_v51, %v7812_v21  ;;  %v6146_v7 = vrot.slane %v6139_v12, %v7812_v21 }
 0x20d   : > { %6609 = vrot.lane.b32.xlu1 %v6604_v16, %s7746_s25 }
 0x20f   : > { %6151 = vrot.lane.b32.xlu0 %v6146_v7, %s7742_s20 }
 0x211   : > { %v6344_v52 = vpop.permute.xlu0 %6343  ;;  %6034 = vrot.lane.b32.xlu1 %v6029_v54, %s7737_s12 }
 0x212   : > { %v6345_v33 = vrot.slane %v6344_v52, 6 }
 0x214   : > { %v9333_v17 = vsel %vm749_vm10, %v6345_v33, %v6344_v52  ;;  %v6350_v5 = vmul.bf16 %v6345_v33, %v6277_v58  ;;  %v5161_v52 = vld [vmem:[%s10016_s3 + $0x10] sm:$0x44]  ;;  %v5162_v33 = vld [vmem:[%s10016_s3 + $0x18] sm:$0x44] }
 0x215   : > { %6263 = vrot.lane.b32.xlu1 %v6258_v13, %s7741_s9  ;;  %v7293_v51 = vcombine.low %v5161_v52, %v5161_v52  ;;  %v7295_v12 = vcombine.low %v5162_v33, %v5162_v33 }
 0x216   : > { %v5541_v61 = vpop.permute.xlu1 %5540  ;;  %v6368_v8 = vcombine.low %v6350_v5, %v6350_v5  ;;  %v7294_v5 = vcombine.high %v5161_v52, %v5161_v52 }
 0x217   : > { %v5542_v19 = vrot.slane %v5541_v61, 6 }
 0x218   : > { %v6375_v49 = vrot.slane %v6368_v8, %v7812_v21  ;;  %v5182_v8 = vshrl.u32 %v7294_v5, 16 }
 0x219   : > { %v9337_v6 = vsel %vm10034_vm15, %v5542_v19, %v5541_v61  ;;  %v5547_v23 = vmul.bf16 %v5542_v19, %v5478_v41  ;;  %v7296_v41 = vcombine.high %v5162_v33, %v5162_v33  ;;  %v5174_v61 = vshrl.u32 %v7293_v51, 16 }
 0x21a   : > { %6380 = vrot.lane.b32.xlu0 %v6375_v49, %s7740_s29  ;;  %v5190_v19 = vshrl.u32 %v7295_v12, 16  ;;  %v5183_v7 = vpack.i.b16 %v5182_v8, %v5182_v8  ;;  %v6117_v33 = vsel %vm708_vm8, %v6116_v48, %v9319_v46  ;;  %v6459_v46 = vsel %vm630_vm2, %v6458_v38, %v9278_v57 }
 0x21b   : > { %v5571_v47 = vrot.slane %v5547_v23, %v7812_v21  ;;  %v5198_v13 = vshrl.u32 %v7296_v41, 16  ;;  %v5175_v23 = vpack.i.b16 %v5174_v61, %v5174_v61  ;;  %v6575_v41 = vsel %vm516_vm9, %v6574_v4, %v9292_v31 }
 0x21c   : > { %v5191_v49 = vpack.i.b16 %v5190_v19, %v5190_v19  ;;  %v6688_v38 = vsel %vm397_vm4, %v6687_v15, %v9294_v56  ;;  %vm10035_vm15 = vcmask 982016  }
 0x21d   : > { %5576 = vrot.lane.b32.xlu1 %v5571_v47, %s7751_s5  ;;  %v5199_v47 = vpack.i.b16 %v5198_v13, %v5198_v13 }
 0x21e   : > { %v5657_v34 = vpop.permute.xlu0 %5656 }
 0x21f   : > { %v5658_v44 = vrot.slane %v5657_v34, 6 }
 0x221   : > { %v9347_v62 = vsel %vm1439_vm12, %v5658_v44, %v5657_v34  ;;  %v5663_v0 = vmul.bf16 %v5658_v44, %v5590_v29  ;;  %v5180_v29 = vrot.slane %v5175_v23, %v7834_v55  ;;  %v5188_v34 = vrot.slane %v5183_v7, %v7834_v55 }
 0x222   : > { %v5770_v35 = vpop.permute.xlu1 %5769  ;;  %v5196_v44 = vrot.slane %v5191_v49, %v7834_v55 }
 0x223   : > { %v5681_v14 = vcombine.low %v5663_v0, %v5663_v0  ;;  %v5771_v36 = vrot.slane %v5770_v35, 6  ;;  %v5204_v0 = vrot.slane %v5199_v47, %v7834_v55 }
 0x225   : > { %v5688_v27 = vrot.slane %v5681_v14, %v7812_v21  ;;  %v9351_v2 = vsel %vm356_vm5, %v5771_v36, %v5770_v35  ;;  %v5776_v25 = vmul.bf16 %v5771_v36, %v5707_v43  ;;  %v5209_v43 = vcombine.low %v5180_v29, %v5188_v34 }
 0x226   : > { %v5210_v35 = vcombine.low %v5196_v44, %v5204_v0 }
 0x227   : > { %v5800_v40 = vrot.slane %v5776_v25, %v7812_v21  ;;  %5693 = vrot.lane.b32.xlu0 %v5688_v27, %s7750_s18 }
 0x229   : > { %5805 = vrot.lane.b32.xlu1 %v5800_v40, %s7736_s7 }
 0x22c   : > { %v5886_v39 = vpop.permute.xlu0 %5885 }
 0x22d   : > { %v5887_v20 = vrot.slane %v5886_v39, 6 }
 0x22f   : > { %v9357_v26 = vsel %vm475_vm13, %v5887_v20, %v5886_v39  ;;  %v5892_v3 = vmul.bf16 %v5887_v20, %v5819_v30  ;;  %v9361_v63 = vpop.permute.xlu1 %5111  ;;  %v5217_v39 = vrot.slane %v5209_v43, %v7812_v21  ;;  %v5224_v20 = vrot.slane %v5210_v35, %v7812_v21 }
 0x230   : > { %v5113_v34 = vrot.slane %v9361_v63, 6 }
 0x231   : > { %v5910_v1 = vcombine.low %v5892_v3, %v5892_v3 }
 0x233   : > { %v5917_v28 = vrot.slane %v5910_v1, %v7812_v21 }
 0x235   : > { %5922 = vrot.lane.b32.xlu0 %v5917_v28, %s7738_s19 }
 0x237   : > { %v5312_v45 = vpop.permute.xlu0 %5311 }
 0x238   : > { %v5313_v60 = vrot.slane %v5312_v45, 6 }
 0x23a   : > { %v9364_v42 = vsel %vm1786_vm6, %v5313_v60, %v5312_v45  ;;  %v5318_v18 = vmul.bf16 %v5313_v60, %v5249_v24 }
 0x23c   : > { %v5342_v10 = vrot.slane %v5318_v18, %v7812_v21 }
 0x23e   : > { %v5428_v16 = vpop.permute.xlu1 %5427  ;;  %5347 = vrot.lane.b32.xlu0 %v5342_v10, %s7747_s28 }
 0x23f   : > { %v5429_v54 = vrot.slane %v5428_v16, 6 }
 0x241   : > { %v9369_v9 = vsel %vm10031_vm14, %v5429_v54, %v5428_v16  ;;  %v5434_v32 = vmul.bf16 %v5429_v54, %v5361_v59  ;;  %v5225_v59 = vcombine.low %v5217_v39, %v5224_v20  ;;  %vm10036_vm14 = vcmask 990208  }
 0x243   : > { %v5452_v37 = vcombine.low %v5434_v32, %v5434_v32  ;;  %v4654_v15 = vpop.permute.xlu0 %4653 }
 0x244   : > { %v4655_v23 = vrot.slane %v4654_v15, 6 }
 0x245   : > { %v5459_v58 = vrot.slane %v5452_v37, %v7812_v21  ;;  %v6001_v37 = vsel %vm590_vm0, %v6000_v53, %v9309_v11  ;;  %v6230_v53 = vsel %vm823_vm1, %v6229_v22, %v9324_v50 }
 0x246   : > { %v4656_v47 = vsel %vm397_vm4, %v4655_v23, %v4654_v15 }
 0x247   : > { %5464 = vrot.lane.b32.xlu1 %v5459_v58, %s7752_s22 }
 0x24b   : > { %v9480_v44 = vpop.permute.xlu1 %4769 }
 0x24c   : > { %v4771_v35 = vrot.slane %v9480_v44, 6 }
 0x24e   : > { %v4772_v20 = vsel %vm1398_vm11, %v4771_v35, %v9480_v44 }
 0x29e   : > { %v3595_v14 = vpop.f32.mrf.mxu0 }
 0x29f   : > { %v3636_v36 = vpop.f32.mrf.mxu1  ;;  %v3643_v25 = vmax.f32 %v3595_v14, 0.0 }
 0x2a0   : > { %v3597_v27 = vpop.f32.mrf.mxu0  ;;  %v3645_v3 = vmax.f32 %v3636_v36, 0.0 }
 0x2a1   : > { %v3644_v40 = vmax.f32 %v3597_v27, 0.0  ;;  %v3638_v30 = vpop.f32.mrf.mxu1 }
 0x2a2   : > { %v3646_v1 = vmax.f32 %v3638_v30, 0.0  ;;  %v3599_v28 = vpop.f32.mrf.mxu0 }
 0x2a3   : > { %v7239_v24 = vpack.c.bf16 %v3644_v40, %v3643_v25  ;;  %v3640_v45 = vpop.f32.mrf.mxu1  ;;  %v4883_v25 = vpop.permute.xlu0 %4882 }
 0x2a4   : > { %v7240_v60 = vpack.c.bf16 %v3646_v1, %v3645_v3  ;;  %v3600_v18 = vpop.f32.mrf.mxu0 }
 0x2a5   : > { %v3663_v55 = vrot.slane %v7239_v24, %v7812_v21  ;;  %v3641_v10 = vpop.f32.mrf.mxu1 }
 0x2a6   : > { %v3670_v16 = vrot.slane %v7240_v60, %v7812_v21 }
 0x2a8   : > { %v3671_v54 = vcombine.low %v3663_v55, %v3670_v16  ;;  %v9517_v55 = vpop.permute.xlu1 %4998 }
 0x2a9   : > { %v5000_v16 = vrot.slane %v9517_v55, 6 }
 0x2aa   : > { %3673 = vst [vmem:[#allocation2 + $0x2] sm:$0xff] %v3671_v54  ;;  %v5227_v32 = vmul.bf16 %v5225_v59, %v3671_v54  ;;  %v9391_v58 = vmul.bf16 %v6001_v37, %v3671_v54  ;;  %v9397_v51 = vmul.bf16 %v6117_v33, %v3671_v54  ;;  %v9412_v48 = vmul.bf16 %v6230_v53, %v3671_v54 }
 0x2ab   : > { %v9415_v12 = vmul.bf16 %v6459_v46, %v3671_v54  ;;  %v9422_v61 = vmul.bf16 %v9333_v17, %v3671_v54  ;;  %v9426_v22 = vmul.bf16 %v6575_v41, %v3671_v54  ;;  %v9437_v31 = vmul.bf16 %v9337_v6, %v3671_v54 }
 0x2ac   : > { %7298 = vst.sshfl [vmem:[#allocation3 + $0x68] sm:$0xf0 pattern:$0x76325410] %v5227_v32  ;;  %v5229_v52 = vcombine.low %v5227_v32, %v5227_v32  ;;  %v6015_v5 = vrot.slane %v9391_v58, %v7812_v21  ;;  %v6138_v11 = vrot.slane %v9397_v51, %v7812_v21  ;;  %v6244_v50 = vrot.slane %v9412_v48, %v7812_v21 }
 0x2ad   : > { %v6473_v57 = vrot.slane %v9415_v12, %v7812_v21  ;;  %v6367_v4 = vrot.slane %v9422_v61, %v7812_v21  ;;  %v9441_v17 = vmul.bf16 %v6688_v38, %v3671_v54  ;;  %v6596_v8 = vrot.slane %v9426_v22, %v7812_v21 }
 0x2ae   : > { %7297 = vst.sshfl [vmem:[#allocation3 + $0x60] sm:$0xf0 pattern:$0x76325410] %v5229_v52  ;;  %6030 = vrot.lane.b32.xlu1 %v6015_v5, %s7737_s12  ;;  %v9448_v19 = vmul.bf16 %v9347_v62, %v3671_v54  ;;  %v5557_v56 = vrot.slane %v9437_v31, %v7812_v21  ;;  %v9453_v6 = vmul.bf16 %v9364_v42, %v3671_v54  ;;  %v4196_v52 = vpop.permute.xlu0 %4195 }
 0x2af   : > { %6488 = vrot.lane.b32.xlu0 %v6473_v57, %s7739_s24  ;;  %v6702_v13 = vrot.slane %v9441_v17, %v7812_v21  ;;  %v9460_v7 = vmul.bf16 %v9351_v2, %v3671_v54  ;;  %v9465_v49 = vmul.bf16 %v9369_v9, %v3671_v54  ;;  %v9476_v2 = vmul.bf16 %v9357_v26, %v3671_v54 }
 0x2b0   : > { %v5680_v62 = vrot.slane %v9448_v19, %v7812_v21  ;;  %v5328_v42 = vrot.slane %v9453_v6, %v7812_v21  ;;  %v5114_v26 = vsel %vm1746_vm7, %v5113_v34, %v9361_v63  ;;  %v4884_v63 = vrot.slane %v4883_v25, 6 }
 0x2b1   : > { %v9470_v29 = vld [vmem:[#allocation2] sm:$0xff]  ;;  %v5786_v9 = vrot.slane %v9460_v7, %v7812_v21  ;;  %v5451_v43 = vrot.slane %v9465_v49, %v7812_v21  ;;  %v4591_v14 = vld [vmem:[#allocation2 + $0x8] sm:$0x3]  ;;  %v5909_v27 = vrot.slane %v9476_v2, %v7812_v21  ;;  %v6466_v18 = vcombine.high %v9415_v12, %v9415_v12 }
 0x2b2   : > { %6149 = vrot.lane.b32.xlu1 %v6138_v11, %s7742_s20  ;;  %v9483_v0 = vmul.bf16 %v4656_v47, %v9470_v29  ;;  %v9493_v36 = vmul.bf16 %v5114_v26, %v9470_v29  ;;  %v5049_v40 = vld [vmem:[#allocation2 + $0x8] sm:$0x3]  ;;  %v4660_v30 = vmul.bf16 %v4655_v23, %v4591_v14  ;;  %v9508_v28 = vmul.bf16 %v4772_v20, %v9470_v29  ;;  %v4425_v23 = vpop.permute.xlu0 %4424  ;;  %v7680_v14 = vld [vmem:[#allocation3 + $0xe8] ss:$16 sps:$4 sm:$0xff]  }
 0x2b3   : > { %6607 = vrot.lane.b32.xlu0 %v6596_v8, %s7746_s25  ;;  %v5118_v3 = vmul.bf16 %v5113_v34, %v5049_v40  ;;  %v4885_v45 = vsel %vm10035_vm15, %v4884_v63, %v4883_v25  ;;  %v4820_v54 = vld [vmem:[#allocation2 + $0x8] sm:$0x3]  ;;  %v6582_v32 = vcombine.low %v9426_v22, %v9426_v22  ;;  %v6480_v37 = vrot.slane %v6466_v18, %v7812_v21  ;;  %vm10037_vm15 = vmmov %vm10036_vm14 }
 0x2b4   : > { %v4670_v39 = vrot.slane %v9483_v0, %v7812_v21  ;;  %v5128_v1 = vrot.slane %v9493_v36, %v7812_v21  ;;  %v4684_v24 = vrot.slane %v4660_v30, %v7812_v21  ;;  %v9520_v10 = vmul.bf16 %v4885_v45, %v9470_v29  ;;  %v4703_v25 = vld [vmem:[#allocation2 + $0x8] sm:$0x3] }
 0x2b5   : > { %v5142_v60 = vrot.slane %v5118_v3, %v7812_v21  ;;  %v4793_v59 = vrot.slane %v9508_v28, %v7812_v21  ;;  %v4889_v33 = vmul.bf16 %v4884_v63, %v4820_v54  ;;  %v5001_v11 = vsel %vm10036_vm14, %v5000_v16, %v9517_v55  ;;  %v4362_v45 = vld [vmem:[#allocation2 + $0x8] sm:$0x3] }
 0x2b6   : > { %6259 = vrot.lane.b32.xlu1 %v6244_v50, %s7741_s9  ;;  %v4899_v5 = vrot.slane %v9520_v10, %v7812_v21  ;;  %v4197_v53 = vrot.slane %v4196_v52, 6  ;;  %v6695_v46 = vcombine.high %v9441_v17, %v9441_v17  ;;  %v6589_v12 = vrot.slane %v6582_v32, %v7812_v21  ;;  %v9554_v17 = vpop.permute.xlu1 %4311 }
 0x2b7   : > { %6717 = vrot.lane.b32.xlu0 %v6702_v13, %s7745_s11  ;;  %v9542_v41 = vmul.bf16 %v5001_v11, %v9470_v29  ;;  %v4913_v50 = vrot.slane %v4889_v33, %v7812_v21  ;;  %v5321_v57 = vcombine.high %v9453_v6, %v9453_v6  ;;  %v4313_v15 = vrot.slane %v9554_v17, 6  ;;  %v4932_v33 = vld [vmem:[#allocation2 + $0x8] sm:$0x3] }
 0x2b8   : > { %v4198_v22 = vsel %vm823_vm1, %v4197_v53, %v4196_v52  ;;  %v6709_v38 = vrot.slane %v6695_v46, %v7812_v21  ;;  %v5437_v6 = vcombine.low %v9465_v49, %v9465_v49  ;;  %v4426_v47 = vrot.slane %v4425_v23, 6  ;;  %v7682_v49 = vld [vmem:[#allocation3 + $0xec] ss:$16 sps:$4 sm:$0xff]  }
 0x2b9   : > { %v5022_v8 = vrot.slane %v9542_v41, %v7812_v21  ;;  %v5335_v13 = vrot.slane %v5321_v57, %v7812_v21  ;;  %v4314_v34 = vsel %vm749_vm10, %v4313_v15, %v9554_v17  ;;  %v4663_v26 = vcombine.high %v9483_v0, %v9483_v0  ;;  %6976 = vmatprep.subr.bf16.mxu1 %v7682_v49 }
 0x2ba   : > { %6378 = vrot.lane.b32.xlu1 %v6367_v4, %s7740_s29  ;;  %v9552_v4 = vmul.bf16 %v9470_v29, %v4198_v22  ;;  %v9577_v30 = vmul.bf16 %v9470_v29, %v4314_v34  ;;  %6977 = vmatpush1.bf16.msra.mxu1 %v7680_v14  ;;  %v4776_v0 = vmul.bf16 %v4771_v35, %v4703_v25  ;;  %v4245_v34 = vld [vmem:[#allocation2 + $0x8] sm:$0x3] }
 0x2bb   : > { %5343 = vrot.lane.b32.xlu0 %v5328_v42, %s7747_s28  ;;  %v4779_v20 = vcombine.low %v9508_v28, %v9508_v28  ;;  %v4677_v63 = vrot.slane %v4663_v26, %v7812_v21  ;;  %v4431_v28 = vmul.bf16 %v4426_v47, %v4362_v45  ;;  %v6124_v17 = vcombine.low %v9397_v51, %v9397_v51  ;;  %v4474_v45 = vld [vmem:[#allocation2 + $0x8] sm:$0x3] }
 0x2bc   : > { %v4212_v42 = vrot.slane %v9552_v4, %v7812_v21  ;;  %v4335_v3 = vrot.slane %v9577_v30, %v7812_v21  ;;  %v4794_v44 = vcombine.low %v4776_v0, %v4776_v0  ;;  %v4321_v26 = vcombine.low %v9577_v30, %v9577_v30 }
 0x2bd   : > { %v4786_v35 = vrot.slane %v4779_v20, %v7812_v21  ;;  %v6131_v51 = vrot.slane %v6124_v17, %v7812_v21  ;;  %v3904_v17 = vld [vmem:[#allocation2 + $0x8] sm:$0x3] }
 0x2be   : > { %5572 = vrot.lane.b32.xlu1 %v5557_v56, %s7751_s5  ;;  %v4133_v56 = vld [vmem:[#allocation2 + $0x8] sm:$0x3]  ;;  %v4801_v52 = vrot.slane %v4794_v44, %v7812_v21 }
 0x2bf   : > { %5462 = vrot.lane.b32.xlu0 %v5451_v43, %s7752_s22  ;;  %v7679_v43 = vld [vmem:[#allocation3 + $0xe4] ss:$16 sps:$4 sm:$0xff]  }
 0x2c0   : > { %6935 = vmatprep.subr.bf16.mxu0 %v7679_v43 }
 0x2c2   : > { %5691 = vrot.lane.b32.xlu1 %v5680_v62, %s7750_s18  ;;  %v4202_v62 = vmul.bf16 %v4197_v53, %v4133_v56 }
 0x2c3   : > { %4685 = vrot.lane.b32.xlu0 %v4670_v39, %s7745_s11  ;;  %v4427_v39 = vsel %vm630_vm2, %v4426_v47, %v4425_v23 }
 0x2c4   : > { %v4226_v40 = vrot.slane %v4202_v62, %v7812_v21  ;;  %v4205_v62 = vcombine.high %v9552_v4, %v9552_v4  ;;  %v4318_v4 = vmul.bf16 %v4313_v15, %v4245_v34 }
 0x2c6   : > { %5801 = vrot.lane.b32.xlu1 %v5786_v9, %s7736_s7  ;;  %v7677_v9 = vld [vmem:[#allocation3 + $0xe0] ss:$16 sps:$4 sm:$0xff]   ;;  %v4219_v49 = vrot.slane %v4205_v62, %v7812_v21  ;;  %v4336_v0 = vcombine.low %v4318_v4, %v4318_v4 }
 0x2c7   : > { %4689 = vrot.lane.b32.xlu0 %v4684_v24, %s7745_s11  ;;  %6936 = vmatpush1.bf16.msra.mxu0 %v7677_v9  ;;  %v9592_v24 = vpop.permute.xlu1 %4540 }
 0x2ca   : > { %5920 = vrot.lane.b32.xlu1 %v5909_v27, %s7738_s19  ;;  %v5444_v27 = vrot.slane %v5437_v6, %v7812_v21 }
 0x2cb   : > { %4804 = vrot.lane.b32.xlu0 %v4793_v59, %s7744_s30  ;;  %v3738_v59 = vpop.permute.xlu0 %3737  ;;  %v9614_v46 = vpop.permute.xlu1 %3853 }
 0x2cc   : > { %v3739_v32 = vrot.slane %v3738_v59, 6 }
 0x2ce   : > { %5143 = vrot.lane.b32.xlu1 %v5128_v1, %s7748_s13  ;;  %v9590_v1 = vmul.bf16 %v9470_v29, %v4427_v39  ;;  %v3740_v53 = vsel %vm356_vm5, %v3739_v32, %v3738_v59  ;;  %v4328_v39 = vrot.slane %v4321_v26, %v7812_v21 }
 0x2cf   : > { %4914 = vrot.lane.b32.xlu0 %v4899_v5, %s7743_s23  ;;  %v4455_v5 = vrot.slane %v4431_v28, %v7812_v21  ;;  %v9626_v57 = vmul.bf16 %v9470_v29, %v3740_v53  ;;  %v9632_v56 = vpop.permute.xlu1 %4082  ;;  %v9641_v23 = vpop.permute.xlu0 %3966 }
 0x2d0   : > { %v4441_v18 = vrot.slane %v9590_v1, %v7812_v21  ;;  %v4434_v20 = vcombine.high %v9590_v1, %v9590_v1  ;;  %v3968_v53 = vrot.slane %v9641_v23, 6 }
 0x2d1   : > { %v3754_v6 = vrot.slane %v9626_v57, %v7812_v21 }
 0x2d2   : > { %5147 = vrot.lane.b32.xlu1 %v5142_v60, %s7748_s13  ;;  %v4542_v60 = vrot.slane %v9592_v24, 6 }
 0x2d3   : > { %4918 = vrot.lane.b32.xlu0 %v4913_v50, %s7743_s23  ;;  %v9647_v47 = vpop.permute.xlu1 %6609  ;;  %v9655_v14 = vpop.permute.xlu0 %6492 }
 0x2d4   : > { %v4543_v54 = vsel %vm516_vm9, %v4542_v60, %v9592_v24  ;;  %v4547_v28 = vmul.bf16 %v4542_v60, %v4474_v45  ;;  %v5550_v24 = vcombine.high %v9437_v31, %v9437_v31  ;;  %v3973_v45 = vmul.bf16 %v3968_v53, %v3904_v17 }
 0x2d5   : > { %v9611_v11 = vmul.bf16 %v9470_v29, %v4543_v54 }
 0x2d6   : > { %6490 = vrot.lane.b32.xlu1 %v6480_v37, %s7739_s24  ;;  %v4892_v37 = vcombine.high %v9520_v10, %v9520_v10  ;;  %v5008_v10 = vcombine.low %v9542_v41, %v9542_v41  ;;  %v5564_v31 = vrot.slane %v5550_v24, %v7812_v21 }
 0x2d7   : > { %5033 = vrot.lane.b32.xlu0 %v5022_v8, %s7749_s10  ;;  %v4564_v22 = vrot.slane %v9611_v11, %v7812_v21  ;;  %v3855_v8 = vrot.slane %v9614_v46, 6  ;;  %v9674_v30 = vpop.permute.xlu0 %6721  ;;  %v4550_v1 = vcombine.low %v9611_v11, %v9611_v11  ;;  %v3787_v11 = vld [vmem:[#allocation2 + $0x8] sm:$0x3] }
 0x2d8   : > { %v4906_v50 = vrot.slane %v4892_v37, %v7812_v21 }
 0x2d9   : > { %v4557_v54 = vrot.slane %v4550_v1, %v7812_v21  ;;  %v3997_v1 = vrot.slane %v3973_v45, %v7812_v21 }
 0x2da   : > { %6605 = vrot.lane.b32.xlu1 %v6589_v12, %s7746_s25  ;;  %v5005_v12 = vmul.bf16 %v5000_v16, %v4932_v33  ;;  %v5015_v16 = vrot.slane %v5008_v10, %v7812_v21 }
 0x2db   : > { %4227 = vrot.lane.b32.xlu0 %v4212_v42, %s7741_s9  ;;  %v9688_v44 = vpop.permute.xlu0 %6151 }
 0x2dc   : > { %v5023_v55 = vcombine.low %v5005_v12, %v5005_v12  ;;  %v6155_v4 = vrot.slane %v9688_v44, 4 }
 0x2de   : > { %6719 = vrot.lane.b32.xlu1 %v6709_v38, %s7745_s11  ;;  %v3675_v38 = vld [vmem:[#allocation2 + $0x8] sm:$0x3]  ;;  %v5030_v42 = vrot.slane %v5023_v55, %v7812_v21  ;;  %v3969_v55 = vsel %vm590_vm0, %v3968_v53, %v9641_v23 }
 0x2df   : > { %4231 = vrot.lane.b32.xlu0 %v4226_v40, %s7741_s9  ;;  %v3744_v41 = vmul.bf16 %v3739_v32, %v3675_v38  ;;  %v9667_v40 = vpop.permute.xlu1 %6034  ;;  %v4565_v32 = vcombine.low %v4547_v28, %v4547_v28  ;;  %v9706_v37 = vpop.permute.xlu0 %6380 }
 0x2e1   : > { %v3768_v9 = vrot.slane %v3744_v41, %v7812_v21  ;;  %v3972_v41 = vmul.bf16 %v9470_v29, %v3969_v55 }
 0x2e2   : > { %5345 = vrot.lane.b32.xlu1 %v5335_v13, %s7747_s28  ;;  %v3856_v13 = vsel %vm475_vm13, %v3855_v8, %v9614_v46 }
 0x2e3   : > { %4346 = vrot.lane.b32.xlu0 %v4335_v3, %s7740_s29  ;;  %v9651_v43 = vmul.bf16 %v9470_v29, %v3856_v13  ;;  %v6237_v3 = vcombine.high %v9412_v48, %v9412_v48  ;;  %v6353_v48 = vcombine.low %v9422_v61, %v9422_v61  ;;  %v4572_v61 = vrot.slane %v4565_v32, %v7812_v21  ;;  %v9721_v12 = vpop.permute.xlu0 %5693 }
 0x2e4   : > { %v3976_v34 = vcombine.high %v3972_v41, %v3972_v41  ;;  %v6613_v32 = vrot.slane %v9647_v47, 4  ;;  %v5697_v53 = vrot.slane %v9721_v12, 4 }
 0x2e5   : > { %v3877_v25 = vrot.slane %v9651_v43, %v7812_v21  ;;  %v6360_v60 = vrot.slane %v6353_v48, %v7812_v21  ;;  %v6384_v48 = vrot.slane %v9706_v37, 4 }
 0x2e6   : > { %5460 = vrot.lane.b32.xlu1 %v5444_v27, %s7752_s22  ;;  %v6008_v27 = vcombine.high %v9391_v58, %v9391_v58  ;;  %v4343_v58 = vrot.slane %v4336_v0, %v7812_v21 }
 0x2e7   : > { %4456 = vrot.lane.b32.xlu0 %v4441_v18, %s7739_s24  ;;  %v6251_v18 = vrot.slane %v6237_v3, %v7812_v21  ;;  %v9745_v23 = vpop.permute.xlu0 %5922 }
 0x2e8   : > { %v6022_v15 = vrot.slane %v6008_v27, %v7812_v21 }
 0x2ea   : > { %4687 = vrot.lane.b32.xlu1 %v4677_v63, %s7745_s11  ;;  %v9681_v63 = vpop.permute.xlu1 %6263 }
 0x2eb   : > { %4460 = vrot.lane.b32.xlu0 %v4455_v5, %s7739_s24  ;;  %v5666_v5 = vcombine.low %v9448_v19, %v9448_v19  ;;  %v9761_v26 = vpop.permute.xlu0 %5347 }
 0x2ed   : > { %v5673_v38 = vrot.slane %v5666_v5, %v7812_v21 }
 0x2ee   : > { %4802 = vrot.lane.b32.xlu1 %v4786_v35, %s7744_s30  ;;  %v4448_v35 = vrot.slane %v4434_v20, %v7812_v21  ;;  %v9699_v59 = vpop.permute.xlu1 %5576 }
 0x2ef   : > { %4575 = vrot.lane.b32.xlu0 %v4564_v22, %s7746_s25  ;;  %v3863_v22 = vcombine.low %v9651_v43, %v9651_v43 }
 0x2f1   : > { %v3870_v46 = vrot.slane %v3863_v22, %v7812_v21 }
 0x2f2   : > { %4806 = vrot.lane.b32.xlu1 %v4801_v52, %s7744_s30  ;;  %v3747_v52 = vcombine.high %v9626_v57, %v9626_v57  ;;  %v9713_v33 = vpop.permute.xlu1 %5805  ;;  %v5779_v57 = vcombine.high %v9460_v7, %v9460_v7 }
 0x2f3   : > { %3769 = vrot.lane.b32.xlu0 %v3754_v6, %s7736_s7  ;;  %v5895_v6 = vcombine.low %v9476_v2, %v9476_v2  ;;  %v5121_v2 = vcombine.high %v9493_v36, %v9493_v36 }
 0x2f4   : > { %v3761_v10 = vrot.slane %v3747_v52, %v7812_v21  ;;  %v5793_v7 = vrot.slane %v5779_v57, %v7812_v21 }
 0x2f5   : > { %v5902_v43 = vrot.slane %v5895_v6, %v7812_v21  ;;  %v5135_v36 = vrot.slane %v5121_v2, %v7812_v21 }
 0x2f6   : > { %4916 = vrot.lane.b32.xlu1 %v4906_v50, %s7743_s23  ;;  %v3860_v50 = vmul.bf16 %v3855_v8, %v3787_v11  ;;  %v9728_v19 = vpop.permute.xlu1 %5464 }
 0x2f7   : > { %3773 = vrot.lane.b32.xlu0 %v3768_v9, %s7736_s7  ;;  %v5468_v55 = vrot.slane %v9728_v19, 4 }
 0x2f8   : > { %v3878_v8 = vcombine.low %v3860_v50, %v3860_v50 }
 0x2fa   : > { %5031 = vrot.lane.b32.xlu1 %v5015_v16, %s7749_s10  ;;  %v4084_v16 = vrot.slane %v9632_v56, 6 }
 0x2fb   : > { %3888 = vrot.lane.b32.xlu0 %v3877_v25, %s7738_s19 }
 0x2fc   : > { %v4085_v13 = vsel %vm708_vm8, %v4084_v16, %v9632_v56 }
 0x2fd   : > { %v4088_v9 = vmul.bf16 %v9470_v29, %v4085_v13  ;;  %v3990_v29 = vrot.slane %v3976_v34, %v7812_v21 }
 0x2fe   : > { %5035 = vrot.lane.b32.xlu1 %v5030_v42, %s7749_s10  ;;  %v3885_v42 = vrot.slane %v3878_v8, %v7812_v21  ;;  %v5926_v8 = vrot.slane %v9745_v23, 4 }
 0x2ff   : > { %6032 = vrot.lane.b32.xlu0 %v6022_v15, %s7737_s12  ;;  %v4106_v5 = vrot.slane %v4088_v9, %v7812_v21 }
 0x302   : > { %4229 = vrot.lane.b32.xlu1 %v4219_v49, %s7741_s9  ;;  %v4016_v49 = vld [vmem:[#allocation2 + $0x8] sm:$0x3] }
 0x303   : > { %6147 = vrot.lane.b32.xlu0 %v6131_v51, %s7742_s20  ;;  %v4089_v25 = vmul.bf16 %v4084_v16, %v4016_v49  ;;  %v3983_v51 = vrot.slane %v3972_v41, %v7812_v21 }
 0x305   : > { %v4107_v20 = vcombine.low %v4089_v25, %v4089_v25 }
 0x306   : > { %4344 = vrot.lane.b32.xlu1 %v4328_v39, %s7740_s29  ;;  %v4092_v39 = vcombine.low %v4088_v9, %v4088_v9 }
 0x307   : > { %6261 = vrot.lane.b32.xlu0 %v6251_v18, %s7741_s9 }
 0x30a   : > { %4348 = vrot.lane.b32.xlu1 %v4343_v58, %s7740_s29  ;;  %v4099_v58 = vrot.slane %v4092_v39, %v7812_v21 }
 0x30b   : > { %6376 = vrot.lane.b32.xlu0 %v6360_v60, %s7740_s29 }
 0x30e   : > { %4458 = vrot.lane.b32.xlu1 %v4448_v35, %s7739_s24  ;;  %v4114_v35 = vrot.slane %v4107_v20, %v7812_v21 }
 0x30f   : > { %5574 = vrot.lane.b32.xlu0 %v5564_v31, %s7751_s5 }
 0x312   : > { %4573 = vrot.lane.b32.xlu1 %v4557_v54, %s7746_s25 }
 0x313   : > { %5689 = vrot.lane.b32.xlu0 %v5673_v38, %s7750_s18 }
 0x316   : > { %4577 = vrot.lane.b32.xlu1 %v4572_v61, %s7746_s25 }
 0x317   : > { %5803 = vrot.lane.b32.xlu0 %v5793_v7, %s7736_s7 }
 0x31a   : > { %3771 = vrot.lane.b32.xlu1 %v3761_v10, %s7736_s7 }
 0x31b   : > { %5918 = vrot.lane.b32.xlu0 %v5902_v43, %s7738_s19  ;;  %v6496_v43 = vrot.slane %v9655_v14, 4 }
 0x31e   : > { %3886 = vrot.lane.b32.xlu1 %v3870_v46, %s7738_s19 }
 0x31f   : > { %5145 = vrot.lane.b32.xlu0 %v5135_v36, %s7748_s13 }
 0x320   : > { %v9748_v62 = vpop.permute.xlu1 %6030 }
 0x321   : > { %v6489_v44 = vpop.permute.xlu0 %6488 }
 0x322   : > { %3890 = vrot.lane.b32.xlu1 %v3885_v42, %s7738_s19  ;;  %v6494_v49 = vrot.slane %v6489_v44, 4  ;;  %s10044_s19 = sshll.u32 %s10046_s16, 4 }
 0x323   : > { %3998 = vrot.lane.b32.xlu0 %v3983_v51, %s7737_s12  ;;  %v6725_v51 = vrot.slane %v9674_v30, 4  ;;  %s197_s9 = scalar_lea.vmem %s10017_s4, %s10044_s19 }
 0x324   : > { %v9757_v56 = vpop.permute.xlu1 %6149 }
 0x325   : > { %v6154_v27 = vrot.slane %v9757_v56, 4  ;;  %v6608_v18 = vpop.permute.xlu0 %6607 }
 0x326   : > { %4000 = vrot.lane.b32.xlu1 %v3990_v29, %s7737_s12  ;;  %v6612_v24 = vrot.slane %v6608_v18, 4 }
 0x327   : > { %v6158_v0 = vsel %vm395_vm3, %v6154_v27, %v6155_v4  ;;  %4002 = vrot.lane.b32.xlu0 %v3997_v1, %s7737_s12 }
 0x328   : > { %v6159_v15 = vsel %vm749_vm10, %v9757_v56, %v6158_v0  ;;  %v9774_v3 = vpop.permute.xlu1 %6259  ;;  %v6616_v61 = vsel %vm395_vm3, %v6612_v24, %v6613_v32 }
 0x329   : > { %6163 = vst [vmem:[#allocation3 + $0xa8] sm:$0xcc] %v6159_v15  ;;  %v6617_v47 = vsel %vm475_vm13, %v6608_v18, %v6616_v61  ;;  %v6718_v31 = vpop.permute.xlu0 %6717 }
 0x32a   : > { %4115 = vrot.lane.b32.xlu1 %v4099_v58, %s7742_s20  ;;  %6621 = vst [vmem:[#allocation3 + $0xc8] sm:$0xcc] %v6617_v47 }
 0x32b   : > { %4117 = vrot.lane.b32.xlu0 %v4106_v5, %s7742_s20 }
 0x32c   : > { %v9780_v28 = vpop.permute.xlu1 %6378 }
 0x32d   : > { %v6383_v54 = vrot.slane %v9780_v28, 4  ;;  %v5344_v10 = vpop.permute.xlu0 %5343 }
 0x32e   : > { %4119 = vrot.lane.b32.xlu1 %v4114_v35, %s7742_s20  ;;  %v6723_v35 = vrot.slane %v6718_v31, 4 }
 0x32f   : > { %v6387_v60 = vsel %vm395_vm3, %v6383_v54, %v6384_v48 }
 0x330   : > { %v6388_v52 = vsel %vm708_vm8, %v9780_v28, %v6387_v60  ;;  %v9794_v37 = vpop.permute.xlu1 %5572 }
 0x331   : > { %6392 = vst [vmem:[#allocation3 + $0xb8] sm:$0xcc] %v6388_v52  ;;  %v9810_v38 = vpop.permute.xlu0 %5462  ;;  %v5349_v52 = vrot.slane %v5344_v10, 4 }
 0x332   : > { %v5467_v16 = vrot.slane %v9810_v38, 4 }
 0x334   : > { %v9799_v11 = vpop.permute.xlu1 %5691  ;;  %v5471_v12 = vsel %vm395_vm3, %v5467_v16, %v5468_v55 }
 0x335   : > { %v5696_v50 = vrot.slane %v9799_v11, 4  ;;  %v5472_v41 = vsel %vm10037_vm15, %v9810_v38, %v5471_v12  ;;  %v9820_v6 = vpop.permute.xlu0 %4685 }
 0x336   : > { %5476 = vst [vmem:[#allocation3 + $0x78] sm:$0xcc] %v5472_v41  ;;  %v4691_v55 = vrot.slane %v9820_v6, 4 }
 0x337   : > { %v5700_v22 = vsel %vm395_vm3, %v5696_v50, %v5697_v53 }
 0x338   : > { %v5701_v21 = vsel %vm1398_vm11, %v9799_v11, %v5700_v22  ;;  %v9808_v57 = vpop.permute.xlu1 %5801 }
 0x339   : > { %5705 = vst [vmem:[#allocation3 + $0x88] sm:$0xcc] %v5701_v21  ;;  %v4690_v34 = vpop.permute.xlu0 %4689  ;;  %v5807_v11 = vrot.slane %v9808_v57, 4 }
 0x33c   : > { %v9815_v46 = vpop.permute.xlu1 %5920 }
 0x33d   : > { %v5925_v7 = vrot.slane %v9815_v46, 4  ;;  %v9832_v9 = vpop.permute.xlu0 %4804 }
 0x33f   : > { %v5929_v19 = vsel %vm395_vm3, %v5925_v7, %v5926_v8  ;;  %v4693_v8 = vrot.slane %v4690_v34, 4 }
 0x340   : > { %v5930_v13 = vsel %vm516_vm9, %v9815_v46, %v5929_v19  ;;  %v9828_v42 = vpop.permute.xlu1 %5143 }
 0x341   : > { %5934 = vst [vmem:[#allocation3 + $0x98] sm:$0xcc] %v5930_v13  ;;  %v9835_v4 = vpop.permute.xlu0 %4914 }
 0x344   : > { %v9830_v23 = vpop.permute.xlu1 %5147 }
 0x345   : > { %v9841_v15 = vpop.permute.xlu0 %4918 }
 0x348   : > { %v6491_v2 = vpop.permute.xlu1 %6490 }
 0x349   : > { %v6495_v29 = vrot.slane %v6491_v2, 4  ;;  %v9846_v1 = vpop.permute.xlu0 %5033 }
 0x34b   : > { %v6497_v25 = vsel %vm395_vm3, %v6494_v49, %v6495_v29  ;;  %v6499_v39 = vsel %vm395_vm3, %v6495_v29, %v6496_v43 }
 0x34c   : > { %v6498_v36 = vsel %vm590_vm0, %v6489_v44, %v6497_v25  ;;  %v6500_v0 = vsel %vm590_vm0, %v6491_v2, %v6499_v39  ;;  %v6606_v17 = vpop.permute.xlu1 %6605 }
 0x34d   : > { %6503 = vst [vmem:[#allocation3 + $0xc0] sm:$0x33] %v6498_v36  ;;  %6504 = vst [vmem:[#allocation3 + $0xc8] sm:$0x33] %v6500_v0  ;;  %v6611_v58 = vrot.slane %v6606_v17, 4  ;;  %v9853_v5 = vpop.permute.xlu0 %4227  ;;  %v4809_v0 = vrot.slane %v9832_v9, 4 }
 0x34f   : > { %v6614_v14 = vsel %vm395_vm3, %v6611_v58, %v6612_v24  ;;  %v5351_v24 = vrot.slane %v9761_v26, 4 }
 0x350   : > { %v6615_v20 = vsel %vm475_vm13, %v6606_v17, %v6614_v14  ;;  %v6720_v45 = vpop.permute.xlu1 %6719 }
 0x351   : > { %6620 = vst [vmem:[#allocation3 + $0xc0] sm:$0xcc] %v6615_v20  ;;  %v6724_v44 = vrot.slane %v6720_v45, 4  ;;  %v9859_v38 = vpop.permute.xlu0 %4231 }
 0x353   : > { %v6726_v48 = vsel %vm395_vm3, %v6723_v35, %v6724_v44  ;;  %v6728_v18 = vsel %vm395_vm3, %v6724_v44, %v6725_v51 }
 0x354   : > { %v6727_v32 = vsel %vm356_vm5, %v6718_v31, %v6726_v48  ;;  %v6729_v60 = vsel %vm356_vm5, %v6720_v45, %v6728_v18  ;;  %v5346_v61 = vpop.permute.xlu1 %5345  ;;  %v4920_v18 = vrot.slane %v9835_v4, 4 }
 0x355   : > { %6732 = vst [vmem:[#allocation3 + $0xd0] sm:$0x33] %v6727_v32  ;;  %6733 = vst [vmem:[#allocation3 + $0xd8] sm:$0x33] %v6729_v60  ;;  %v5350_v30 = vrot.slane %v5346_v61, 4  ;;  %v9864_v43 = vpop.permute.xlu0 %4346  ;;  %v4922_v32 = vrot.slane %v9841_v15, 4 }
 0x357   : > { %v5352_v47 = vsel %vm395_vm3, %v5349_v52, %v5350_v30  ;;  %v5354_v53 = vsel %vm395_vm3, %v5350_v30, %v5351_v24 }
 0x358   : > { %v5353_v22 = vsel %vm1746_vm7, %v5344_v10, %v5352_v47  ;;  %v5355_v21 = vsel %vm1746_vm7, %v5346_v61, %v5354_v53  ;;  %v5461_v31 = vpop.permute.xlu1 %5460 }
 0x359   : > { %5358 = vst [vmem:[#allocation3 + $0x70] sm:$0x33] %v5353_v22  ;;  %5359 = vst [vmem:[#allocation3 + $0x78] sm:$0x33] %v5355_v21  ;;  %v5466_v26 = vrot.slane %v5461_v31, 4  ;;  %v9872_v17 = vpop.permute.xlu0 %4456 }
 0x35b   : > { %v5469_v12 = vsel %vm395_vm3, %v5466_v26, %v5467_v16 }
 0x35c   : > { %v5470_v41 = vsel %vm10036_vm14, %v5461_v31, %v5469_v12  ;;  %v4688_v19 = vpop.permute.xlu1 %4687  ;;  %v7683_v13 = vld [vmem:[#allocation3 + $0xc0] ss:$16 sps:$4 sm:$0xff]   ;;  %v7685_v2 = vld [vmem:[#allocation3 + $0xc4] ss:$16 sps:$4 sm:$0xff]   ;;  %v7686_v49 = vld [vmem:[#allocation3 + $0xc8] ss:$16 sps:$4 sm:$0xff]  }
 0x35d   : > { %5475 = vst [vmem:[#allocation3 + $0x70] sm:$0xcc] %v5470_v41  ;;  %v4692_v10 = vrot.slane %v4688_v19, 4  ;;  %v7688_v29 = vld [vmem:[#allocation3 + $0xcc] ss:$16 sps:$4 sm:$0xff]   ;;  %6937 = vmatprep.subr.bf16.mxu0 %v7685_v2  ;;  %v9876_v51 = vpop.permute.xlu0 %4460 }
 0x35e   : > { %6978 = vmatprep.subr.bf16.mxu1 %v7688_v29  ;;  %6938 = vmatpush1.bf16.msra.mxu0 %v7683_v13  ;;  %v4235_v13 = vrot.slane %v9859_v38, 4 }
 0x35f   : > { %v4694_v25 = vsel %vm395_vm3, %v4691_v55, %v4692_v10  ;;  %v4696_v39 = vsel %vm395_vm3, %v4692_v10, %v4693_v8  ;;  %6979 = vmatpush1.bf16.msra.mxu1 %v7686_v49 }
 0x360   : > { %v4695_v16 = vsel %vm356_vm5, %v9820_v6, %v4694_v25  ;;  %v4697_v34 = vsel %vm356_vm5, %v4688_v19, %v4696_v39  ;;  %v4803_v36 = vpop.permute.xlu1 %4802  ;;  %vm10038_vm5 = vcmask 64512   ;;  %v4233_v19 = vrot.slane %v9853_v5, 4 }
 0x361   : > { %4700 = vst [vmem:[#allocation3 + $0x40] sm:$0x33] %v4695_v16  ;;  %4701 = vst [vmem:[#allocation3 + $0x48] sm:$0x33] %v4697_v34  ;;  %v4808_v58 = vrot.slane %v4803_v36, 4  ;;  %v9883_v60 = vpop.permute.xlu0 %4575 }
 0x362   : > { %vm10039_vm7 = vmmov %vm10038_vm5 }
 0x363   : > { %v4811_v14 = vsel %vm395_vm3, %v4808_v58, %v4809_v0 }
 0x364   : > { %v4812_v20 = vsel %vm1439_vm12, %v4803_v36, %v4811_v14  ;;  %v4807_v45 = vpop.permute.xlu1 %4806  ;;  %v6038_v36 = vrot.slane %v9667_v40, 4 }
 0x365   : > { %4817 = vst [vmem:[#allocation3 + $0x40] sm:$0xcc] %v4812_v20  ;;  %v4810_v6 = vrot.slane %v4807_v45, 4  ;;  %v9891_v22 = vpop.permute.xlu0 %3769 }
 0x367   : > { %v4813_v35 = vsel %vm395_vm3, %v4809_v0, %v4810_v6  ;;  %v6036_v0 = vrot.slane %v9748_v62, 4 }
 0x368   : > { %v4814_v44 = vsel %vm1439_vm12, %v9832_v9, %v4813_v35  ;;  %v4917_v48 = vpop.permute.xlu1 %4916  ;;  %v5038_v9 = vrot.slane %v9846_v1, 4  ;;  %vm10040_vm12 = vcmask 56320  }
 0x369   : > { %4818 = vst [vmem:[#allocation3 + $0x48] sm:$0xcc] %v4814_v44  ;;  %v4921_v61 = vrot.slane %v4917_v48, 4  ;;  %v9895_v55 = vpop.permute.xlu0 %3773  ;;  %vm10041_vm15 = vmmov %vm10040_vm12 }
 0x36b   : > { %v4923_v24 = vsel %vm395_vm3, %v4920_v18, %v4921_v61  ;;  %v4925_v52 = vsel %vm395_vm3, %v4921_v61, %v4922_v32 }
 0x36c   : > { %v4924_v30 = vsel %vm10038_vm5, %v9835_v4, %v4923_v24  ;;  %v4926_v47 = vsel %vm10039_vm7, %v4917_v48, %v4925_v52  ;;  %v5032_v53 = vpop.permute.xlu1 %5031 }
 0x36d   : > { %4929 = vst [vmem:[#allocation3 + $0x50] sm:$0x33] %v4924_v30  ;;  %4930 = vst [vmem:[#allocation3 + $0x58] sm:$0x33] %v4926_v47  ;;  %v5037_v15 = vrot.slane %v5032_v53, 4  ;;  %v9902_v2 = vpop.permute.xlu0 %3888  ;;  %v4464_v30 = vrot.slane %v9876_v51, 4 }
 0x36f   : > { %v5040_v21 = vsel %vm395_vm3, %v5037_v15, %v5038_v9  ;;  %v6267_v15 = vrot.slane %v9681_v63, 4  ;;  %v4580_v63 = vrot.slane %v9883_v60, 4 }
 0x370   : > { %v5041_v31 = vsel %vm10040_vm12, %v5032_v53, %v5040_v21  ;;  %v5036_v26 = vpop.permute.xlu1 %5035  ;;  %v6265_v21 = vrot.slane %v9774_v3, 4 }
 0x371   : > { %5046 = vst [vmem:[#allocation3 + $0x50] sm:$0xcc] %v5041_v31  ;;  %v5039_v12 = vrot.slane %v5036_v26, 4  ;;  %v6033_v34 = vpop.permute.xlu0 %6032 }
 0x372   : > { %v6037_v58 = vrot.slane %v6033_v34, 4 }
 0x373   : > { %v5042_v4 = vsel %vm395_vm3, %v5038_v9, %v5039_v12 }
 0x374   : > { %v5043_v8 = vsel %vm10041_vm15, %v9846_v1, %v5042_v4  ;;  %v4230_v41 = vpop.permute.xlu1 %4229  ;;  %v4351_v1 = vrot.slane %v9864_v43, 4  ;;  %v6039_v20 = vsel %vm395_vm3, %v6036_v0, %v6037_v58 }
 0x375   : > { %5047 = vst [vmem:[#allocation3 + $0x58] sm:$0xcc] %v5043_v8  ;;  %v4234_v10 = vrot.slane %v4230_v41, 4  ;;  %v6040_v35 = vsel %vm630_vm2, %v9748_v62, %v6039_v20  ;;  %v6148_v48 = vpop.permute.xlu0 %6147  ;;  %v4462_v62 = vrot.slane %v9872_v17, 4 }
 0x376   : > { %6045 = vst [vmem:[#allocation3 + $0xa0] sm:$0x33] %v6040_v35  ;;  %v6153_v18 = vrot.slane %v6148_v48, 4 }
 0x377   : > { %v4236_v49 = vsel %vm395_vm3, %v4233_v19, %v4234_v10  ;;  %v4238_v29 = vsel %vm395_vm3, %v4234_v10, %v4235_v13 }
 0x378   : > { %v4237_v25 = vsel %vm823_vm1, %v9853_v5, %v4236_v49  ;;  %v4239_v39 = vsel %vm823_vm1, %v4230_v41, %v4238_v29  ;;  %v4345_v16 = vpop.permute.xlu1 %4344  ;;  %v6041_v5 = vsel %vm395_vm3, %v6037_v58, %v6038_v36  ;;  %v6156_v61 = vsel %vm395_vm3, %v6153_v18, %v6154_v27 }
 0x379   : > { %4242 = vst [vmem:[#allocation3 + $0x20] sm:$0x33] %v4237_v25  ;;  %4243 = vst [vmem:[#allocation3 + $0x28] sm:$0x33] %v4239_v39  ;;  %v4350_v38 = vrot.slane %v4345_v16, 4  ;;  %v6042_v44 = vsel %vm630_vm2, %v6033_v34, %v6041_v5  ;;  %v6157_v47 = vsel %vm749_vm10, %v6148_v48, %v6156_v61  ;;  %v6262_v53 = vpop.permute.xlu0 %6261  ;;  %v5578_v34 = vrot.slane %v9794_v37, 4 }
 0x37a   : > { %6046 = vst [vmem:[#allocation3 + $0xa8] sm:$0x33] %v6042_v44  ;;  %6162 = vst [vmem:[#allocation3 + $0xa0] sm:$0xcc] %v6157_v47  ;;  %v6266_v56 = vrot.slane %v6262_v53, 4  ;;  %v3775_v36 = vrot.slane %v9891_v22, 4 }
 0x37b   : > { %v4353_v14 = vsel %vm395_vm3, %v4350_v38, %v4351_v1 }
 0x37c   : > { %v4354_v45 = vsel %vm708_vm8, %v4345_v16, %v4353_v14  ;;  %v4349_v6 = vpop.permute.xlu1 %4348  ;;  %v6268_v31 = vsel %vm395_vm3, %v6265_v21, %v6266_v56  ;;  %v6270_v26 = vsel %vm395_vm3, %v6266_v56, %v6267_v15 }
 0x37d   : > { %4359 = vst [vmem:[#allocation3 + $0x20] sm:$0xcc] %v4354_v45  ;;  %v4352_v40 = vrot.slane %v4349_v6, 4  ;;  %v6269_v8 = vsel %vm823_vm1, %v9774_v3, %v6268_v31  ;;  %v6271_v41 = vsel %vm823_vm1, %v6262_v53, %v6270_v26  ;;  %v6377_v19 = vpop.permute.xlu0 %6376  ;;  %v5809_v53 = vrot.slane %v9713_v33, 4 }
 0x37e   : > { %6274 = vst [vmem:[#allocation3 + $0xb0] sm:$0x33] %v6269_v8  ;;  %6275 = vst [vmem:[#allocation3 + $0xb8] sm:$0x33] %v6271_v41  ;;  %v6382_v10 = vrot.slane %v6377_v19, 4  ;;  %v5149_v41 = vrot.slane %v9828_v42, 4 }
 0x37f   : > { %v4355_v32 = vsel %vm395_vm3, %v4351_v1, %v4352_v40  ;;  %v5580_v1 = vrot.slane %v9699_v59, 4 }
 0x380   : > { %v4356_v24 = vsel %vm708_vm8, %v9864_v43, %v4355_v32  ;;  %v4459_v52 = vpop.permute.xlu1 %4458 }
 0x381   : > { %4360 = vst [vmem:[#allocation3 + $0x28] sm:$0xcc] %v4356_v24  ;;  %v4463_v9 = vrot.slane %v4459_v52, 4  ;;  %v5575_v39 = vpop.permute.xlu0 %5574 }
 0x382   : > { %v5579_v38 = vrot.slane %v5575_v39, 4 }
 0x383   : > { %v4465_v27 = vsel %vm395_vm3, %v4462_v62, %v4463_v9  ;;  %v4467_v43 = vsel %vm395_vm3, %v4463_v9, %v4464_v30 }
 0x384   : > { %v4466_v51 = vsel %vm590_vm0, %v9872_v17, %v4465_v27  ;;  %v4468_v12 = vsel %vm590_vm0, %v4459_v52, %v4467_v43  ;;  %v4574_v4 = vpop.permute.xlu1 %4573  ;;  %v6385_v17 = vsel %vm395_vm3, %v6382_v10, %v6383_v54  ;;  %v3777_v54 = vrot.slane %v9895_v55, 4 }
 0x385   : > { %4471 = vst [vmem:[#allocation3 + $0x30] sm:$0x33] %v4466_v51  ;;  %4472 = vst [vmem:[#allocation3 + $0x38] sm:$0x33] %v4468_v12  ;;  %v4579_v13 = vrot.slane %v4574_v4, 4  ;;  %v6386_v3 = vsel %vm708_vm8, %v6377_v19, %v6385_v17  ;;  %v5581_v0 = vsel %vm395_vm3, %v5578_v34, %v5579_v38  ;;  %v5583_v58 = vsel %vm395_vm3, %v5579_v38, %v5580_v1  ;;  %v5690_v45 = vpop.permute.xlu0 %5689 }
 0x386   : > { %6391 = vst [vmem:[#allocation3 + $0xb0] sm:$0xcc] %v6386_v3  ;;  %vm10042_vm0 = vcmask 982016   ;;  %v7689_v6 = vld [vmem:[#allocation3 + $0xa8] ss:$16 sps:$4 sm:$0xff]   ;;  %v5695_v55 = vrot.slane %v5690_v45, 4 }
 0x387   : > { %v4582_v49 = vsel %vm395_vm3, %v4579_v13, %v4580_v63  ;;  %v5582_v59 = vsel %vm10042_vm0, %v9794_v37, %v5581_v0  ;;  %vm10043_vm1 = vmmov %vm10042_vm0  ;;  %v7691_v35 = vld [vmem:[#allocation3 + $0xac] ss:$16 sps:$4 sm:$0xff]   ;;  %v5151_v19 = vrot.slane %v9830_v23, 4 }
 0x388   : > { %v4583_v29 = vsel %vm475_vm13, %v4574_v4, %v4582_v49  ;;  %v4578_v25 = vpop.permute.xlu1 %4577  ;;  %v5584_v5 = vsel %vm10043_vm1, %v5575_v39, %v5583_v58  ;;  %5587 = vst [vmem:[#allocation3 + $0x80] sm:$0x33] %v5582_v59  ;;  %6980 = vmatprep.subr.bf16.mxu1 %v7691_v35  ;;  %v5698_v37 = vsel %vm395_vm3, %v5695_v55, %v5696_v50  ;;  %v7709_v35 = vld [vmem:[#allocation3 + $0x44] ss:$16 sps:$4 sm:$0xff]  }
 0x389   : > { %4588 = vst [vmem:[#allocation3 + $0x30] sm:$0xcc] %v4583_v29  ;;  %v4581_v16 = vrot.slane %v4578_v25, 4  ;;  %5588 = vst [vmem:[#allocation3 + $0x88] sm:$0x33] %v5584_v5  ;;  %6981 = vmatpush1.bf16.msra.mxu1 %v7689_v6  ;;  %v5699_v24 = vsel %vm1398_vm11, %v5690_v45, %v5698_v37  ;;  %v5804_v52 = vpop.permute.xlu0 %5803 }
 0x38a   : > { %5704 = vst [vmem:[#allocation3 + $0x80] sm:$0xcc] %v5699_v24  ;;  %v5808_v50 = vrot.slane %v5804_v52, 4  ;;  %v7707_v37 = vld [vmem:[#allocation3 + $0x40] ss:$16 sps:$4 sm:$0xff]  }
 0x38b   : > { %v4584_v28 = vsel %vm395_vm3, %v4580_v63, %v4581_v16 }
 0x38c   : > { %v4585_v14 = vsel %vm475_vm13, %v9883_v60, %v4584_v28  ;;  %v3772_v20 = vpop.permute.xlu1 %3771  ;;  %v3893_v60 = vrot.slane %v9902_v2, 4  ;;  %v5810_v9 = vsel %vm395_vm3, %v5807_v11, %v5808_v50  ;;  %v5812_v15 = vsel %vm395_vm3, %v5808_v50, %v5809_v53  ;;  %v6734_v11 = vld [vmem:[%s10015_s2] sm:$0x3] }
 0x38d   : > { %4589 = vst [vmem:[#allocation3 + $0x38] sm:$0xcc] %v4585_v14  ;;  %v3776_v44 = vrot.slane %v3772_v20, 4  ;;  %v7692_v62 = vld [vmem:[#allocation3 + $0xa0] ss:$16 sps:$4 sm:$0xff]   ;;  %v5811_v27 = vsel %vm397_vm4, %v9808_v57, %v5810_v9  ;;  %v5813_v33 = vsel %vm397_vm4, %v5804_v52, %v5812_v15  ;;  %v5919_v43 = vpop.permute.xlu0 %5918  ;;  %v6767_v50 = vld [vmem:[%s8109_s14] sm:$0xff] }
 0x38e   : > { %v7694_v30 = vld [vmem:[#allocation3 + $0xa4] ss:$16 sps:$4 sm:$0xff]   ;;  %5816 = vst [vmem:[#allocation3 + $0x90] sm:$0x33] %v5811_v27  ;;  %5817 = vst [vmem:[#allocation3 + $0x98] sm:$0x33] %v5813_v33  ;;  %v6931_v9 = vcombine.high %v6767_v50, %v6767_v50 }
 0x38f   : > { %v3778_v48 = vsel %vm395_vm3, %v3775_v36, %v3776_v44  ;;  %v3780_v40 = vsel %vm395_vm3, %v3776_v44, %v3777_v54  ;;  %6939 = vmatprep.subr.bf16.mxu0 %v7694_v30  ;;  %v5924_v26 = vrot.slane %v5919_v43, 4 }
 0x390   : > { %v3779_v18 = vsel %vm397_vm4, %v9891_v22, %v3778_v48  ;;  %v3781_v32 = vsel %vm397_vm4, %v3772_v20, %v3780_v40  ;;  %v3887_v61 = vpop.permute.xlu1 %3886  ;;  %6940 = vmatpush1.bf16.msra.mxu0 %v7692_v62  ;;  %v7712_v48 = vld [vmem:[#allocation3 + $0x4c] ss:$16 sps:$4 sm:$0xff]   ;;  %v7713_v24 = vld [vmem:[#allocation3 + $0x20] ss:$16 sps:$4 sm:$0xff]  }
 0x391   : > { %3784 = vst [vmem:[#allocation3] sm:$0x33] %v3779_v18  ;;  %3785 = vst [vmem:[#allocation3 + $0x8] sm:$0x33] %v3781_v32  ;;  %v3892_v47 = vrot.slane %v3887_v61, 4  ;;  %v5927_v12 = vsel %vm395_vm3, %v5924_v26, %v5925_v7  ;;  %v5146_v8 = vpop.permute.xlu0 %5145 }
 0x392   : > { %v5928_v57 = vsel %vm516_vm9, %v5919_v43, %v5927_v12  ;;  %v5150_v13 = vrot.slane %v5146_v8, 4  ;;  %v7710_v18 = vld [vmem:[#allocation3 + $0x48] ss:$16 sps:$4 sm:$0xff]   ;;  %v7715_v32 = vld [vmem:[#allocation3 + $0x24] ss:$16 sps:$4 sm:$0xff]  }
 0x393   : > { %v3895_v22 = vsel %vm395_vm3, %v3892_v47, %v3893_v60  ;;  %5933 = vst [vmem:[#allocation3 + $0x90] sm:$0xcc] %v5928_v57 }
 0x394   : > { %v3896_v21 = vsel %vm516_vm9, %v3887_v61, %v3895_v22  ;;  %v3891_v56 = vpop.permute.xlu1 %3890  ;;  %v5152_v10 = vsel %vm395_vm3, %v5149_v41, %v5150_v13  ;;  %v5154_v46 = vsel %vm395_vm3, %v5150_v13, %v5151_v19  ;;  %v7718_v61 = vld [vmem:[#allocation3 + $0x2c] ss:$16 sps:$4 sm:$0xff]   ;;  %v7716_v52 = vld [vmem:[#allocation3 + $0x28] ss:$16 sps:$4 sm:$0xff]  }
 0x395   : > { %3901 = vst [vmem:[#allocation3] sm:$0xcc] %v3896_v21  ;;  %v3894_v31 = vrot.slane %v3891_v56, 4  ;;  %v5155_v17 = vsel %vm1786_vm6, %v5146_v8, %v5154_v46  ;;  %v3999_v29 = vpop.permute.xlu0 %3998  ;;  %v7695_v25 = vld [vmem:[#allocation3 + $0x88] ss:$16 sps:$4 sm:$0xff]   ;;  %v6768_v22 = vld [vmem:[%s8109_s14 + $0x8] sm:$0xff] }
 0x396   : > { %v7697_v3 = vld [vmem:[#allocation3 + $0x8c] ss:$16 sps:$4 sm:$0xff]   ;;  %5159 = vst [vmem:[#allocation3 + $0x68] sm:$0x33] %v5155_v17  ;;  %v4004_v39 = vrot.slane %v3999_v29, 4  ;;  %v6932_v21 = vcombine.high %v6768_v22, %v6768_v22 }
 0x397   : > { %v3897_v51 = vsel %vm395_vm3, %v3893_v60, %v3894_v31  ;;  %6982 = vmatprep.subr.bf16.mxu1 %v7697_v3 }
 0x398   : > { %v3898_v4 = vsel %vm516_vm9, %v9902_v2, %v3897_v51  ;;  %v4001_v63 = vpop.permute.xlu1 %4000  ;;  %v5153_v2 = vsel %vm1786_vm6, %v9828_v42, %v5152_v10  ;;  %6983 = vmatpush1.bf16.msra.mxu1 %v7695_v25 }
 0x399   : > { %3902 = vst [vmem:[#allocation3 + $0x8] sm:$0xcc] %v3898_v4  ;;  %v4005_v49 = vrot.slane %v4001_v63, 4  ;;  %5158 = vst [vmem:[#allocation3 + $0x60] sm:$0x33] %v5153_v2  ;;  %v4003_v16 = vpop.permute.xlu0 %4002 }
 0x39a   : > { %v7698_v34 = vld [vmem:[#allocation3 + $0x80] ss:$16 sps:$4 sm:$0xff]   ;;  %v7700_v38 = vld [vmem:[#allocation3 + $0x84] ss:$16 sps:$4 sm:$0xff]   ;;  %v4006_v28 = vrot.slane %v4003_v16, 4 }
 0x39b   : > { %v4007_v23 = vsel %vm395_vm3, %v4004_v39, %v4005_v49  ;;  %6941 = vmatprep.subr.bf16.mxu0 %v7700_v38 }
 0x39c   : > { %v4116_v7 = vpop.permute.xlu1 %4115  ;;  %v4008_v1 = vsel %vm630_vm2, %v3999_v29, %v4007_v23  ;;  %v4009_v42 = vsel %vm395_vm3, %v4005_v49, %v4006_v28  ;;  %6942 = vmatpush1.bf16.msra.mxu0 %v7698_v34 }
 0x39d   : > { %4013 = vst [vmem:[#allocation3 + $0x10] sm:$0x33] %v4008_v1  ;;  %v4121_v54 = vrot.slane %v4116_v7, 4  ;;  %v4010_v58 = vsel %vm630_vm2, %v4001_v63, %v4009_v42  ;;  %v4118_v14 = vpop.permute.xlu0 %4117  ;;  %v7704_v45 = vld [vmem:[#allocation3 + $0x68] ss:$16 sps:$4 sm:$0xff]  }
 0x39e   : > { %4014 = vst [vmem:[#allocation3 + $0x18] sm:$0x33] %v4010_v58  ;;  %v4122_v5 = vrot.slane %v4118_v14, 4  ;;  %v7706_v6 = vld [vmem:[#allocation3 + $0x6c] ss:$16 sps:$4 sm:$0xff]  }
 0x39f   : > { %6984 = vmatprep.subr.bf16.mxu1 %v7706_v6 }
 0x3a0   : > { %v4120_v36 = vpop.permute.xlu1 %4119  ;;  %v7701_v20 = vld [vmem:[#allocation3 + $0x60] ss:$16 sps:$4 sm:$0xff]   ;;  %v7703_v59 = vld [vmem:[#allocation3 + $0x64] ss:$16 sps:$4 sm:$0xff]   ;;  %v4124_v44 = vsel %vm395_vm3, %v4121_v54, %v4122_v5  ;;  %6985 = vmatpush1.bf16.msra.mxu1 %v7704_v45 }
 0x3a1   : > { %v4123_v0 = vrot.slane %v4120_v36, 4  ;;  %6943 = vmatprep.subr.bf16.mxu0 %v7703_v59  ;;  %v4125_v40 = vsel %vm749_vm10, %v4116_v7, %v4124_v44  ;;  %6986 = vmatprep.subr.bf16.mxu1 %v7712_v48 }
 0x3a2   : > { %6944 = vmatpush1.bf16.msra.mxu0 %v7701_v20  ;;  %4130 = vst [vmem:[#allocation3 + $0x10] sm:$0xcc] %v4125_v40 }
 0x3a3   : > { %v4126_v55 = vsel %vm395_vm3, %v4122_v5, %v4123_v0  ;;  %6945 = vmatprep.subr.bf16.mxu0 %v7709_v35 }
 0x3a4   : > { %v4127_v60 = vsel %vm749_vm10, %v4118_v14, %v4126_v55  ;;  %6987 = vmatpush1.bf16.msra.mxu1 %v7710_v18 }
 0x3a5   : > { %4131 = vst [vmem:[#allocation3 + $0x18] sm:$0xcc] %v4127_v60  ;;  %6988 = vmatprep.subr.bf16.mxu1 %v7718_v61 }
 0x3a6   : > { %6946 = vmatpush1.bf16.msra.mxu0 %v7707_v37 }
 0x3a7   : > { %6947 = vmatprep.subr.bf16.mxu0 %v7715_v32 }
 0x3a8   : > { %6989 = vmatpush1.bf16.msra.mxu1 %v7716_v52 }
 0x3a9   : > { %v7719_v62 = vld [vmem:[#allocation3] ss:$16 sps:$4 sm:$0xff]   ;;  %v7721_v30 = vld [vmem:[#allocation3 + $0x4] ss:$16 sps:$4 sm:$0xff]  }
 0x3aa   : > { %6948 = vmatpush1.bf16.msra.mxu0 %v7713_v24 }
 0x3ab   : > { %6949 = vmatprep.subr.bf16.mxu0 %v7721_v30 }
 0x3ac   : > { %v7722_v47 = vld [vmem:[#allocation3 + $0x8] ss:$16 sps:$4 sm:$0xff]   ;;  %v7724_v53 = vld [vmem:[#allocation3 + $0xc] ss:$16 sps:$4 sm:$0xff]  }
 0x3ad   : > { %6990 = vmatprep.subr.bf16.mxu1 %v7724_v53 }
 0x3ae   : > { %6950 = vmatpush1.bf16.msra.mxu0 %v7719_v62  ;;  %6991 = vmatpush1.bf16.msra.mxu1 %v7722_v47 }
 0x3b1   : > { %6968 = vmatmul.mubr.bf16.vlgmr.msra.gmra.mxu0 %v6734_v11  ;;  %7009 = vmatmul.mubr.bf16.vlgmr.msra.gmra.mxu1 %v6734_v11 }
 0x471   : > { %v6969_v15 = vpop.f32.mrf.mxu0  ;;  %v7010_v27 = vpop.f32.mrf.mxu1 }
 0x472   : > { %v6970_v56 = vadd.f32 %v6969_v15, %v6767_v50  ;;  %v7011_v43 = vadd.f32 %v7010_v27, %v6768_v22 }
 0x473   : > { %v6971_v33 = vpop.f32.mrf.mxu0  ;;  %v7012_v51 = vpop.f32.mrf.mxu1 }
 0x474   : > { %v7017_v31 = vmax.f32 %v6970_v56, 0.0  ;;  %v6972_v26 = vadd.f32 %v6971_v33, %v6931_v9  ;;  %v7013_v4 = vadd.f32 %v7012_v51, %v6932_v21  ;;  %v7019_v8 = vmax.f32 %v7011_v43, 0.0 }
 0x475   : > { %v6973_v12 = vpop.f32.mrf.mxu0  ;;  %v7014_v57 = vpop.f32.mrf.mxu1 }
 0x476   : > { %v7018_v63 = vmax.f32 %v6972_v26, 0.0  ;;  %v7020_v19 = vmax.f32 %v7013_v4, 0.0 }
 0x477   : > { %v6974_v41 = vpop.f32.mrf.mxu0  ;;  %v7015_v10 = vpop.f32.mrf.mxu1 }
 0x478   : > { %v7025_v13 = vcombine.low %v7017_v31, %v7018_v63  ;;  %v7026_v46 = vcombine.low %v7019_v8, %v7020_v19 }
 0x47a   : > { %7029 = vst [vmem:[%s197_s9] sm:$0xff] %v7025_v13  ;;  %7030 = vst [vmem:[%s197_s9 + $0x8] sm:$0xff] %v7026_v46 }
 0x47b PF: > { %s14_s15 = sadd.s32 1, %s7733_s15  }
 0x47c   : > { %p11_p4 = scmp.ge.s32.totalorder %s14_s15, 4  }
 0x47e   :  { %13 = sbr.rel (!%p11_p4) target bundleno = 1 (0x1), region = 66 }

</bundles_post_ra>
